<compile_context>
chip_gen: v7x
topology: tpu7x:2x2x1
jax: 0.10.0
libtpu: 0.0.40
codegen_flags: <defaults>
</compile_context>

<pallas_src>
import functools

import jax
import jax.numpy as jnp
from jax.experimental import pallas as pl
from jax.experimental.pallas import tpu as pltpu


def _round_up(x, m):
    return ((x + m - 1) // m) * m


def exrnn_fused_kernel(x_ref, h0_ref, w1x_ref, w1h_ref, b1_ref, w2_ref, b2_ref,
                       out_ref, hid_ref, xw_ref, *, seq_len, rows):
    """Whole-sequence RNN.  All refs are full arrays resident in VMEM.

    x_ref:   (T*Bp, Ip)  flattened padded inputs
    h0_ref:  (Bp, Hp)    initial hidden state
    w1x_ref: (Ip, Hp), w1h_ref: (Hp, Hp), b1_ref: (1, Hp)
    w2_ref:  (Hp, Op),  b2_ref: (1, Op)
    out_ref: (T*Bp, Op)  logits slab
    hid_ref: (T*Bp, Hp)  hidden-state slab
    xw_ref:  (T*Bp, Hp)  VMEM scratch for the hoisted input projection
    """
    # ---- Hoisted input projection for ALL timesteps: one big MXU call. ----
    xw_ref[...] = (jnp.dot(x_ref[...], w1x_ref[...],
                           preferred_element_type=jnp.float32)
                   + b1_ref[...])

    # Loop-invariant weight load hoisted above the recurrence.
    w1h = w1h_ref[...]

    # ---- Serial recurrence: only h @ w1h + add + tanh on the critical path. ----
    # T is tiny and static, so fully unroll with static slice offsets
    # (equivalent to lax.fori_loop(..., unroll=True) for this trip count).
    h = h0_ref[...].astype(jnp.float32)
    for t in range(seq_len):
        r0 = t * rows
        xw_t = xw_ref[pl.ds(r0, rows), :]                       # (Bp, Hp)
        h = jnp.tanh(xw_t + jnp.dot(h, w1h,
                                    preferred_element_type=jnp.float32))
        hid_ref[pl.ds(r0, rows), :] = h

    # ---- Hoisted output projection: one matmul + one lane-dense store. ----
    out_ref[...] = (jnp.dot(hid_ref[...], w2_ref[...],
                            preferred_element_type=jnp.float32)
                    + b2_ref[...]).astype(out_ref.dtype)


def exrnn_forward_seq(x_seq, h0, w1, b1, w2, b2):
    """Run the ExRNN cell over a whole sequence in a single pallas_call.

    x_seq: (T, B, I) float32
    h0:    (B, H)
    w1:    (H, I+H)   PyTorch nn.Linear(I+H, H).weight
    b1:    (H,)
    w2:    (O, H)     PyTorch nn.Linear(H, O).weight
    b2:    (O,)
    Returns (outputs (T, B, O), hiddens (T, B, H)).
    """
    T, B, I = x_seq.shape
    H = w1.shape[0]
    O = w2.shape[0]
    assert w1.shape == (H, I + H) and b1.shape == (H,)
    assert w2.shape == (O, H) and b2.shape == (O,)

    # Split/transpose in2hidden so the concat becomes two matmuls.
    w1x = w1[:, :I].T                   # (I, H)
    w1h = w1[:, I:].T                   # (H, H)
    w2t = w2.T                          # (H, O)

    # TPU-friendly padding: sublane (rows) multiple of 8, lane (cols) multiple of 128.
    Bp = _round_up(max(B, 8), 8)
    Ip = _round_up(I, 128)
    Hp = _round_up(H, 128)
    Op = _round_up(O, 128)

    f32 = jnp.float32
    # Flatten time into rows so the kernel works purely on 2-D tiles.
    x_p = (jnp.zeros((T, Bp, Ip), f32)
           .at[:, :B, :I].set(x_seq.astype(f32))
           .reshape(T * Bp, Ip))
    h0_p = jnp.zeros((Bp, Hp), f32).at[:B, :H].set(h0.astype(f32))
    w1x_p = jnp.zeros((Ip, Hp), f32).at[:I, :H].set(w1x)
    w1h_p = jnp.zeros((Hp, Hp), f32).at[:H, :H].set(w1h)
    b1_p = jnp.zeros((1, Hp), f32).at[0, :H].set(b1)       # zero pad -> tanh(0)=0
    w2_p = jnp.zeros((Hp, Op), f32).at[:H, :O].set(w2t)
    b2_p = jnp.zeros((1, Op), f32).at[0, :O].set(b2)

    def vmem_spec():
        return pl.BlockSpec(memory_space=pltpu.MemorySpace.VMEM)

    out_p, hid_p = pl.pallas_call(
        functools.partial(exrnn_fused_kernel, seq_len=T, rows=Bp),
        out_shape=(
            jax.ShapeDtypeStruct((T * Bp, Op), f32),
            jax.ShapeDtypeStruct((T * Bp, Hp), f32),
        ),
        in_specs=[vmem_spec() for _ in range(7)],
        out_specs=(vmem_spec(), vmem_spec()),
        scratch_shapes=[pltpu.VMEM((T * Bp, Hp), f32)],     # hoisted x @ w1x + b1
    )(x_p, h0_p, w1x_p, w1h_p, b1_p, w2_p, b2_p)

    out = out_p.reshape(T, Bp, Op)[:, :B, :O]
    hid = hid_p.reshape(T, Bp, Hp)[:, :B, :H]
    return out, hid


def exrnn_forward(x, hidden_state, w1, b1, w2, b2):
    """Single-step forward with exactly ExRNN.forward(x, hidden_state) semantics."""
    out_seq, hid_seq = exrnn_forward_seq(x[None], hidden_state, w1, b1, w2, b2)
    return out_seq[0], hid_seq[0]


def _ref_rnn(x_seq, h0, w1, b1, w2, b2):
    """Pure-JAX reference replicating the PyTorch module step-by-step."""
    def step(h, x):
        combined = jnp.concatenate([x, h], axis=1)
        hidden = jnp.tanh(combined @ w1.T + b1)
        output = hidden @ w2.T + b2
        return hidden, (output, hidden)
    _, (outs, hids) = jax.lax.scan(step, h0, x_seq)
    return outs, hids


if __name__ == "__main__":
    # Keep the reference matmuls in full f32 so it matches the kernel's f32 MXU acc.
    jax.config.update("jax_default_matmul_precision", "highest")

    # Module constants: hidden_size = 64, output_size = 2. Small everything else.
    input_size = 32
    hidden_size = 64
    output_size = 2
    batch = 2
    seq_len = 16

    key = jax.random.PRNGKey(0)
    k_x, k_w1, k_b1, k_w2, k_b2 = jax.random.split(key, 5)

    # PyTorch nn.Linear weight layouts.
    w1 = jax.random.normal(k_w1, (hidden_size, input_size + hidden_size), jnp.float32) * 0.1
    b1 = jax.random.normal(k_b1, (hidden_size,), jnp.float32) * 0.1
    w2 = jax.random.normal(k_w2, (output_size, hidden_size), jnp.float32) * 0.1
    b2 = jax.random.normal(k_b2, (output_size,), jnp.float32) * 0.1

    x_seq = jax.random.normal(k_x, (seq_len, batch, input_size), jnp.float32)
    h0 = jnp.zeros((batch, hidden_size), jnp.float32)   # init_hidden(bs)

    # Fused-sequence kernel (one launch, everything VMEM-resident, projections hoisted).
    outs, hids = exrnn_forward_seq(x_seq, h0, w1, b1, w2, b2)
    jax.block_until_ready((outs, hids))

    outs_ref, hids_ref = _ref_rnn(x_seq, h0, w1, b1, w2, b2)
    assert outs.shape == (seq_len, batch, output_size)
    assert hids.shape == (seq_len, batch, hidden_size)
    assert jnp.allclose(hids, hids_ref, atol=1e-4, rtol=1e-4), "hidden mismatch"
    assert jnp.allclose(outs, outs_ref, atol=1e-4, rtol=1e-4), "output mismatch"

    # Single-step API — exactly the module's forward(x, hidden_state) signature.
    out1, hid1 = exrnn_forward(x_seq[0], h0, w1, b1, w2, b2)
    jax.block_until_ready((out1, hid1))
    assert jnp.allclose(out1, outs_ref[0], atol=1e-4, rtol=1e-4), "step output mismatch"
    assert jnp.allclose(hid1, hids_ref[0], atol=1e-4, rtol=1e-4), "step hidden mismatch"

    print("KERNEL_OK")
</pallas_src>

<mosaic_0001>
module attributes {stable_mosaic.version = 11 : i64} {
  func.func @exrnn_fused_kernel(%arg0: memref<128x128xf32, #tpu.memory_space<vmem>>, %arg1: memref<8x128xf32, #tpu.memory_space<vmem>>, %arg2: memref<128x128xf32, #tpu.memory_space<vmem>>, %arg3: memref<128x128xf32, #tpu.memory_space<vmem>>, %arg4: memref<1x128xf32, #tpu.memory_space<vmem>>, %arg5: memref<128x128xf32, #tpu.memory_space<vmem>>, %arg6: memref<1x128xf32, #tpu.memory_space<vmem>>, %arg7: memref<128x128xf32, #tpu.memory_space<vmem>>, %arg8: memref<128x128xf32, #tpu.memory_space<vmem>>, %arg9: memref<128x128xf32, #tpu.memory_space<vmem>>) attributes {dimension_semantics = [], scalar_prefetch = 0 : i64, scratch_operands = 1 : i64, tpu.core_type = #tpu.core_type<tc>} {
    %c0 = arith.constant 0 : index
    %c0_0 = arith.constant 0 : index
    %0 = vector.load %arg0[%c0, %c0_0] : memref<128x128xf32, #tpu.memory_space<vmem>>, vector<128x128xf32>
    %c0_1 = arith.constant 0 : index
    %c0_2 = arith.constant 0 : index
    %1 = vector.load %arg2[%c0_1, %c0_2] : memref<128x128xf32, #tpu.memory_space<vmem>>, vector<128x128xf32>
    %cst = arith.constant dense<0.000000e+00> : vector<128x128xf32>
    %2 = tpu.matmul %0, %1, %cst {dimension_numbers = #tpu.dot_dimension_numbers<[1], [0], [0], [1], [0, 0, 1, 1], [], []>, precision = #tpu.contract_precision<fp32>} : vector<128x128xf32>, vector<128x128xf32>, vector<128x128xf32> -> vector<128x128xf32>
    %c0_3 = arith.constant 0 : index
    %c0_4 = arith.constant 0 : index
    %3 = vector.load %arg4[%c0_3, %c0_4] : memref<1x128xf32, #tpu.memory_space<vmem>>, vector<1x128xf32>
    %4 = vector.broadcast %3 : vector<1x128xf32> to vector<128x128xf32>
    %5 = arith.addf %2, %4 : vector<128x128xf32>
    %c0_5 = arith.constant 0 : index
    %c0_6 = arith.constant 0 : index
    %6 = vector.load %arg9[%c0_5, %c0_6] : memref<128x128xf32, #tpu.memory_space<vmem>>, vector<128x128xf32>
    tpu.vector_store %arg9[%c0_5, %c0_6], %5 {strides = array<i32>} : memref<128x128xf32, #tpu.memory_space<vmem>>, vector<128x128xf32>,
    %c0_7 = arith.constant 0 : index
    %c0_8 = arith.constant 0 : index
    %7 = vector.load %arg3[%c0_7, %c0_8] : memref<128x128xf32, #tpu.memory_space<vmem>>, vector<128x128xf32>
    %c0_9 = arith.constant 0 : index
    %c0_10 = arith.constant 0 : index
    %8 = vector.load %arg1[%c0_9, %c0_10] : memref<8x128xf32, #tpu.memory_space<vmem>>, vector<8x128xf32>
    %c0_11 = arith.constant 0 : index
    %c0_12 = arith.constant 0 : index
    %9 = vector.load %arg9[%c0_11, %c0_12] : memref<128x128xf32, #tpu.memory_space<vmem>>, vector<8x128xf32>
    %cst_13 = arith.constant dense<0.000000e+00> : vector<8x128xf32>
    %10 = tpu.matmul %8, %7, %cst_13 {dimension_numbers = #tpu.dot_dimension_numbers<[1], [0], [0], [1], [0, 0, 1, 1], [], []>, precision = #tpu.contract_precision<fp32>} : vector<8x128xf32>, vector<128x128xf32>, vector<8x128xf32> -> vector<8x128xf32>
    %11 = arith.addf %9, %10 : vector<8x128xf32>
    %12 = math.tanh %11 : vector<8x128xf32>
    %c0_14 = arith.constant 0 : index
    %c0_15 = arith.constant 0 : index
    %13 = vector.load %arg8[%c0_14, %c0_15] : memref<128x128xf32, #tpu.memory_space<vmem>>, vector<8x128xf32>
    tpu.vector_store %arg8[%c0_14, %c0_15], %12 {strides = array<i32>} : memref<128x128xf32, #tpu.memory_space<vmem>>, vector<8x128xf32>,
    %c8 = arith.constant 8 : index
    %c0_16 = arith.constant 0 : index
    %14 = vector.load %arg9[%c8, %c0_16] : memref<128x128xf32, #tpu.memory_space<vmem>>, vector<8x128xf32>
    %cst_17 = arith.constant dense<0.000000e+00> : vector<8x128xf32>
    %15 = tpu.matmul %12, %7, %cst_17 {dimension_numbers = #tpu.dot_dimension_numbers<[1], [0], [0], [1], [0, 0, 1, 1], [], []>, precision = #tpu.contract_precision<fp32>} : vector<8x128xf32>, vector<128x128xf32>, vector<8x128xf32> -> vector<8x128xf32>
    %16 = arith.addf %14, %15 : vector<8x128xf32>
    %17 = math.tanh %16 : vector<8x128xf32>
    %c8_18 = arith.constant 8 : index
    %c0_19 = arith.constant 0 : index
    %18 = vector.load %arg8[%c8_18, %c0_19] : memref<128x128xf32, #tpu.memory_space<vmem>>, vector<8x128xf32>
    tpu.vector_store %arg8[%c8_18, %c0_19], %17 {strides = array<i32>} : memref<128x128xf32, #tpu.memory_space<vmem>>, vector<8x128xf32>,
    %c16 = arith.constant 16 : index
    %c0_20 = arith.constant 0 : index
    %19 = vector.load %arg9[%c16, %c0_20] : memref<128x128xf32, #tpu.memory_space<vmem>>, vector<8x128xf32>
    %cst_21 = arith.constant dense<0.000000e+00> : vector<8x128xf32>
    %20 = tpu.matmul %17, %7, %cst_21 {dimension_numbers = #tpu.dot_dimension_numbers<[1], [0], [0], [1], [0, 0, 1, 1], [], []>, precision = #tpu.contract_precision<fp32>} : vector<8x128xf32>, vector<128x128xf32>, vector<8x128xf32> -> vector<8x128xf32>
    %21 = arith.addf %19, %20 : vector<8x128xf32>
    %22 = math.tanh %21 : vector<8x128xf32>
    %c16_22 = arith.constant 16 : index
    %c0_23 = arith.constant 0 : index
    %23 = vector.load %arg8[%c16_22, %c0_23] : memref<128x128xf32, #tpu.memory_space<vmem>>, vector<8x128xf32>
    tpu.vector_store %arg8[%c16_22, %c0_23], %22 {strides = array<i32>} : memref<128x128xf32, #tpu.memory_space<vmem>>, vector<8x128xf32>,
    %c24 = arith.constant 24 : index
    %c0_24 = arith.constant 0 : index
    %24 = vector.load %arg9[%c24, %c0_24] : memref<128x128xf32, #tpu.memory_space<vmem>>, vector<8x128xf32>
    %cst_25 = arith.constant dense<0.000000e+00> : vector<8x128xf32>
    %25 = tpu.matmul %22, %7, %cst_25 {dimension_numbers = #tpu.dot_dimension_numbers<[1], [0], [0], [1], [0, 0, 1, 1], [], []>, precision = #tpu.contract_precision<fp32>} : vector<8x128xf32>, vector<128x128xf32>, vector<8x128xf32> -> vector<8x128xf32>
    %26 = arith.addf %24, %25 : vector<8x128xf32>
    %27 = math.tanh %26 : vector<8x128xf32>
    %c24_26 = arith.constant 24 : index
    %c0_27 = arith.constant 0 : index
    %28 = vector.load %arg8[%c24_26, %c0_27] : memref<128x128xf32, #tpu.memory_space<vmem>>, vector<8x128xf32>
    tpu.vector_store %arg8[%c24_26, %c0_27], %27 {strides = array<i32>} : memref<128x128xf32, #tpu.memory_space<vmem>>, vector<8x128xf32>,
    %c32 = arith.constant 32 : index
    %c0_28 = arith.constant 0 : index
    %29 = vector.load %arg9[%c32, %c0_28] : memref<128x128xf32, #tpu.memory_space<vmem>>, vector<8x128xf32>
    %cst_29 = arith.constant dense<0.000000e+00> : vector<8x128xf32>
    %30 = tpu.matmul %27, %7, %cst_29 {dimension_numbers = #tpu.dot_dimension_numbers<[1], [0], [0], [1], [0, 0, 1, 1], [], []>, precision = #tpu.contract_precision<fp32>} : vector<8x128xf32>, vector<128x128xf32>, vector<8x128xf32> -> vector<8x128xf32>
    %31 = arith.addf %29, %30 : vector<8x128xf32>
    %32 = math.tanh %31 : vector<8x128xf32>
    %c32_30 = arith.constant 32 : index
    %c0_31 = arith.constant 0 : index
    %33 = vector.load %arg8[%c32_30, %c0_31] : memref<128x128xf32, #tpu.memory_space<vmem>>, vector<8x128xf32>
    tpu.vector_store %arg8[%c32_30, %c0_31], %32 {strides = array<i32>} : memref<128x128xf32, #tpu.memory_space<vmem>>, vector<8x128xf32>,
    %c40 = arith.constant 40 : index
    %c0_32 = arith.constant 0 : index
    %34 = vector.load %arg9[%c40, %c0_32] : memref<128x128xf32, #tpu.memory_space<vmem>>, vector<8x128xf32>
    %cst_33 = arith.constant dense<0.000000e+00> : vector<8x128xf32>
    %35 = tpu.matmul %32, %7, %cst_33 {dimension_numbers = #tpu.dot_dimension_numbers<[1], [0], [0], [1], [0, 0, 1, 1], [], []>, precision = #tpu.contract_precision<fp32>} : vector<8x128xf32>, vector<128x128xf32>, vector<8x128xf32> -> vector<8x128xf32>
    %36 = arith.addf %34, %35 : vector<8x128xf32>
    %37 = math.tanh %36 : vector<8x128xf32>
    %c40_34 = arith.constant 40 : index
    %c0_35 = arith.constant 0 : index
    %38 = vector.load %arg8[%c40_34, %c0_35] : memref<128x128xf32, #tpu.memory_space<vmem>>, vector<8x128xf32>
    tpu.vector_store %arg8[%c40_34, %c0_35], %37 {strides = array<i32>} : memref<128x128xf32, #tpu.memory_space<vmem>>, vector<8x128xf32>,
    %c48 = arith.constant 48 : index
    %c0_36 = arith.constant 0 : index
    %39 = vector.load %arg9[%c48, %c0_36] : memref<128x128xf32, #tpu.memory_space<vmem>>, vector<8x128xf32>
    %cst_37 = arith.constant dense<0.000000e+00> : vector<8x128xf32>
    %40 = tpu.matmul %37, %7, %cst_37 {dimension_numbers = #tpu.dot_dimension_numbers<[1], [0], [0], [1], [0, 0, 1, 1], [], []>, precision = #tpu.contract_precision<fp32>} : vector<8x128xf32>, vector<128x128xf32>, vector<8x128xf32> -> vector<8x128xf32>
    %41 = arith.addf %39, %40 : vector<8x128xf32>
    %42 = math.tanh %41 : vector<8x128xf32>
    %c48_38 = arith.constant 48 : index
    %c0_39 = arith.constant 0 : index
    %43 = vector.load %arg8[%c48_38, %c0_39] : memref<128x128xf32, #tpu.memory_space<vmem>>, vector<8x128xf32>
    tpu.vector_store %arg8[%c48_38, %c0_39], %42 {strides = array<i32>} : memref<128x128xf32, #tpu.memory_space<vmem>>, vector<8x128xf32>,
    %c56 = arith.constant 56 : index
    %c0_40 = arith.constant 0 : index
    %44 = vector.load %arg9[%c56, %c0_40] : memref<128x128xf32, #tpu.memory_space<vmem>>, vector<8x128xf32>
    %cst_41 = arith.constant dense<0.000000e+00> : vector<8x128xf32>
    %45 = tpu.matmul %42, %7, %cst_41 {dimension_numbers = #tpu.dot_dimension_numbers<[1], [0], [0], [1], [0, 0, 1, 1], [], []>, precision = #tpu.contract_precision<fp32>} : vector<8x128xf32>, vector<128x128xf32>, vector<8x128xf32> -> vector<8x128xf32>
    %46 = arith.addf %44, %45 : vector<8x128xf32>
    %47 = math.tanh %46 : vector<8x128xf32>
    %c56_42 = arith.constant 56 : index
    %c0_43 = arith.constant 0 : index
    %48 = vector.load %arg8[%c56_42, %c0_43] : memref<128x128xf32, #tpu.memory_space<vmem>>, vector<8x128xf32>
    tpu.vector_store %arg8[%c56_42, %c0_43], %47 {strides = array<i32>} : memref<128x128xf32, #tpu.memory_space<vmem>>, vector<8x128xf32>,
    %c64 = arith.constant 64 : index
    %c0_44 = arith.constant 0 : index
    %49 = vector.load %arg9[%c64, %c0_44] : memref<128x128xf32, #tpu.memory_space<vmem>>, vector<8x128xf32>
    %cst_45 = arith.constant dense<0.000000e+00> : vector<8x128xf32>
    %50 = tpu.matmul %47, %7, %cst_45 {dimension_numbers = #tpu.dot_dimension_numbers<[1], [0], [0], [1], [0, 0, 1, 1], [], []>, precision = #tpu.contract_precision<fp32>} : vector<8x128xf32>, vector<128x128xf32>, vector<8x128xf32> -> vector<8x128xf32>
    %51 = arith.addf %49, %50 : vector<8x128xf32>
    %52 = math.tanh %51 : vector<8x128xf32>
    %c64_46 = arith.constant 64 : index
    %c0_47 = arith.constant 0 : index
    %53 = vector.load %arg8[%c64_46, %c0_47] : memref<128x128xf32, #tpu.memory_space<vmem>>, vector<8x128xf32>
    tpu.vector_store %arg8[%c64_46, %c0_47], %52 {strides = array<i32>} : memref<128x128xf32, #tpu.memory_space<vmem>>, vector<8x128xf32>,
    %c72 = arith.constant 72 : index
    %c0_48 = arith.constant 0 : index
    %54 = vector.load %arg9[%c72, %c0_48] : memref<128x128xf32, #tpu.memory_space<vmem>>, vector<8x128xf32>
    %cst_49 = arith.constant dense<0.000000e+00> : vector<8x128xf32>
    %55 = tpu.matmul %52, %7, %cst_49 {dimension_numbers = #tpu.dot_dimension_numbers<[1], [0], [0], [1], [0, 0, 1, 1], [], []>, precision = #tpu.contract_precision<fp32>} : vector<8x128xf32>, vector<128x128xf32>, vector<8x128xf32> -> vector<8x128xf32>
    %56 = arith.addf %54, %55 : vector<8x128xf32>
    %57 = math.tanh %56 : vector<8x128xf32>
    %c72_50 = arith.constant 72 : index
    %c0_51 = arith.constant 0 : index
    %58 = vector.load %arg8[%c72_50, %c0_51] : memref<128x128xf32, #tpu.memory_space<vmem>>, vector<8x128xf32>
    tpu.vector_store %arg8[%c72_50, %c0_51], %57 {strides = array<i32>} : memref<128x128xf32, #tpu.memory_space<vmem>>, vector<8x128xf32>,
    %c80 = arith.constant 80 : index
    %c0_52 = arith.constant 0 : index
    %59 = vector.load %arg9[%c80, %c0_52] : memref<128x128xf32, #tpu.memory_space<vmem>>, vector<8x128xf32>
    %cst_53 = arith.constant dense<0.000000e+00> : vector<8x128xf32>
    %60 = tpu.matmul %57, %7, %cst_53 {dimension_numbers = #tpu.dot_dimension_numbers<[1], [0], [0], [1], [0, 0, 1, 1], [], []>, precision = #tpu.contract_precision<fp32>} : vector<8x128xf32>, vector<128x128xf32>, vector<8x128xf32> -> vector<8x128xf32>
    %61 = arith.addf %59, %60 : vector<8x128xf32>
    %62 = math.tanh %61 : vector<8x128xf32>
    %c80_54 = arith.constant 80 : index
    %c0_55 = arith.constant 0 : index
    %63 = vector.load %arg8[%c80_54, %c0_55] : memref<128x128xf32, #tpu.memory_space<vmem>>, vector<8x128xf32>
    tpu.vector_store %arg8[%c80_54, %c0_55], %62 {strides = array<i32>} : memref<128x128xf32, #tpu.memory_space<vmem>>, vector<8x128xf32>,
    %c88 = arith.constant 88 : index
    %c0_56 = arith.constant 0 : index
    %64 = vector.load %arg9[%c88, %c0_56] : memref<128x128xf32, #tpu.memory_space<vmem>>, vector<8x128xf32>
    %cst_57 = arith.constant dense<0.000000e+00> : vector<8x128xf32>
    %65 = tpu.matmul %62, %7, %cst_57 {dimension_numbers = #tpu.dot_dimension_numbers<[1], [0], [0], [1], [0, 0, 1, 1], [], []>, precision = #tpu.contract_precision<fp32>} : vector<8x128xf32>, vector<128x128xf32>, vector<8x128xf32> -> vector<8x128xf32>
    %66 = arith.addf %64, %65 : vector<8x128xf32>
    %67 = math.tanh %66 : vector<8x128xf32>
    %c88_58 = arith.constant 88 : index
    %c0_59 = arith.constant 0 : index
    %68 = vector.load %arg8[%c88_58, %c0_59] : memref<128x128xf32, #tpu.memory_space<vmem>>, vector<8x128xf32>
    tpu.vector_store %arg8[%c88_58, %c0_59], %67 {strides = array<i32>} : memref<128x128xf32, #tpu.memory_space<vmem>>, vector<8x128xf32>,
    %c96 = arith.constant 96 : index
    %c0_60 = arith.constant 0 : index
    %69 = vector.load %arg9[%c96, %c0_60] : memref<128x128xf32, #tpu.memory_space<vmem>>, vector<8x128xf32>
    %cst_61 = arith.constant dense<0.000000e+00> : vector<8x128xf32>
    %70 = tpu.matmul %67, %7, %cst_61 {dimension_numbers = #tpu.dot_dimension_numbers<[1], [0], [0], [1], [0, 0, 1, 1], [], []>, precision = #tpu.contract_precision<fp32>} : vector<8x128xf32>, vector<128x128xf32>, vector<8x128xf32> -> vector<8x128xf32>
    %71 = arith.addf %69, %70 : vector<8x128xf32>
    %72 = math.tanh %71 : vector<8x128xf32>
    %c96_62 = arith.constant 96 : index
    %c0_63 = arith.constant 0 : index
    %73 = vector.load %arg8[%c96_62, %c0_63] : memref<128x128xf32, #tpu.memory_space<vmem>>, vector<8x128xf32>
    tpu.vector_store %arg8[%c96_62, %c0_63], %72 {strides = array<i32>} : memref<128x128xf32, #tpu.memory_space<vmem>>, vector<8x128xf32>,
    %c104 = arith.constant 104 : index
    %c0_64 = arith.constant 0 : index
    %74 = vector.load %arg9[%c104, %c0_64] : memref<128x128xf32, #tpu.memory_space<vmem>>, vector<8x128xf32>
    %cst_65 = arith.constant dense<0.000000e+00> : vector<8x128xf32>
    %75 = tpu.matmul %72, %7, %cst_65 {dimension_numbers = #tpu.dot_dimension_numbers<[1], [0], [0], [1], [0, 0, 1, 1], [], []>, precision = #tpu.contract_precision<fp32>} : vector<8x128xf32>, vector<128x128xf32>, vector<8x128xf32> -> vector<8x128xf32>
    %76 = arith.addf %74, %75 : vector<8x128xf32>
    %77 = math.tanh %76 : vector<8x128xf32>
    %c104_66 = arith.constant 104 : index
    %c0_67 = arith.constant 0 : index
    %78 = vector.load %arg8[%c104_66, %c0_67] : memref<128x128xf32, #tpu.memory_space<vmem>>, vector<8x128xf32>
    tpu.vector_store %arg8[%c104_66, %c0_67], %77 {strides = array<i32>} : memref<128x128xf32, #tpu.memory_space<vmem>>, vector<8x128xf32>,
    %c112 = arith.constant 112 : index
    %c0_68 = arith.constant 0 : index
    %79 = vector.load %arg9[%c112, %c0_68] : memref<128x128xf32, #tpu.memory_space<vmem>>, vector<8x128xf32>
    %cst_69 = arith.constant dense<0.000000e+00> : vector<8x128xf32>
    %80 = tpu.matmul %77, %7, %cst_69 {dimension_numbers = #tpu.dot_dimension_numbers<[1], [0], [0], [1], [0, 0, 1, 1], [], []>, precision = #tpu.contract_precision<fp32>} : vector<8x128xf32>, vector<128x128xf32>, vector<8x128xf32> -> vector<8x128xf32>
    %81 = arith.addf %79, %80 : vector<8x128xf32>
    %82 = math.tanh %81 : vector<8x128xf32>
    %c112_70 = arith.constant 112 : index
    %c0_71 = arith.constant 0 : index
    %83 = vector.load %arg8[%c112_70, %c0_71] : memref<128x128xf32, #tpu.memory_space<vmem>>, vector<8x128xf32>
    tpu.vector_store %arg8[%c112_70, %c0_71], %82 {strides = array<i32>} : memref<128x128xf32, #tpu.memory_space<vmem>>, vector<8x128xf32>,
    %c120 = arith.constant 120 : index
    %c0_72 = arith.constant 0 : index
    %84 = vector.load %arg9[%c120, %c0_72] : memref<128x128xf32, #tpu.memory_space<vmem>>, vector<8x128xf32>
    %cst_73 = arith.constant dense<0.000000e+00> : vector<8x128xf32>
    %85 = tpu.matmul %82, %7, %cst_73 {dimension_numbers = #tpu.dot_dimension_numbers<[1], [0], [0], [1], [0, 0, 1, 1], [], []>, precision = #tpu.contract_precision<fp32>} : vector<8x128xf32>, vector<128x128xf32>, vector<8x128xf32> -> vector<8x128xf32>
    %86 = arith.addf %84, %85 : vector<8x128xf32>
    %87 = math.tanh %86 : vector<8x128xf32>
    %c120_74 = arith.constant 120 : index
    %c0_75 = arith.constant 0 : index
    %88 = vector.load %arg8[%c120_74, %c0_75] : memref<128x128xf32, #tpu.memory_space<vmem>>, vector<8x128xf32>
    tpu.vector_store %arg8[%c120_74, %c0_75], %87 {strides = array<i32>} : memref<128x128xf32, #tpu.memory_space<vmem>>, vector<8x128xf32>,
    %c0_76 = arith.constant 0 : index
    %c0_77 = arith.constant 0 : index
    %89 = vector.load %arg8[%c0_76, %c0_77] : memref<128x128xf32, #tpu.memory_space<vmem>>, vector<128x128xf32>
    %c0_78 = arith.constant 0 : index
    %c0_79 = arith.constant 0 : index
    %90 = vector.load %arg5[%c0_78, %c0_79] : memref<128x128xf32, #tpu.memory_space<vmem>>, vector<128x128xf32>
    %cst_80 = arith.constant dense<0.000000e+00> : vector<128x128xf32>
    %91 = tpu.matmul %89, %90, %cst_80 {dimension_numbers = #tpu.dot_dimension_numbers<[1], [0], [0], [1], [0, 0, 1, 1], [], []>, precision = #tpu.contract_precision<fp32>} : vector<128x128xf32>, vector<128x128xf32>, vector<128x128xf32> -> vector<128x128xf32>
    %c0_81 = arith.constant 0 : index
    %c0_82 = arith.constant 0 : index
    %92 = vector.load %arg6[%c0_81, %c0_82] : memref<1x128xf32, #tpu.memory_space<vmem>>, vector<1x128xf32>
    %93 = vector.broadcast %92 : vector<1x128xf32> to vector<128x128xf32>
    %94 = arith.addf %91, %93 : vector<128x128xf32>
    %c0_83 = arith.constant 0 : index
    %c0_84 = arith.constant 0 : index
    %95 = vector.load %arg7[%c0_83, %c0_84] : memref<128x128xf32, #tpu.memory_space<vmem>>, vector<128x128xf32>
    tpu.vector_store %arg7[%c0_83, %c0_84], %94 {strides = array<i32>} : memref<128x128xf32, #tpu.memory_space<vmem>>, vector<128x128xf32>,
    return
  }
}

</mosaic_0001>

<bundles_post_ra>
// kernel: tpu_custom_call.1
= control target key start
LH: loop header
LB: loop body
LE: loop exit
PB: predicated region body
PF: predicated region fallthrough
CT: control target
= control target key end

     0   :  { %14 = vsyncpa [#allocation4], 0  ;;  %s26046_s0 = inlined_call_operand.hbm [shape: f32[128,128], index: 0, kind: input, shape index: {}]   ;;  %s26047_s1 = inlined_call_operand.hbm [shape: f32[8,128], index: 1, kind: input, shape index: {}]   ;;  %s26048_s2 = inlined_call_operand.hbm [shape: f32[128,128], index: 2, kind: input, shape index: {}]   ;;  %s26049_s3 = inlined_call_operand.hbm [shape: f32[128,128], index: 3, kind: input, shape index: {}]   ;;  %s26050_s4 = inlined_call_operand.vmem [shape: f32[1,128], index: 4, kind: input, shape index: {}]   ;;  %s26051_s5 = inlined_call_operand.hbm [shape: f32[128,128], index: 5, kind: input, shape index: {}]   ;;  %s26052_s6 = inlined_call_operand.vmem [shape: f32[1,128], index: 6, kind: input, shape index: {}]   ;;  %s26053_s7 = inlined_call_operand.hbm [shape: f32[128,128], index: 7, kind: output, shape index: {0}]   ;;  %s26054_s8 = inlined_call_operand.hbm [shape: f32[128,128], index: 8, kind: output, shape index: {1}]  }
   0x1   :  { %15 = vsyncpa [#allocation7], 0 }
   0x2   :  { %16 = vsyncpa [#allocation10], 0 }
   0x3   :  { %17 = vsyncpa [#allocation5], 0 }
   0x4   :  { %18 = vsyncpa [#allocation14], 0  ;;  %s22448_s27 = smov [#allocation6]   ;;  %s22284_s9 = scalar_lea.hbm %s26047_s1, 128 }
   0x5   :  { %s37_s28 = sshll.u32 %s22448_s27, 4  ;;  %p22285_p0 = scmp.ne.s32.totalorder %s26047_s1, %s22284_s9  ;;  %s38_s28 = int_to_ptr.vmem [resolvable:$true] %s37_s28 }
   0x6   :  { %p22288_p1 = scmp.lt.u32.totalorder %s22284_s9, %s26047_s1 }
   0x8   :  { %p22290_p2 = pnand %p22288_p1, %p22285_p0 }
   0xa   :  { %22293 = shalt.err (!%p22290_p2)
}
   0xb   :  { %s22294_s14 = scalar_lea.vmem %s38_s28, 128  ;;  %p22299_p4 = scmp.lt.s32.totalorder %s38_s28, %s38_s28 }
   0xc   :  { %p22295_p3 = scmp.ne.s32.totalorder %s38_s28, %s22294_s14  ;;  %p22300_p5 = scmp.lt.s32.totalorder %s22294_s14, %s22294_s14 }
   0xe   :  { %p22301_p6 = por %p22300_p5, %p22299_p4 }
  0x10   :  { %p22302_p7 = pnand %p22301_p6, %p22295_p3 }
  0x12   :  { %22305 = shalt.err (!%p22302_p7)
}
  0x13   :  { %40 = dma.hbm_to_vmem [thread:$0]  %s26047_s1, 128, %s38_s28, [#allocation7]  }
  0x14   :  { %s22449_s17 = smov [#allocation9]   ;;  %s22450_s19 = smov [#allocation3]  }
  0x15   :  { %s58_s18 = sshll.u32 %s22449_s17, 4  ;;  %s24_s20 = sshll.u32 %s22450_s19, 4  ;;  %s59_s18 = int_to_ptr.vmem [resolvable:$true] %s58_s18  ;;  %s25_s20 = int_to_ptr.vmem [resolvable:$true] %s24_s20 }
  0x16   :  { %s22306_s23 = scalar_lea.hbm %s26049_s3, 2048 }
  0x17   :  { %p22307_p8 = scmp.ne.s32.totalorder %s26049_s3, %s22306_s23  ;;  %p22310_p9 = scmp.lt.u32.totalorder %s22306_s23, %s26049_s3 }
  0x19   :  { %p22312_p10 = pnand %p22310_p9, %p22307_p8 }
  0x1b   :  { %22315 = shalt.err (!%p22312_p10)
}
  0x1c   :  { %s22316_s1 = scalar_lea.vmem %s59_s18, 2048  ;;  %p22321_p12 = scmp.lt.s32.totalorder %s59_s18, %s59_s18 }
  0x1d   :  { %p22317_p11 = scmp.ne.s32.totalorder %s59_s18, %s22316_s1  ;;  %p22322_p13 = scmp.lt.s32.totalorder %s22316_s1, %s22316_s1 }
  0x1f   :  { %p22323_p0 = por %p22322_p13, %p22321_p12 }
  0x21   :  { %p22324_p1 = pnand %p22323_p0, %p22317_p11 }
  0x23   :  { %22327 = shalt.err (!%p22324_p1)
}
  0x24   :  { %s22451_s28 = smov 128   ;;  %s22452_s29 = smov 8  }
  0x25   :  { %64 = dma.hbm_to_vmem [thread:$0]  %s26049_s3, 2048, %s59_s18, [#allocation10], %s22451_s28, %s22451_s28, %s22452_s29  }
  0x26   :  { %s22328_s12 = scalar_lea.hbm %s26046_s0, 2048 }
  0x27   :  { %p22329_p2 = scmp.ne.s32.totalorder %s26046_s0, %s22328_s12  ;;  %p22332_p3 = scmp.lt.u32.totalorder %s22328_s12, %s26046_s0 }
  0x29   :  { %p22334_p4 = pnand %p22332_p3, %p22329_p2 }
  0x2b   :  { %22337 = shalt.err (!%p22334_p4)
}
  0x2c   :  { %s22338_s17 = scalar_lea.vmem %s25_s20, 2048  ;;  %p22343_p6 = scmp.lt.s32.totalorder %s25_s20, %s25_s20 }
  0x2d   :  { %p22339_p5 = scmp.ne.s32.totalorder %s25_s20, %s22338_s17  ;;  %p22344_p7 = scmp.lt.s32.totalorder %s22338_s17, %s22338_s17 }
  0x2f   :  { %p22345_p8 = por %p22344_p7, %p22343_p6 }
  0x31   :  { %p22346_p9 = pnand %p22345_p8, %p22339_p5 }
  0x33   :  { %22349 = shalt.err (!%p22346_p9)
}
  0x34   :  { %30 = dma.hbm_to_vmem [thread:$0]  %s26046_s0, 2048, %s25_s20, [#allocation4], %s22451_s28, %s22451_s28, %s22452_s29  }
  0x35   :  { %s22453_s19 = smov [#allocation8]   ;;  %s22454_s22 = smov [#allocation11]  }
  0x36   :  { %s46_s21 = sshll.u32 %s22453_s19, 4  ;;  %s72_s23 = sshll.u32 %s22454_s22, 4  ;;  %s47_s21 = int_to_ptr.vmem [resolvable:$true] %s46_s21  ;;  %s73_s23 = int_to_ptr.vmem [resolvable:$true] %s72_s23 }
  0x37   :  { %s22350_s26 = scalar_lea.hbm %s26048_s2, 2048 }
  0x38   :  { %p22351_p10 = scmp.ne.s32.totalorder %s26048_s2, %s22350_s26  ;;  %p22354_p11 = scmp.lt.u32.totalorder %s22350_s26, %s26048_s2 }
  0x3a   :  { %p22356_p12 = pnand %p22354_p11, %p22351_p10 }
  0x3c   :  { %22359 = shalt.err (!%p22356_p12)
}
  0x3d   :  { %s22360_s0 = scalar_lea.vmem %s47_s21, 2048  ;;  %p22365_p0 = scmp.lt.s32.totalorder %s47_s21, %s47_s21 }
  0x3e   :  { %p22361_p13 = scmp.ne.s32.totalorder %s47_s21, %s22360_s0  ;;  %p22366_p1 = scmp.lt.s32.totalorder %s22360_s0, %s22360_s0 }
  0x40   :  { %p22367_p2 = por %p22366_p1, %p22365_p0 }
  0x42   :  { %p22368_p3 = pnand %p22367_p2, %p22361_p13 }
  0x44   :  { %22371 = shalt.err (!%p22368_p3)
}
  0x45   :  { %52 = dma.hbm_to_vmem [thread:$0]  %s26048_s2, 2048, %s47_s21, [#allocation7], %s22451_s28, %s22451_s28, %s22452_s29  }
  0x46   :  { %s22372_s13 = scalar_lea.hbm %s26051_s5, 2048 }
  0x47   :  { %p22373_p4 = scmp.ne.s32.totalorder %s26051_s5, %s22372_s13  ;;  %p22376_p5 = scmp.lt.u32.totalorder %s22372_s13, %s26051_s5 }
  0x49   :  { %p22378_p6 = pnand %p22376_p5, %p22373_p4 }
  0x4b   :  { %22381 = shalt.err (!%p22378_p6)
}
  0x4c   :  { %s22382_s3 = scalar_lea.vmem %s73_s23, 2048  ;;  %p22387_p8 = scmp.lt.s32.totalorder %s73_s23, %s73_s23 }
  0x4d   :  { %p22383_p7 = scmp.ne.s32.totalorder %s73_s23, %s22382_s3  ;;  %p22388_p9 = scmp.lt.s32.totalorder %s22382_s3, %s22382_s3 }
  0x4f   :  { %p22389_p10 = por %p22388_p9, %p22387_p8 }
  0x51   :  { %p22390_p11 = pnand %p22389_p10, %p22383_p7 }
  0x53   :  { %22393 = shalt.err (!%p22390_p11)
}
  0x54   :  { %78 = dma.hbm_to_vmem [thread:$0]  %s26051_s5, 2048, %s73_s23, [#allocation10], %s22451_s28, %s22451_s28, %s22452_s29  }
  0x55   :  { %22438 = dma.done.wait [#allocation4], 2048  }
  0x56   :  { %22439 = vsyncadd [#allocation4], 4294965248 }
  0x57   :  { %22440 = dma.done.wait [#allocation7], 2176  }
  0x58   :  { %22441 = vsyncadd [#allocation7], 4294965120 }
  0x59   :  { %22442 = dma.done.wait [#allocation10], 4096  }
  0x5a   :  { %22443 = vsyncadd [#allocation10], 4294963200  ;;  %v26086_v0 = vmov 0.0|0.0   ;;  %vm22456_vm0 = vmmov 0   ;;  %v26055_v1 = vmov 0.0   ;;  %v22580_v2 = vld [vmem:[#allocation8] sm:$0xff] }
  0x5b   :  { %19392 = vmatprep.subr.bf16.mxu1 %v26086_v0  ;;  %15536 = vmatprep.mubr.msk.f32.mxu1 %vm22456_vm0, %v26055_v1  ;;  %v22582_v3 = vld [vmem:[#allocation8 + $0x8] sm:$0xff]  ;;  %v22584_v4 = vld [vmem:[#allocation9] sm:$0xff]  ;;  %v136_v5 = vand.u32 4294901760, %v22580_v2  ;;  %v22591_v9 = vld [vmem:[#allocation8 + $0x10] sm:$0xff] }
  0x5c   :  { %v139_v6 = vand.u32 4294901760, %v22582_v3  ;;  %v22588_v7 = vld [vmem:[#allocation9 + $0x8] sm:$0xff]  ;;  %v1456_v8 = vand.u32 4294901760, %v22584_v4  ;;  %v22593_v10 = vld [vmem:[#allocation8 + $0x18] sm:$0xff]  ;;  %v26076_v12 = vand.u32 4294901760, %v22591_v9  ;;  %v22598_v14 = vld [vmem:[#allocation9 + $0x10] sm:$0xff] }
  0x5d   :  { %v26079_v11 = vand.u32 4294901760, %v22588_v7  ;;  %v26073_v13 = vand.u32 4294901760, %v22593_v10  ;;  %v22600_v15 = vld [vmem:[#allocation9 + $0x18] sm:$0xff]  ;;  %v22602_v16 = vld [vmem:[#allocation8 + $0x20] sm:$0xff]  ;;  %v26072_v18 = vand.u32 4294901760, %v22598_v14  ;;  %v22612_v20 = vld [vmem:[#allocation8 + $0x28] sm:$0xff] }
  0x5e   :  { %v22608_v17 = vpack.c.bf16 %v139_v6, %v136_v5  ;;  %v26071_v19 = vand.u32 4294901760, %v22600_v15  ;;  %v26070_v21 = vand.u32 4294901760, %v22602_v16  ;;  %v22615_v22 = vld [vmem:[#allocation9 + $0x20] sm:$0xff]  ;;  %v22617_v23 = vld [vmem:[#allocation9 + $0x28] sm:$0xff]  ;;  %v26069_v26 = vand.u32 4294901760, %v22612_v20  ;;  %v22633_v28 = vld [vmem:[#allocation8 + $0x30] sm:$0xff] }
  0x5f   :  { %v22623_v24 = vpack.c.bf16 %v26079_v11, %v1456_v8  ;;  %v22629_v25 = vpack.c.bf16 %v26073_v13, %v26076_v12  ;;  %v26064_v27 = vand.u32 4294901760, %v22615_v22  ;;  %v22635_v29 = vld [vmem:[#allocation8 + $0x38] sm:$0xff]  ;;  %v22637_v30 = vld [vmem:[#allocation9 + $0x30] sm:$0xff]  ;;  %v26063_v32 = vand.u32 4294901760, %v22617_v23  ;;  %v22651_v36 = vld [vmem:[#allocation8 + $0x40] sm:$0xff] }
  0x60   :  { %26354 = vst [vmem:[#allocation20_spill] sm:$0xff] %v22608_v17  ;;  %19201 = vmatprep.subr.bf16.mxu0 %v22608_v17  ;;  %v22644_v31 = vpack.c.bf16 %v26071_v19, %v26072_v18  ;;  %v26062_v33 = vand.u32 4294901760, %v22633_v28  ;;  %v26061_v34 = vand.u32 4294901760, %v22635_v29  ;;  %v22649_v35 = vld [vmem:[#allocation9 + $0x38] sm:$0xff]  ;;  %v22653_v37 = vld [vmem:[#allocation8 + $0x48] sm:$0xff]  ;;  %v22661_v38 = vpack.c.bf16 %v26069_v26, %v26070_v21  ;;  %v22666_v42 = vld [vmem:[#allocation9 + $0x40] sm:$0xff] }
  0x61   :  { %26355 = vst [vmem:[#allocation21_spill] sm:$0xff] %v22623_v24  ;;  %26356 = vst [vmem:[#allocation22_spill] sm:$0xff] %v22629_v25  ;;  %19394 = vmatpush3.bf16.msra.mxu1 %v22623_v24  ;;  %19203 = vmatpush3.bf16.msra.mxu0 %v22608_v17  ;;  %v26060_v39 = vand.u32 4294901760, %v22637_v30  ;;  %v26057_v40 = vand.u32 4294901760, %v22649_v35  ;;  %v26059_v41 = vand.u32 4294901760, %v22651_v36  ;;  %v22668_v43 = vld [vmem:[#allocation9 + $0x48] sm:$0xff]  ;;  %v22678_v45 = vpack.c.bf16 %v26063_v32, %v26064_v27 }
  0x62   :  { %26357 = vst [vmem:[#allocation23_spill] sm:$0xff] %v22644_v31  ;;  %26358 = vst [vmem:[#allocation24_spill] sm:$0xff] %v22661_v38  ;;  %v22670_v44 = vld [vmem:[#allocation8 + $0x50] sm:$0xff]  ;;  %19395 = vmatprep.subr.bf16.mxu1 %v26086_v0  ;;  %19205 = vmatprep.subr.bf16.mxu0 %v22629_v25  ;;  %v22684_v46 = vpack.c.bf16 %v26061_v34, %v26062_v33  ;;  %v26058_v47 = vand.u32 4294901760, %v22653_v37  ;;  %v26068_v48 = vand.u32 4294901760, %v22666_v42  ;;  %v22688_v49 = vld [vmem:[#allocation8 + $0x58] sm:$0xff] }
  0x63   :  { %26359 = vst [vmem:[#allocation25_spill] sm:$0xff] %v22678_v45  ;;  %v22690_v50 = vld [vmem:[#allocation9 + $0x50] sm:$0xff]  ;;  %v22692_v51 = vld [vmem:[#allocation9 + $0x58] sm:$0xff]  ;;  %v22698_v52 = vpack.c.bf16 %v26057_v40, %v26060_v39  ;;  %v26065_v53 = vand.u32 4294901760, %v22668_v43  ;;  %v26067_v54 = vand.u32 4294901760, %v22670_v44  ;;  %v26066_v55 = vand.u32 4294901760, %v22688_v49 }
  0x64   :  { %26360 = vst [vmem:[#allocation26_spill] sm:$0xff] %v22684_v46  ;;  %v22703_v56 = vld [vmem:[#allocation8 + $0x60] sm:$0xff]  ;;  %v22705_v57 = vld [vmem:[#allocation8 + $0x68] sm:$0xff]  ;;  %v22713_v59 = vpack.c.bf16 %v26058_v47, %v26059_v41  ;;  %v26075_v60 = vand.u32 4294901760, %v22690_v50  ;;  %v26074_v61 = vand.u32 4294901760, %v22692_v51  ;;  %v22720_v1 = vld [vmem:[#allocation8 + $0x70] sm:$0xff] }
  0x65   :  { %26361 = vst [vmem:[#allocation27_spill] sm:$0xff] %v22698_v52  ;;  %v22707_v58 = vld [vmem:[#allocation9 + $0x60] sm:$0xff]  ;;  %v26078_v62 = vand.u32 4294901760, %v22703_v56  ;;  %v22718_v63 = vld [vmem:[#allocation9 + $0x68] sm:$0xff]  ;;  %v22722_v40 = vld [vmem:[#allocation8 + $0x78] sm:$0xff]  ;;  %19397 = vmatpush3.bf16.msra.mxu1 %v22644_v31  ;;  %19207 = vmatpush3.bf16.msra.mxu0 %v22629_v25  ;;  %v22730_v47 = vpack.c.bf16 %v26065_v53, %v26068_v48  ;;  %v22736_v41 = vpack.c.bf16 %v26066_v55, %v26067_v54  ;;  %v26077_v39 = vand.u32 4294901760, %v22705_v57 }
  0x66   :  { %26362 = vst [vmem:[#allocation28_spill] sm:$0xff] %v22713_v59  ;;  %v26085_v34 = vand.u32 4294901760, %v22707_v58  ;;  %v22740_v33 = vld [vmem:[#allocation9 + $0x70] sm:$0xff]  ;;  %v22742_v32 = vld [vmem:[#allocation9 + $0x78] sm:$0xff]  ;;  %19398 = vmatprep.subr.bf16.mxu1 %v26086_v0  ;;  %19209 = vmatprep.subr.bf16.mxu0 %v22661_v38  ;;  %v22750_v53 = vpack.c.bf16 %v26074_v61, %v26075_v60  ;;  %v26080_v55 = vand.u32 4294901760, %v22718_v63  ;;  %v26082_v54 = vand.u32 4294901760, %v22720_v1 }
  0x67   :  { %26363 = vst [vmem:[#allocation29_spill] sm:$0xff] %v22730_v47  ;;  %26364 = vst [vmem:[#allocation30_spill] sm:$0xff] %v22736_v41  ;;  %v96_v27 = vld [vmem:[#allocation3] sm:$0xff]  ;;  %v26081_v48 = vand.u32 4294901760, %v22722_v40  ;;  %v97_v26 = vld [vmem:[#allocation3 + $0x8] sm:$0xff]  ;;  %v22759_v19 = vpack.c.bf16 %v26077_v39, %v26078_v62  ;;  %v26084_v18 = vand.u32 4294901760, %v22740_v33  ;;  %v22782_v62 = vsub.f32 %v22580_v2, %v136_v5 }
  0x68   :  { %26365 = vst [vmem:[#allocation31_spill] sm:$0xff] %v22750_v53  ;;  %v1453_v21 = vld [vmem:[#allocation6] sm:$0xff]  ;;  %v26083_v13 = vand.u32 4294901760, %v22742_v32  ;;  %v22763_v61 = vand.u32 4294901760, %v96_v27  ;;  %v22769_v60 = vpack.c.bf16 %v26080_v55, %v26085_v34  ;;  %v22777_v39 = vand.u32 4294901760, %v97_v26  ;;  %v98_v11 = vld [vmem:[#allocation3 + $0x10] sm:$0xff] }
  0x69   :  { %26366 = vst [vmem:[#allocation32_spill] sm:$0xff] %v22759_v19  ;;  %v22775_v12 = vpack.c.bf16 %v26081_v48, %v26082_v54  ;;  %19400 = vmatpush3.bf16.msra.mxu1 %v22678_v45  ;;  %19211 = vmatpush3.bf16.msra.mxu0 %v22661_v38  ;;  %v22798_v54 = vsub.f32 %v22582_v3, %v139_v6  ;;  %v22800_v2 = vand.u32 4294901760, %v1453_v21  ;;  %v26378_v45 = vand.u32 4294901760, %v22782_v62 }
  0x6a   :  { %26367 = vst [vmem:[#allocation33_spill] sm:$0xff] %v22763_v61  ;;  %26368 = vst [vmem:[#allocation34_spill] sm:$0xff] %v22769_v60  ;;  %v22790_v55 = vpack.c.bf16 %v26083_v13, %v26084_v18  ;;  %v22793_v48 = vsub.f32 %v96_v27, %v22763_v61  ;;  %19401 = vmatprep.subr.bf16.mxu1 %v26086_v0  ;;  %19213 = vmatprep.subr.bf16.mxu0 %v22684_v46  ;;  %v26375_v18 = vand.u32 4294901760, %v22588_v7  ;;  %v26380_v38 = vmov 0.0|0.0  }
  0x6b   :  { %26369 = vst [vmem:[#allocation35_spill] sm:$0xff] %v22775_v12  ;;  %26370 = vst [vmem:[#allocation36_spill] sm:$0xff] %v22777_v39  ;;  %v22805_v5 = vsub.f32 %v97_v26, %v22777_v39  ;;  %v22811_v27 = vsub.f32 %v22584_v4, %v1456_v8  ;;  %v26097_v34 = vand.u32 4294901760, %v22798_v54  ;;  %v22821_v0 = vsub.f32 %v1453_v21, %v22800_v2  ;;  %v99_v8 = vld [vmem:[#allocation3 + $0x18] sm:$0xff] }
  0x6c   :  { %26371 = vst [vmem:[#allocation37_spill] sm:$0xff] %v22790_v55  ;;  %26372 = vst [vmem:[#allocation38_spill] sm:$0xff] %v22793_v48  ;;  %v22816_v3 = vsub.f32 %v22588_v7, %v26375_v18  ;;  %v26094_v6 = vand.u32 4294901760, %v22793_v48  ;;  %v22823_v26 = vand.u32 4294901760, %v98_v11  ;;  %v380_v4 = vsub.f32 %v22782_v62, %v26378_v45 }
  0x6d   :  { %26373 = vst [vmem:[#allocation39_spill] sm:$0xff] %v22800_v2  ;;  %26374 = vst [vmem:[#allocation40_spill] sm:$0xff] %v22805_v5  ;;  %19403 = vmatpush3.bf16.msra.mxu1 %v22698_v52  ;;  %19215 = vmatpush3.bf16.msra.mxu0 %v22684_v46  ;;  %v387_v21 = vsub.f32 %v22798_v54, %v26097_v34  ;;  %v26381_v7 = vand.u32 4294901760, %v22805_v5  ;;  %v26382_v46 = vand.u32 4294901760, %v22811_v27  ;;  %v26384_v24 = vand.u32 4294901760, %v22821_v0 }
  0x6e   :  { %26376 = vst [vmem:[#allocation41_spill] sm:$0xff] %v22821_v0  ;;  %26377 = vst [vmem:[#allocation42_spill] sm:$0xff] %v22823_v26  ;;  %v219_v18 = vsub.f32 %v22793_v48, %v26094_v6  ;;  %v22841_v45 = vsub.f32 %v98_v11, %v22823_v26  ;;  %19404 = vmatprep.subr.bf16.mxu1 %v26380_v38  ;;  %19217 = vmatprep.subr.bf16.mxu0 %v22713_v59  ;;  %v381_v6 = vand.u32 4294901760, %v380_v4 }
  0x6f   :  { %v22848_v52 = vsub.f32 %v22805_v5, %v26381_v7  ;;  %v1550_v34 = vsub.f32 %v22811_v27, %v26382_v46  ;;  %v26383_v13 = vand.u32 4294901760, %v22816_v3  ;;  %v388_v25 = vand.u32 4294901760, %v387_v21  ;;  %v100_v7 = vld [vmem:[#allocation3 + $0x20] sm:$0xff]  ;;  %v101_v21 = vld [vmem:[#allocation3 + $0x28] sm:$0xff] }
  0x70   :  { %26379 = vst [vmem:[#allocation43_spill] sm:$0xff] %v22841_v45  ;;  %v220_v31 = vand.u32 4294901760, %v219_v18  ;;  %v22859_v17 = vsub.f32 %v22821_v0, %v26384_v24  ;;  %v26114_v48 = vand.u32 4294901760, %v22841_v45  ;;  %v22863_v2 = vand.u32 4294901760, %v99_v8  ;;  %v102_v0 = vld [vmem:[#allocation3 + $0x30] sm:$0xff] }
  0x71   :  { %v1557_v11 = vsub.f32 %v22816_v3, %v26383_v13  ;;  %v1551_v5 = vand.u32 4294901760, %v1550_v34  ;;  %19406 = vmatpush3.bf16.msra.mxu1 %v22730_v47  ;;  %19219 = vmatpush3.bf16.msra.mxu0 %v22713_v59  ;;  %v22867_v13 = vpack.c.bf16 %v388_v25, %v381_v6  ;;  %v26385_v18 = vand.u32 4294901760, %v22591_v9 }
  0x72   :  { %v22873_v24 = vsub.f32 %v22841_v45, %v26114_v48  ;;  %19407 = vmatprep.subr.bf16.mxu1 %v26380_v38  ;;  %19221 = vmatprep.subr.bf16.mxu0 %v22736_v41  ;;  %v22885_v25 = vsub.f32 %v99_v8, %v22863_v2  ;;  %v26388_v6 = vand.u32 4294901760, %v22593_v10  ;;  %v22892_v46 = vand.u32 4294901760, %v100_v7 }
  0x73   :  { %v1558_v26 = vand.u32 4294901760, %v1557_v11  ;;  %v22878_v34 = vsub.f32 %v22591_v9, %v26385_v18  ;;  %15200 = vmatprep.mubr.f32.mxu0 %v220_v31  ;;  %v26390_v4 = vand.u32 4294901760, %v22598_v14  ;;  %v22911_v9 = vand.u32 4294901760, %v101_v21 }
  0x74   :  { %26387 = vst [vmem:[#allocation45_spill] sm:$0xff] %v22885_v25  ;;  %v22890_v48 = vsub.f32 %v22593_v10, %v26388_v6  ;;  %26389 = vst [vmem:[#allocation46_spill] sm:$0xff] %v22892_v46  ;;  %v26124_v10 = vand.u32 4294901760, %v22885_v25  ;;  %v22909_v31 = vsub.f32 %v100_v7, %v22892_v46 }
  0x75   :  { %v22882_v11 = vpack.c.bf16 %v1558_v26, %v1551_v5  ;;  %v26115_v18 = vand.u32 4294901760, %v22878_v34  ;;  %v22899_v5 = vsub.f32 %v22598_v14, %v26390_v4  ;;  %v26391_v26 = vand.u32 4294901760, %v22600_v15  ;;  %26393 = vst [vmem:[#allocation48_spill] sm:$0xff] %v22911_v9  ;;  %19409 = vmatpush3.bf16.msra.mxu1 %v22750_v53  ;;  %19223 = vmatpush3.bf16.msra.mxu0 %v22736_v41 }
  0x76   :  { %26392 = vst [vmem:[#allocation47_spill] sm:$0xff] %v22909_v31  ;;  %19410 = vmatprep.subr.bf16.mxu1 %v26380_v38  ;;  %19225 = vmatprep.subr.bf16.mxu0 %v22759_v19  ;;  %v22930_v7 = vsub.f32 %v22885_v25, %v26124_v10  ;;  %v26131_v4 = vand.u32 4294901760, %v22909_v31  ;;  %v22937_v53 = vsub.f32 %v101_v21, %v22911_v9  ;;  %v26399_v25 = vand.u32 4294901760, %v22612_v20 }
  0x77   :  { %26386 = vst [vmem:[#allocation44_spill] sm:$0xff] %v22882_v11  ;;  %v22904_v8 = vsub.f32 %v22600_v15, %v26391_v26  ;;  %v394_v14 = vsub.f32 %v22878_v34, %v26115_v18  ;;  %v26394_v26 = vand.u32 4294901760, %v22602_v16  ;;  %v26395_v18 = vand.u32 4294901760, %v22890_v48 }
  0x78   :  { %26396 = vst [vmem:[#allocation49_spill] sm:$0xff] %v22937_v53  ;;  %v26403_v9 = vand.u32 4294901760, %v22617_v23 }
  0x79   :  { %v22923_v6 = vsub.f32 %v22602_v16, %v26394_v26  ;;  %v401_v15 = vsub.f32 %v22890_v48, %v26395_v18  ;;  %v395_v16 = vand.u32 4294901760, %v394_v14  ;;  %v26397_v26 = vand.u32 4294901760, %v22899_v5  ;;  %19412 = vmatpush3.bf16.msra.mxu1 %v22769_v60  ;;  %19227 = vmatpush3.bf16.msra.mxu0 %v22759_v19 }
  0x7a   :  { %v26398_v47 = vand.u32 4294901760, %v22904_v8  ;;  %v22950_v18 = vsub.f32 %v22909_v31, %v26131_v4  ;;  %v103_v4 = vld [vmem:[#allocation3 + $0x38] sm:$0xff]  ;;  %19413 = vmatprep.subr.bf16.mxu1 %v26380_v38  ;;  %19229 = vmatprep.subr.bf16.mxu0 %v22775_v12 }
  0x7b   :  { %v1564_v41 = vsub.f32 %v22899_v5, %v26397_v26  ;;  %v26134_v10 = vand.u32 4294901760, %v22923_v6  ;;  %v402_v45 = vand.u32 4294901760, %v401_v15  ;;  %v22961_v15 = vsub.f32 %v22612_v20, %v26399_v25 }
  0x7c   :  { %v1571_v59 = vsub.f32 %v22904_v8, %v26398_v47  ;;  %v22988_v46 = vand.u32 4294901760, %v103_v4 }
  0x7d   :  { %v1565_v14 = vand.u32 4294901760, %v1564_v41  ;;  %v408_v47 = vsub.f32 %v22923_v6, %v26134_v10  ;;  %v19236_v21 = vpack.c.bf16 %v402_v45, %v395_v16  ;;  %v26400_v41 = vand.u32 4294901760, %v22937_v53  ;;  %v104_v16 = vld [vmem:[#allocation3 + $0x40] sm:$0xff]  ;;  %19415 = vmatpush3.bf16.msra.mxu1 %v22790_v55  ;;  %19231 = vmatpush3.bf16.msra.mxu0 %v22775_v12 }
  0x7e   :  { %v1572_v26 = vand.u32 4294901760, %v1571_v59  ;;  %v26401_v10 = vand.u32 4294901760, %v22615_v22  ;;  %v26145_v31 = vand.u32 4294901760, %v22961_v15  ;;  %v22982_v45 = vsub.f32 %v22617_v23, %v26403_v9  ;;  %26405 = vst [vmem:[#allocation52_spill] sm:$0xff] %v22988_v46  ;;  %19416 = vmatprep.subr.bf16.mxu1 %v26380_v38  ;;  %19233 = vmatprep.subr.bf16.mxu0 %v22867_v13 }
  0x7f   :  { %v22969_v59 = vsub.f32 %v22937_v53, %v26400_v41  ;;  %v409_v25 = vand.u32 4294901760, %v408_v47  ;;  %v22986_v53 = vand.u32 4294901760, %v102_v0  ;;  %v26406_v9 = vand.u32 4294901760, %v22633_v28 }
  0x80   :  { %v22974_v19 = vsub.f32 %v22615_v22, %v26401_v10  ;;  %v22976_v20 = vpack.c.bf16 %v1572_v26, %v1565_v14  ;;  %v415_v22 = vsub.f32 %v22961_v15, %v26145_v31  ;;  %v26155_v23 = vand.u32 4294901760, %v22982_v45 }
  0x81   :  { %26404 = vst [vmem:[#allocation51_spill] sm:$0xff] %v22986_v53  ;;  %v22999_v10 = vsub.f32 %v22633_v28, %v26406_v9  ;;  %v26407_v14 = vand.u32 4294901760, %v22635_v29  ;;  %v23012_v31 = vsub.f32 %v102_v0, %v22986_v53  ;;  %v23015_v60 = vsub.f32 %v103_v4, %v22988_v46 }
  0x82   :  { %26402 = vst [vmem:[#allocation50_spill] sm:$0xff] %v22976_v20  ;;  %v26150_v41 = vand.u32 4294901760, %v22974_v19  ;;  %v23017_v28 = vand.u32 4294901760, %v104_v16  ;;  %v416_v9 = vand.u32 4294901760, %v415_v22  ;;  %v26410_v12 = vand.u32 4294901760, %v22848_v52 }
  0x83   :  { %v23004_v26 = vsub.f32 %v22635_v29, %v26407_v14  ;;  %26408 = vst [vmem:[#allocation53_spill] sm:$0xff] %v23012_v31  ;;  %26409 = vst [vmem:[#allocation54_spill] sm:$0xff] %v23015_v60  ;;  %v1585_v29 = vsub.f32 %v22982_v45, %v26155_v23  ;;  %v26159_v14 = vand.u32 4294901760, %v22999_v10  ;;  %v26411_v0 = vand.u32 4294901760, %v22859_v17 }
  0x84   :  { %v1578_v47 = vsub.f32 %v22974_v19, %v26150_v41  ;;  %15201 = vmatmul.mubr.f32.vlgmr.msra.gmra.mrb[0].mxu0 %v26410_v12  ;;  %v26157_v4 = vand.u32 4294901760, %v23012_v31  ;;  %v26158_v46 = vand.u32 4294901760, %v23015_v60  ;;  %v26412_v22 = vand.u32 4294901760, %v22637_v30 }
  0x85   :  { %v26156_v55 = vand.u32 4294901760, %v23004_v26  ;;  %15537 = vmatmul.mubr.f32.vlgmr.msra.gmra.mrb[0].mxu1 %v26411_v0  ;;  %19235 = vmatpush3.bf16.msra.mxu0 %v22867_v13  ;;  %v19240_v23 = vpack.c.bf16 %v416_v9, %v409_v25  ;;  %v1586_v52 = vand.u32 4294901760, %v1585_v29  ;;  %v422_v12 = vsub.f32 %v22999_v10, %v26159_v14  ;;  %v105_v0 = vld [vmem:[#allocation3 + $0x48] sm:$0xff] }
  0x86   :  { %v1579_v41 = vand.u32 4294901760, %v1578_v47  ;;  %v23033_v53 = vsub.f32 %v22637_v30, %v26412_v22  ;;  %19418 = vmatpush3.bf16.msra.mxu1 %v22882_v11  ;;  %v26413_v47 = vand.u32 4294901760, %v22873_v24  ;;  %v279_v30 = vsub.f32 %v23012_v31, %v26157_v4  ;;  %19237 = vmatprep.subr.bf16.mxu0 %v19236_v21 }
  0x87   :  { %v429_v17 = vsub.f32 %v23004_v26, %v26156_v55  ;;  %19419 = vmatprep.subr.bf16.mxu1 %v26380_v38  ;;  %v289_v13 = vsub.f32 %v23015_v60, %v26158_v46  ;;  %v26414_v9 = vand.u32 4294901760, %v22649_v35  ;;  %v423_v22 = vand.u32 4294901760, %v422_v12 }
  0x88   :  { %15203 = vmatprep.mubr.f32.mxu0 %v26413_v47  ;;  %v23058_v24 = vpack.c.bf16 %v1586_v52, %v1579_v41  ;;  %v23061_v55 = vsub.f32 %v104_v16, %v23017_v28  ;;  %v26417_v4 = vmov 0.0   ;;  %v26418_v46 = vand.u32 4294901760, %v22930_v7  ;;  %v106_v7 = vld [vmem:[#allocation3 + $0x50] sm:$0xff] }
  0x89   :  { %v23056_v29 = vsub.f32 %v22649_v35, %v26414_v9  ;;  %v430_v47 = vand.u32 4294901760, %v429_v17  ;;  %15571 = vmatprep.mubr.msk.f32.mxu1 %vm22456_vm0, %v26417_v4  ;;  %v280_v14 = vand.u32 4294901760, %v279_v30  ;;  %v290_v25 = vand.u32 4294901760, %v289_v13  ;;  %19239 = vmatpush3.bf16.msra.mxu0 %v19236_v21 }
  0x8a   :  { %26415 = vst [vmem:[#allocation55_spill] sm:$0xff] %v23058_v24  ;;  %26416 = vst [vmem:[#allocation56_spill] sm:$0xff] %v23061_v55  ;;  %15204 = vmatmul.mubr.f32.gmra.mrb[2].mxu0 %v26418_v46  ;;  %v26419_v35 = vand.u32 4294901760, %v23033_v53  ;;  %19421 = vmatpush3.bf16.msra.mxu1 %v22976_v20  ;;  %v26163_v16 = vand.u32 4294901760, %v23061_v55  ;;  %v23073_v12 = vand.u32 4294901760, %v105_v0  ;;  %v26420_v17 = vand.u32 4294901760, %v22651_v36 }
  0x8b   :  { %v26160_v41 = vand.u32 4294901760, %v23056_v29  ;;  %v19244_v52 = vpack.c.bf16 %v430_v47, %v423_v22  ;;  %v26421_v30 = vand.u32 4294901760, %v22950_v18  ;;  %19422 = vmatprep.subr.bf16.mxu1 %v26380_v38  ;;  %v26422_v22 = vand.u32 4294901760, %v22653_v37  ;;  %19241 = vmatprep.subr.bf16.mxu0 %v19240_v23 }
  0x8c   :  { %v1592_v9 = vsub.f32 %v23033_v53, %v26419_v35  ;;  %v23078_v46 = vsub.f32 %v22651_v36, %v26420_v17  ;;  %v26423_v35 = vand.u32 4294901760, %v22666_v42  ;;  %v299_v18 = vsub.f32 %v23061_v55, %v26163_v16 }
  0x8d   :  { %15206 = vmatprep.mubr.f32.mxu0 %v26421_v30  ;;  %v1599_v21 = vsub.f32 %v23056_v29, %v26160_v41  ;;  %v23089_v47 = vsub.f32 %v22653_v37, %v26422_v22  ;;  %v26425_v30 = vand.u32 4294901760, %v22668_v43  ;;  %v107_v22 = vld [vmem:[#allocation3 + $0x58] sm:$0xff]  ;;  %v26426_v41 = vand.u32 4294901760, %v22969_v59  ;;  %19243 = vmatpush3.bf16.msra.mxu0 %v19240_v23 }
  0x8e   :  { %v1593_v13 = vand.u32 4294901760, %v1592_v9  ;;  %v23094_v36 = vsub.f32 %v22666_v42, %v26423_v35  ;;  %v23100_v9 = vsub.f32 %v105_v0, %v23073_v12  ;;  %v23112_v16 = vand.u32 4294901760, %v106_v7  ;;  %19424 = vmatpush3.bf16.msra.mxu1 %v23058_v24  ;;  %19245 = vmatprep.subr.bf16.mxu0 %v19244_v52 }
  0x8f   :  { %v23106_v37 = vsub.f32 %v22668_v43, %v26425_v30  ;;  %15207 = vmatmul.mubr.f32.gmra.mrb[4].mxu0 %v26426_v41  ;;  %v1600_v42 = vand.u32 4294901760, %v1599_v21  ;;  %v26164_v35 = vand.u32 4294901760, %v23089_v47  ;;  %v300_v0 = vand.u32 4294901760, %v299_v18  ;;  %19425 = vmatprep.subr.bf16.mxu1 %v26380_v38 }
  0x90   :  { %26424 = vst [vmem:[#allocation57_spill] sm:$0xff] %v23100_v9  ;;  %v26167_v20 = vand.u32 4294901760, %v23094_v36  ;;  %v26172_v17 = vand.u32 4294901760, %v23100_v9  ;;  %v26427_v43 = vand.u32 4294901760, %v23078_v46  ;;  %15209 = vmatprep.mubr.f32.mxu0 %v280_v14  ;;  %v23129_v18 = vand.u32 4294901760, %v107_v22 }
  0x91   :  { %v26173_v59 = vand.u32 4294901760, %v23106_v37  ;;  %v23121_v41 = vpack.c.bf16 %v1600_v42, %v1593_v13  ;;  %v443_v21 = vsub.f32 %v23089_v47, %v26164_v35  ;;  %v23138_v42 = vsub.f32 %v106_v7, %v23112_v16  ;;  %19247 = vmatpush3.bf16.msra.mxu0 %v19244_v52 }
  0x92   :  { %v436_v30 = vsub.f32 %v23078_v46, %v26427_v43  ;;  %v1606_v23 = vsub.f32 %v23094_v36, %v26167_v20  ;;  %v309_v43 = vsub.f32 %v23100_v9, %v26172_v17  ;;  %v23141_v20 = vsub.f32 %v107_v22, %v23129_v18 }
  0x93   :  { %26428 = vst [vmem:[#allocation58_spill] sm:$0xff] %v23121_v41  ;;  %v1613_v13 = vsub.f32 %v23106_v37, %v26173_v59  ;;  %26429 = vst [vmem:[#allocation59_spill] sm:$0xff] %v23138_v42  ;;  %15210 = vmatmul.mubr.f32.gmra.mrb[6].mxu0 %v290_v25  ;;  %v444_v35 = vand.u32 4294901760, %v443_v21  ;;  %v26431_v11 = vand.u32 4294901760, %v22670_v44  ;;  %19427 = vmatpush3.bf16.msra.mxu1 %v23121_v41  ;;  %v26175_v59 = vand.u32 4294901760, %v23138_v42  ;;  %v108_v21 = vld [vmem:[#allocation3 + $0x60] sm:$0xff] }
  0x94   :  { %v437_v14 = vand.u32 4294901760, %v436_v30  ;;  %v1607_v24 = vand.u32 4294901760, %v1606_v23  ;;  %26430 = vst [vmem:[#allocation60_spill] sm:$0xff] %v23141_v20  ;;  %v310_v30 = vand.u32 4294901760, %v309_v43  ;;  %v26432_v7 = vand.u32 4294901760, %v22688_v49  ;;  %15212 = vmatprep.mubr.f32.mxu0 %v300_v0  ;;  %19428 = vmatprep.subr.bf16.mxu1 %v26380_v38  ;;  %v109_v43 = vld [vmem:[#allocation3 + $0x68] sm:$0xff] }
  0x95   :  { %v23146_v55 = vsub.f32 %v22670_v44, %v26431_v11  ;;  %v1614_v17 = vand.u32 4294901760, %v1613_v13  ;;  %v26174_v44 = vand.u32 4294901760, %v23141_v20  ;;  %v26433_v52 = vand.u32 4294901760, %v22690_v50 }
  0x96   :  { %v23153_v25 = vsub.f32 %v22688_v49, %v26432_v7  ;;  %v19248_v22 = vpack.c.bf16 %v444_v35, %v437_v14  ;;  %v319_v49 = vsub.f32 %v23138_v42, %v26175_v59  ;;  %v26435_v35 = vand.u32 4294901760, %v22692_v51 }
  0x97   :  { %v26176_v11 = vand.u32 4294901760, %v23146_v55  ;;  %v23161_v23 = vsub.f32 %v22690_v50, %v26433_v52  ;;  %v23163_v13 = vpack.c.bf16 %v1614_v17, %v1607_v24  ;;  %15213 = vmatmul.mubr.f32.gmra.mrb[8].mxu0 %v310_v30  ;;  %v329_v50 = vsub.f32 %v23141_v20, %v26174_v44 }
  0x98   :  { %v26179_v0 = vand.u32 4294901760, %v23153_v25  ;;  %v23172_v14 = vsub.f32 %v22692_v51, %v26435_v35  ;;  %19249 = vmatprep.subr.bf16.mxu0 %v19248_v22  ;;  %v23181_v7 = vand.u32 4294901760, %v108_v21  ;;  %v320_v52 = vand.u32 4294901760, %v319_v49 }
  0x99   :  { %26434 = vst [vmem:[#allocation61_spill] sm:$0xff] %v23163_v13  ;;  %v450_v24 = vsub.f32 %v23146_v55, %v26176_v11  ;;  %v26182_v17 = vand.u32 4294901760, %v23161_v23  ;;  %19430 = vmatpush3.bf16.msra.mxu1 %v23163_v13  ;;  %19251 = vmatpush3.bf16.msra.mxu0 %v19248_v22  ;;  %v23188_v35 = vand.u32 4294901760, %v109_v43  ;;  %v330_v44 = vand.u32 4294901760, %v329_v50 }
  0x9a   :  { %v457_v51 = vsub.f32 %v23153_v25, %v26179_v0  ;;  %v26183_v30 = vand.u32 4294901760, %v23172_v14  ;;  %19431 = vmatprep.subr.bf16.mxu1 %v26380_v38  ;;  %v23195_v13 = vsub.f32 %v108_v21, %v23181_v7  ;;  %15215 = vmatprep.mubr.f32.mxu0 %v320_v52  ;;  %v26438_v41 = vand.u32 4294901760, %v22703_v56 }
  0x9b   :  { %v451_v59 = vand.u32 4294901760, %v450_v24  ;;  %v1620_v11 = vsub.f32 %v23161_v23, %v26182_v17  ;;  %v23201_v0 = vsub.f32 %v109_v43, %v23188_v35  ;;  %15216 = vmatmul.mubr.f32.gmra.mrb[10].mxu0 %v330_v44  ;;  %v26439_v21 = vand.u32 4294901760, %v22705_v57  ;;  %v110_v43 = vld [vmem:[#allocation3 + $0x70] sm:$0xff] }
  0x9c   :  { %26436 = vst [vmem:[#allocation62_spill] sm:$0xff] %v23195_v13  ;;  %v458_v22 = vand.u32 4294901760, %v457_v51  ;;  %v1627_v49 = vsub.f32 %v23172_v14, %v26183_v30  ;;  %v23206_v50 = vsub.f32 %v22703_v56, %v26438_v41  ;;  %v26188_v17 = vand.u32 4294901760, %v23195_v13 }
  0x9d   :  { %26437 = vst [vmem:[#allocation63_spill] sm:$0xff] %v23201_v0  ;;  %v1621_v24 = vand.u32 4294901760, %v1620_v11  ;;  %v23212_v52 = vsub.f32 %v22705_v57, %v26439_v21  ;;  %v26440_v51 = vand.u32 4294901760, %v22707_v58  ;;  %v26189_v56 = vand.u32 4294901760, %v23201_v0 }
  0x9e   :  { %v19252_v20 = vpack.c.bf16 %v458_v22, %v451_v59  ;;  %v1628_v42 = vand.u32 4294901760, %v1627_v49  ;;  %v26192_v41 = vand.u32 4294901760, %v23206_v50  ;;  %v339_v44 = vsub.f32 %v23195_v13, %v26188_v17 }
  0x9f   :  { %v23217_v30 = vsub.f32 %v22707_v58, %v26440_v51  ;;  %v26195_v11 = vand.u32 4294901760, %v23212_v52  ;;  %v26441_v21 = vand.u32 4294901760, %v22718_v63  ;;  %v111_v51 = vld [vmem:[#allocation3 + $0x78] sm:$0xff]  ;;  %v349_v22 = vsub.f32 %v23201_v0, %v26189_v56 }
  0xa0   :  { %19253 = vmatprep.subr.bf16.mxu0 %v19252_v20  ;;  %v23231_v59 = vpack.c.bf16 %v1628_v42, %v1621_v24  ;;  %v464_v49 = vsub.f32 %v23206_v50, %v26192_v41  ;;  %v23239_v17 = vand.u32 4294901760, %v110_v43  ;;  %v340_v57 = vand.u32 4294901760, %v339_v44 }
  0xa1   :  { %v23229_v58 = vsub.f32 %v22718_v63, %v26441_v21  ;;  %19255 = vmatpush3.bf16.msra.mxu0 %v19252_v20  ;;  %v471_v63 = vsub.f32 %v23212_v52, %v26195_v11  ;;  %v26444_v21 = vand.u32 4294901760, %v23217_v30  ;;  %v350_v56 = vand.u32 4294901760, %v349_v22 }
  0xa2   :  { %26442 = vst [vmem:[#allocation64_spill] sm:$0xff] %v23231_v59  ;;  %26443 = vst [vmem:[#allocation65_spill] sm:$0xff] %v23239_v17  ;;  %19433 = vmatpush3.bf16.msra.mxu1 %v23231_v59  ;;  %v465_v0 = vand.u32 4294901760, %v464_v49  ;;  %v23250_v41 = vsub.f32 %v110_v43, %v23239_v17  ;;  %v23252_v13 = vand.u32 4294901760, %v111_v51  ;;  %15218 = vmatprep.mubr.f32.mxu0 %v340_v57  ;;  %v26447_v11 = vand.u32 4294901760, %v22720_v1 }
  0xa3   :  { %v1634_v42 = vsub.f32 %v23217_v30, %v26444_v21  ;;  %v26198_v24 = vand.u32 4294901760, %v23229_v58  ;;  %19434 = vmatprep.subr.bf16.mxu1 %v26380_v38  ;;  %v472_v20 = vand.u32 4294901760, %v471_v63  ;;  %15219 = vmatmul.mubr.f32.gmra.mrb[12].mxu0 %v350_v56  ;;  %v26449_v57 = vand.u32 4294901760, %v22722_v40 }
  0xa4   :  { %26445 = vst [vmem:[#allocation66_spill] sm:$0xff] %v23250_v41  ;;  %26446 = vst [vmem:[#allocation67_spill] sm:$0xff] %v23252_v13  ;;  %v23261_v59 = vsub.f32 %v22720_v1, %v26447_v11  ;;  %v26201_v43 = vand.u32 4294901760, %v23250_v41  ;;  %v23265_v22 = vsub.f32 %v111_v51, %v23252_v13  ;;  %v26450_v63 = vand.u32 4294901760, %v22740_v33 }
  0xa5   :  { %v1635_v44 = vand.u32 4294901760, %v1634_v42  ;;  %v1641_v21 = vsub.f32 %v23229_v58, %v26198_v24  ;;  %v23270_v49 = vsub.f32 %v22722_v40, %v26449_v57  ;;  %v19256_v24 = vpack.c.bf16 %v472_v20, %v465_v0 }
  0xa6   :  { %26448 = vst [vmem:[#allocation68_spill] sm:$0xff] %v23265_v22  ;;  %v23275_v42 = vsub.f32 %v22740_v33, %v26450_v63  ;;  %v477_v1 = vand.u32 4294901760, %v23261_v59  ;;  %v26451_v56 = vand.u32 4294901760, %v22742_v32  ;;  %v359_v51 = vsub.f32 %v23250_v41, %v26201_v43 }
  0xa7   :  { %v1642_v9 = vand.u32 4294901760, %v1641_v21  ;;  %v26208_v40 = vand.u32 4294901760, %v23265_v22  ;;  %v484_v57 = vand.u32 4294901760, %v23270_v49  ;;  %19257 = vmatprep.subr.bf16.mxu0 %v19256_v24 }
  0xa8   :  { %v23281_v11 = vsub.f32 %v22742_v32, %v26451_v56  ;;  %v1647_v33 = vand.u32 4294901760, %v23275_v42  ;;  %v478_v20 = vsub.f32 %v23261_v59, %v477_v1  ;;  %19259 = vmatpush3.bf16.msra.mxu0 %v19256_v24  ;;  %v360_v32 = vand.u32 4294901760, %v359_v51 }
  0xa9   :  { %v23289_v0 = vpack.c.bf16 %v1642_v9, %v1635_v44  ;;  %v369_v63 = vsub.f32 %v23265_v22, %v26208_v40  ;;  %v485_v56 = vsub.f32 %v23270_v49, %v484_v57  ;;  %v19264_v40 = vpack.c.bf16 %v22798_v54, %v22782_v62 }
  0xaa   :  { %v1654_v21 = vand.u32 4294901760, %v23281_v11  ;;  %v1648_v43 = vsub.f32 %v23275_v42, %v1647_v33  ;;  %v479_v41 = vand.u32 4294901760, %v478_v20  ;;  %15221 = vmatprep.mubr.f32.mxu0 %v360_v32  ;;  %v23308_v20 = vpack.c.bf16 %v22816_v3, %v22811_v27 }
  0xab   :  { %26452 = vst [vmem:[#allocation69_spill] sm:$0xff] %v23289_v0  ;;  %19436 = vmatpush3.bf16.msra.mxu1 %v23289_v0  ;;  %v370_v44 = vand.u32 4294901760, %v369_v63  ;;  %v486_v60 = vand.u32 4294901760, %v485_v56  ;;  %v19268_v32 = vpack.c.bf16 %v22890_v48, %v22878_v34  ;;  %v26456_v63 = vand.u32 4294901760, %v22798_v54 }
  0xac   :  { %v1655_v9 = vsub.f32 %v23281_v11, %v1654_v21  ;;  %19437 = vmatprep.subr.bf16.mxu1 %v26380_v38  ;;  %v1649_v24 = vand.u32 4294901760, %v1648_v43  ;;  %26454 = vst [vmem:[#allocation71_spill] sm:$0xff] %v23308_v20  ;;  %v26455_v43 = vand.u32 4294901760, %v22782_v62  ;;  %v26458_v56 = vand.u32 4294901760, %v22816_v3 }
  0xad   :  { %15222 = vmatmul.mubr.f32.gmra.mrb[14].mxu0 %v370_v44  ;;  %v19260_v31 = vpack.c.bf16 %v486_v60, %v479_v41  ;;  %v26457_v41 = vand.u32 4294901760, %v22811_v27  ;;  %v26459_v44 = vand.u32 4294901760, %v22878_v34  ;;  %v26461_v62 = vand.u32 4294901760, %v22899_v5 }
  0xae   :  { %v1656_v51 = vand.u32 4294901760, %v1655_v9  ;;  %15256 = vmatprep.mubr.f32.mxu0 %v22763_v61  ;;  %v23316_v60 = vpack.c.bf16 %v26456_v63, %v26455_v43  ;;  %v26462_v54 = vand.u32 4294901760, %v22904_v8  ;;  %v26463_v27 = vand.u32 4294901760, %v22923_v6 }
  0xaf   :  { %19261 = vmatprep.subr.bf16.mxu0 %v19260_v31  ;;  %v23323_v9 = vpack.c.bf16 %v26458_v56, %v26457_v41  ;;  %v26464_v3 = vand.u32 4294901760, %v22961_v15  ;;  %v26465_v34 = vand.u32 4294901760, %v22974_v19  ;;  %v26467_v41 = vand.u32 4294901760, %v22999_v10 }
  0xb0   :  { %v23303_v22 = vpack.c.bf16 %v1656_v51, %v1649_v24  ;;  %19263 = vmatpush3.bf16.msra.mxu0 %v19260_v31  ;;  %v26460_v24 = vand.u32 4294901760, %v22890_v48  ;;  %v23335_v43 = vpack.c.bf16 %v26462_v54, %v26461_v62  ;;  %v26466_v48 = vand.u32 4294901760, %v22982_v45 }
  0xb1   :  { %19265 = vmatprep.subr.bf16.mxu0 %v19264_v40  ;;  %v23342_v31 = vpack.c.bf16 %v26464_v3, %v26463_v27  ;;  %v26468_v56 = vand.u32 4294901760, %v23004_v26  ;;  %v26470_v62 = vand.u32 4294901760, %v23056_v29  ;;  %v26471_v27 = vand.u32 4294901760, %v23078_v46 }
  0xb2   :  { %26453 = vst [vmem:[#allocation70_spill] sm:$0xff] %v23303_v22  ;;  %19439 = vmatpush3.bf16.msra.mxu1 %v23303_v22  ;;  %v23329_v51 = vpack.c.bf16 %v26460_v24, %v26459_v44  ;;  %v23348_v63 = vpack.c.bf16 %v26466_v48, %v26465_v34  ;;  %v26469_v24 = vand.u32 4294901760, %v23033_v53  ;;  %v26472_v3 = vand.u32 4294901760, %v23089_v47 }
  0xb3   :  { %19440 = vmatprep.subr.bf16.mxu1 %v26380_v38  ;;  %v23354_v44 = vpack.c.bf16 %v26468_v56, %v26467_v41  ;;  %v26474_v34 = vand.u32 4294901760, %v23094_v36  ;;  %v26475_v48 = vand.u32 4294901760, %v23106_v37  ;;  %v26477_v41 = vand.u32 4294901760, %v23146_v55  ;;  %15257 = vmatmul.mubr.f32.vlgmr.msra.gmra.mrb[0].mxu0 %v22777_v39  ;;  %v26487_v39 = vld [vmem:[#allocation42_spill] sm:$0xff] }
  0xb4   :  { %v23360_v54 = vpack.c.bf16 %v26470_v62, %v26469_v24  ;;  %v23366_v22 = vpack.c.bf16 %v26472_v3, %v26471_v27  ;;  %v26478_v56 = vand.u32 4294901760, %v23153_v25  ;;  %v26479_v24 = vld [vmem:[#allocation39_spill] sm:$0xff]  ;;  %v26480_v62 = vand.u32 4294901760, %v23161_v23  ;;  %19267 = vmatpush3.bf16.msra.mxu0 %v19264_v40  ;;  %15259 = vmatprep.mubr.f32.mxu0 %v26487_v39 }
  0xb5   :  { %v23372_v0 = vpack.c.bf16 %v26475_v48, %v26474_v34  ;;  %15572 = vmatmul.mubr.f32.vlgmr.msra.gmra.mrb[0].mxu1 %v26479_v24  ;;  %v26481_v27 = vand.u32 4294901760, %v23172_v14  ;;  %v26483_v34 = vand.u32 4294901760, %v23212_v52  ;;  %v23403_v24 = vpack.c.bf16 %v22904_v8, %v22899_v5  ;;  %19269 = vmatprep.subr.bf16.mxu0 %v19268_v32  ;;  %v26489_v8 = vld [vmem:[#allocation46_spill] sm:$0xff]  ;;  %v26492_v40 = vld [vmem:[#allocation51_spill] sm:$0xff] }
  0xb6   :  { %26473 = vst [vmem:[#allocation72_spill] sm:$0xff] %v23366_v22  ;;  %v23378_v61 = vpack.c.bf16 %v26478_v56, %v26477_v41  ;;  %v26482_v22 = vand.u32 4294901760, %v23206_v50  ;;  %v26485_v41 = vand.u32 4294901760, %v23229_v58  ;;  %19442 = vmatpush3.bf16.msra.mxu1 %v23308_v20  ;;  %15606 = vmatprep.mubr.msk.f32.mxu1 %vm22456_vm0, %v26417_v4  ;;  %v23419_v5 = vpack.c.bf16 %v22982_v45, %v22974_v19  ;;  %v26493_v45 = vld [vmem:[#allocation52_spill] sm:$0xff] }
  0xb7   :  { %26476 = vst [vmem:[#allocation73_spill] sm:$0xff] %v23372_v0  ;;  %v23386_v3 = vpack.c.bf16 %v26481_v27, %v26480_v62  ;;  %v26484_v0 = vand.u32 4294901760, %v23217_v30  ;;  %26486 = vst [vmem:[#allocation74_spill] sm:$0xff] %v23403_v24  ;;  %v23405_v62 = vpack.c.bf16 %v484_v57, %v477_v1  ;;  %v23407_v27 = vpack.c.bf16 %v1654_v21, %v1647_v33  ;;  %v26511_v57 = vld [vmem:[#allocation53_spill] sm:$0xff]  ;;  %v26512_v33 = vld [vmem:[#allocation26_spill] sm:$0xff] }
  0xb8   :  { %v23392_v48 = vpack.c.bf16 %v26483_v34, %v26482_v22  ;;  %19443 = vmatprep.subr.bf16.mxu1 %v26380_v38  ;;  %v19272_v22 = vpack.c.bf16 %v22961_v15, %v22923_v6  ;;  %15260 = vmatmul.mubr.f32.gmra.mrb[2].mxu0 %v22863_v2  ;;  %26488 = vst [vmem:[#allocation42_spill] sm:$0xff] %v23419_v5  ;;  %v26490_v15 = vld [vmem:[#allocation48_spill] sm:$0xff]  ;;  %v26514_v21 = vld [vmem:[#allocation27_spill] sm:$0xff] }
  0xb9   :  { %v23398_v56 = vpack.c.bf16 %v26485_v41, %v26484_v0  ;;  %19271 = vmatpush3.bf16.msra.mxu0 %v19268_v32  ;;  %15262 = vmatprep.mubr.f32.mxu0 %v26489_v8  ;;  %v19276_v6 = vpack.c.bf16 %v23004_v26, %v22999_v10  ;;  %v23429_v1 = vpack.c.bf16 %v23056_v29, %v23033_v53  ;;  %v26513_v0 = vld [vmem:[#allocation54_spill] sm:$0xff]  ;;  %v26515_v32 = vld [vmem:[#allocation56_spill] sm:$0xff]  ;;  %v26517_v41 = vld [vmem:[#allocation57_spill] sm:$0xff] }
  0xba   :  { %19445 = vmatpush3.bf16.msra.mxu1 %v23403_v24  ;;  %19273 = vmatprep.subr.bf16.mxu0 %v19272_v22  ;;  %v19280_v19 = vpack.c.bf16 %v23089_v47, %v23078_v46  ;;  %v23439_v10 = vpack.c.bf16 %v23106_v37, %v23094_v36  ;;  %v19284_v53 = vpack.c.bf16 %v23153_v25, %v23146_v55  ;;  %v26498_v36 = vld [vmem:[#allocation38_spill] sm:$0xff]  ;;  %v26499_v37 = vld [vmem:[#allocation20_spill] sm:$0xff]  ;;  %v26530_v24 = vld [vmem:[#allocation37_spill] sm:$0xff] }
  0xbb   :  { %19446 = vmatprep.subr.bf16.mxu1 %v26380_v38  ;;  %26491 = vst [vmem:[#allocation46_spill] sm:$0xff] %v23429_v1  ;;  %v23449_v26 = vpack.c.bf16 %v23172_v14, %v23161_v23  ;;  %v19288_v29 = vpack.c.bf16 %v23212_v52, %v23206_v50  ;;  %v23459_v55 = vpack.c.bf16 %v23229_v58, %v23217_v30  ;;  %v26500_v25 = vld [vmem:[#allocation40_spill] sm:$0xff]  ;;  %v26501_v23 = vld [vmem:[#allocation41_spill] sm:$0xff]  ;;  %v26503_v30 = vld [vmem:[#allocation43_spill] sm:$0xff]  ;;  %v26531_v20 = vand.u32 4294901760, %v26498_v36 }
  0xbc   :  { %15263 = vmatmul.mubr.f32.gmra.mrb[4].mxu0 %v26490_v15  ;;  %26494 = vst [vmem:[#allocation48_spill] sm:$0xff] %v23439_v10  ;;  %v19292_v46 = vpack.c.bf16 %v23270_v49, %v23261_v59  ;;  %v23469_v47 = vpack.c.bf16 %v23281_v11, %v23275_v42  ;;  %v26502_v14 = vld [vmem:[#allocation21_spill] sm:$0xff]  ;;  %v26504_v50 = vld [vmem:[#allocation22_spill] sm:$0xff]  ;;  %v26506_v58 = vld [vmem:[#allocation23_spill] sm:$0xff] }
  0xbd   :  { %19275 = vmatpush3.bf16.msra.mxu0 %v19272_v22  ;;  %15265 = vmatprep.mubr.f32.mxu0 %v26492_v40  ;;  %26495 = vst [vmem:[#allocation51_spill] sm:$0xff] %v23449_v26  ;;  %26496 = vst [vmem:[#allocation52_spill] sm:$0xff] %v23459_v55  ;;  %v26505_v52 = vld [vmem:[#allocation45_spill] sm:$0xff]  ;;  %v26507_v59 = vld [vmem:[#allocation47_spill] sm:$0xff] }
  0xbe   :  { %19448 = vmatpush3.bf16.msra.mxu1 %v23419_v5  ;;  %19277 = vmatprep.subr.bf16.mxu0 %v19276_v6  ;;  %26497 = vst [vmem:[#allocation75_spill] sm:$0xff] %v23469_v47  ;;  %v26508_v49 = vld [vmem:[#allocation24_spill] sm:$0xff]  ;;  %v26509_v42 = vld [vmem:[#allocation49_spill] sm:$0xff] }
  0xbf   :  { %19449 = vmatprep.subr.bf16.mxu1 %v26380_v38  ;;  %v26510_v11 = vld [vmem:[#allocation25_spill] sm:$0xff]  ;;  %v26516_v34 = vld [vmem:[#allocation28_spill] sm:$0xff] }
  0xc0   :  { %15266 = vmatmul.mubr.f32.gmra.mrb[6].mxu0 %v26493_v45  ;;  %v26518_v22 = vld [vmem:[#allocation29_spill] sm:$0xff]  ;;  %v26529_v5 = vld [vmem:[#allocation68_spill] sm:$0xff] }
  0xc1   :  { %19279 = vmatpush3.bf16.msra.mxu0 %v19276_v6  ;;  %15268 = vmatprep.mubr.f32.mxu0 %v23017_v28  ;;  %v26519_v6 = vld [vmem:[#allocation59_spill] sm:$0xff] }
  0xc2   :  { %19451 = vmatpush3.bf16.msra.mxu1 %v23429_v1  ;;  %19281 = vmatprep.subr.bf16.mxu0 %v19280_v19  ;;  %v26528_v1 = vld [vmem:[#allocation35_spill] sm:$0xff] }
  0xc3   :  { %19452 = vmatprep.subr.bf16.mxu1 %v26380_v38 }
  0xc4   :  { %15269 = vmatmul.mubr.f32.gmra.mrb[8].mxu0 %v23073_v12 }
  0xc5   :  { %19283 = vmatpush3.bf16.msra.mxu0 %v19280_v19  ;;  %15271 = vmatprep.mubr.f32.mxu0 %v23112_v16  ;;  %v26520_v19 = vld [vmem:[#allocation30_spill] sm:$0xff] }
  0xc6   :  { %19454 = vmatpush3.bf16.msra.mxu1 %v23439_v10  ;;  %19285 = vmatprep.subr.bf16.mxu0 %v19284_v53  ;;  %v26527_v10 = vld [vmem:[#allocation66_spill] sm:$0xff] }
  0xc7   :  { %19455 = vmatprep.subr.bf16.mxu1 %v26380_v38 }
  0xc8   :  { %15272 = vmatmul.mubr.f32.gmra.mrb[10].mxu0 %v23129_v18 }
  0xc9   :  { %19287 = vmatpush3.bf16.msra.mxu0 %v19284_v53  ;;  %15274 = vmatprep.mubr.f32.mxu0 %v23181_v7  ;;  %v26521_v53 = vld [vmem:[#allocation60_spill] sm:$0xff] }
  0xca   :  { %19457 = vmatpush3.bf16.msra.mxu1 %v23449_v26  ;;  %19289 = vmatprep.subr.bf16.mxu0 %v19288_v29  ;;  %v26526_v26 = vld [vmem:[#allocation34_spill] sm:$0xff] }
  0xcb   :  { %19458 = vmatprep.subr.bf16.mxu1 %v26380_v38 }
  0xcc   :  { %15275 = vmatmul.mubr.f32.gmra.mrb[12].mxu0 %v23188_v35 }
  0xcd   :  { %19291 = vmatpush3.bf16.msra.mxu0 %v19288_v29  ;;  %15277 = vmatprep.mubr.f32.mxu0 %v23239_v17  ;;  %v26522_v29 = vld [vmem:[#allocation31_spill] sm:$0xff]  ;;  %v26533_v17 = vand.u32 4294901760, %v26501_v23 }
  0xce   :  { %19460 = vmatpush3.bf16.msra.mxu1 %v23459_v55  ;;  %19293 = vmatprep.subr.bf16.mxu0 %v19292_v46  ;;  %v26525_v55 = vld [vmem:[#allocation63_spill] sm:$0xff] }
  0xcf   :  { %19461 = vmatprep.subr.bf16.mxu1 %v26380_v38 }
  0xd0   :  { %15278 = vmatmul.mubr.f32.gmra.mrb[14].mxu0 %v23252_v13  ;;  %v26532_v13 = vand.u32 4294901760, %v26500_v25 }
  0xd1   :  { %19295 = vmatpush3.bf16.msra.mxu0 %v19292_v46  ;;  %15312 = vmatprep.mubr.f32.mxu0 %v26498_v36  ;;  %v26523_v46 = vld [vmem:[#allocation62_spill] sm:$0xff]  ;;  %v26542_v36 = vand.u32 4294901760, %v26517_v41 }
  0xd2   :  { %19463 = vmatpush3.bf16.msra.mxu1 %v23469_v47  ;;  %19297 = vmatprep.subr.bf16.mxu0 %v26499_v37  ;;  %v26524_v47 = vld [vmem:[#allocation32_spill] sm:$0xff] }
  0xd3   :  { %19464 = vmatprep.subr.bf16.mxu1 %v26380_v38 }
  0xd4   :  { %15313 = vmatmul.mubr.f32.vlgmr.msra.gmra.mrb[0].mxu0 %v26500_v25  ;;  %v26543_v25 = vld [vmem:[#allocation73_spill] sm:$0xff] }
  0xd5   :  { %15607 = vmatmul.mubr.f32.vlgmr.msra.gmra.mrb[0].mxu1 %v26501_v23  ;;  %19299 = vmatpush3.bf16.msra.mxu0 %v26499_v37  ;;  %v26544_v23 = vand.u32 4294901760, %v26519_v6 }
  0xd6   :  { %19466 = vmatpush3.bf16.msra.mxu1 %v26502_v14  ;;  %15315 = vmatprep.mubr.f32.mxu0 %v26503_v30 }
  0xd7   :  { %19467 = vmatprep.subr.bf16.mxu1 %v26380_v38  ;;  %19301 = vmatprep.subr.bf16.mxu0 %v26504_v50 }
  0xd8   :  { %15641 = vmatprep.mubr.msk.f32.mxu1 %vm22456_vm0, %v26417_v4  ;;  %15316 = vmatmul.mubr.f32.gmra.mrb[2].mxu0 %v26505_v52 }
  0xd9   :  { %19303 = vmatpush3.bf16.msra.mxu0 %v26504_v50  ;;  %15318 = vmatprep.mubr.f32.mxu0 %v26507_v59 }
  0xda   :  { %19469 = vmatpush3.bf16.msra.mxu1 %v26506_v58  ;;  %19305 = vmatprep.subr.bf16.mxu0 %v26508_v49 }
  0xdb   :  { %19470 = vmatprep.subr.bf16.mxu1 %v26380_v38 }
  0xdc   :  { %15319 = vmatmul.mubr.f32.gmra.mrb[4].mxu0 %v26509_v42 }
  0xdd   :  { %19307 = vmatpush3.bf16.msra.mxu0 %v26508_v49  ;;  %15321 = vmatprep.mubr.f32.mxu0 %v26511_v57 }
  0xde   :  { %19472 = vmatpush3.bf16.msra.mxu1 %v26510_v11  ;;  %19309 = vmatprep.subr.bf16.mxu0 %v26512_v33 }
  0xdf   :  { %19473 = vmatprep.subr.bf16.mxu1 %v26380_v38 }
  0xe0   :  { %15322 = vmatmul.mubr.f32.gmra.mrb[6].mxu0 %v26513_v0 }
  0xe1   :  { %19311 = vmatpush3.bf16.msra.mxu0 %v26512_v33  ;;  %15324 = vmatprep.mubr.f32.mxu0 %v26515_v32 }
  0xe2   :  { %19475 = vmatpush3.bf16.msra.mxu1 %v26514_v21  ;;  %19313 = vmatprep.subr.bf16.mxu0 %v26516_v34 }
  0xe3   :  { %19476 = vmatprep.subr.bf16.mxu1 %v26380_v38 }
  0xe4   :  { %15325 = vmatmul.mubr.f32.gmra.mrb[8].mxu0 %v26517_v41 }
  0xe5   :  { %19315 = vmatpush3.bf16.msra.mxu0 %v26516_v34  ;;  %15327 = vmatprep.mubr.f32.mxu0 %v26519_v6 }
  0xe6   :  { %19478 = vmatpush3.bf16.msra.mxu1 %v26518_v22  ;;  %19317 = vmatprep.subr.bf16.mxu0 %v26520_v19 }
  0xe7   :  { %19479 = vmatprep.subr.bf16.mxu1 %v26380_v38 }
  0xe8   :  { %15328 = vmatmul.mubr.f32.gmra.mrb[10].mxu0 %v26521_v53 }
  0xe9   :  { %19319 = vmatpush3.bf16.msra.mxu0 %v26520_v19  ;;  %15330 = vmatprep.mubr.f32.mxu0 %v26523_v46 }
  0xea   :  { %19481 = vmatpush3.bf16.msra.mxu1 %v26522_v29  ;;  %19321 = vmatprep.subr.bf16.mxu0 %v26524_v47 }
  0xeb   :  { %19482 = vmatprep.subr.bf16.mxu1 %v26380_v38 }
  0xec   :  { %15331 = vmatmul.mubr.f32.gmra.mrb[12].mxu0 %v26525_v55 }
  0xed   :  { %19323 = vmatpush3.bf16.msra.mxu0 %v26524_v47  ;;  %15333 = vmatprep.mubr.f32.mxu0 %v26527_v10 }
  0xee   :  { %19484 = vmatpush3.bf16.msra.mxu1 %v26526_v26  ;;  %19325 = vmatprep.subr.bf16.mxu0 %v26528_v1 }
  0xef   :  { %19485 = vmatprep.subr.bf16.mxu1 %v26380_v38 }
  0xf0   :  { %15334 = vmatmul.mubr.f32.gmra.mrb[14].mxu0 %v26529_v5 }
  0xf1   :  { %19327 = vmatpush3.bf16.msra.mxu0 %v26528_v1  ;;  %15368 = vmatprep.mubr.f32.mxu0 %v26531_v20  ;;  %v26535_v20 = vand.u32 4294901760, %v26505_v52  ;;  %v26547_v52 = vand.u32 4294901760, %v26525_v55  ;;  %v26550_v55 = vld [vmem:[#allocation33_spill] sm:$0xff] }
  0xf2   :  { %19487 = vmatpush3.bf16.msra.mxu1 %v26530_v24  ;;  %19329 = vmatprep.subr.bf16.mxu0 %v23316_v60  ;;  %v26534_v24 = vand.u32 4294901760, %v26503_v30  ;;  %v26546_v30 = vand.u32 4294901760, %v26523_v46 }
  0xf3   :  { %19488 = vmatprep.subr.bf16.mxu1 %v26380_v38 }
  0xf4   :  { %15369 = vmatmul.mubr.f32.vlgmr.msra.gmra.mrb[0].mxu0 %v26532_v13  ;;  %v26536_v13 = vand.u32 4294901760, %v26507_v59  ;;  %v26548_v59 = vand.u32 4294901760, %v26527_v10  ;;  %v26552_v10 = vld [vmem:[#allocation39_spill] sm:$0xff] }
  0xf5   :  { %15642 = vmatmul.mubr.f32.vlgmr.msra.gmra.mrb[0].mxu1 %v26533_v17  ;;  %19331 = vmatpush3.bf16.msra.mxu0 %v23316_v60  ;;  %v26537_v17 = vand.u32 4294901760, %v26509_v42  ;;  %v26538_v60 = vand.u32 4294901760, %v26511_v57 }
  0xf6   :  { %19490 = vmatpush3.bf16.msra.mxu1 %v23323_v9  ;;  %15371 = vmatprep.mubr.f32.mxu0 %v26534_v24  ;;  %v26540_v24 = vand.u32 4294901760, %v26515_v32 }
  0xf7   :  { %19491 = vmatprep.subr.bf16.mxu1 %v26380_v38  ;;  %19333 = vmatprep.subr.bf16.mxu0 %v23329_v51 }
  0xf8   :  { %15676 = vmatprep.mubr.msk.f32.mxu1 %vm22456_vm0, %v26417_v4  ;;  %15372 = vmatmul.mubr.f32.gmra.mrb[2].mxu0 %v26535_v20 }
  0xf9   :  { %19335 = vmatpush3.bf16.msra.mxu0 %v23329_v51  ;;  %15374 = vmatprep.mubr.f32.mxu0 %v26536_v13  ;;  %v26539_v51 = vand.u32 4294901760, %v26513_v0 }
  0xfa   :  { %19493 = vmatpush3.bf16.msra.mxu1 %v23335_v43  ;;  %19337 = vmatprep.subr.bf16.mxu0 %v23342_v31 }
  0xfb   :  { %19494 = vmatprep.subr.bf16.mxu1 %v26380_v38 }
  0xfc   :  { %15375 = vmatmul.mubr.f32.gmra.mrb[4].mxu0 %v26537_v17 }
  0xfd   :  { %19339 = vmatpush3.bf16.msra.mxu0 %v23342_v31  ;;  %15377 = vmatprep.mubr.f32.mxu0 %v26538_v60  ;;  %v26541_v31 = vld [vmem:[#allocation72_spill] sm:$0xff] }
  0xfe   :  { %19496 = vmatpush3.bf16.msra.mxu1 %v23348_v63  ;;  %19341 = vmatprep.subr.bf16.mxu0 %v23354_v44 }
  0xff   :  { %19497 = vmatprep.subr.bf16.mxu1 %v26380_v38 }
 0x100   :  { %15378 = vmatmul.mubr.f32.gmra.mrb[6].mxu0 %v26539_v51 }
 0x101   :  { %19343 = vmatpush3.bf16.msra.mxu0 %v23354_v44  ;;  %15380 = vmatprep.mubr.f32.mxu0 %v26540_v24  ;;  %v26545_v44 = vand.u32 4294901760, %v26521_v53 }
 0x102   :  { %19499 = vmatpush3.bf16.msra.mxu1 %v23360_v54  ;;  %19345 = vmatprep.subr.bf16.mxu0 %v26541_v31 }
 0x103   :  { %19500 = vmatprep.subr.bf16.mxu1 %v26380_v38 }
 0x104   :  { %15381 = vmatmul.mubr.f32.gmra.mrb[8].mxu0 %v26542_v36 }
 0x105   :  { %19347 = vmatpush3.bf16.msra.mxu0 %v26541_v31  ;;  %15383 = vmatprep.mubr.f32.mxu0 %v26544_v23 }
 0x106   :  { %19502 = vmatpush3.bf16.msra.mxu1 %v26543_v25  ;;  %19349 = vmatprep.subr.bf16.mxu0 %v23378_v61 }
 0x107   :  { %19503 = vmatprep.subr.bf16.mxu1 %v26380_v38 }
 0x108   :  { %15384 = vmatmul.mubr.f32.gmra.mrb[10].mxu0 %v26545_v44 }
 0x109   :  { %19351 = vmatpush3.bf16.msra.mxu0 %v23378_v61  ;;  %15386 = vmatprep.mubr.f32.mxu0 %v26546_v30  ;;  %v26549_v61 = vand.u32 4294901760, %v26529_v5  ;;  %v26554_v5 = vld [vmem:[#allocation67_spill] sm:$0xff] }
 0x10a   :  { %19505 = vmatpush3.bf16.msra.mxu1 %v23386_v3  ;;  %19353 = vmatprep.subr.bf16.mxu0 %v23392_v48 }
 0x10b   :  { %19506 = vmatprep.subr.bf16.mxu1 %v26380_v38 }
 0x10c   :  { %15387 = vmatmul.mubr.f32.gmra.mrb[12].mxu0 %v26547_v52  ;;  %v26556_v52 = vld [vmem:[#allocation44_spill] sm:$0xff] }
 0x10d   :  { %19355 = vmatpush3.bf16.msra.mxu0 %v23392_v48  ;;  %15389 = vmatprep.mubr.f32.mxu0 %v26548_v59  ;;  %v26551_v48 = vld [vmem:[#allocation36_spill] sm:$0xff] }
 0x10e   :  { %19508 = vmatpush3.bf16.msra.mxu1 %v23398_v56  ;;  %19357 = vmatprep.subr.bf16.mxu0 %v23405_v62 }
 0x10f   :  { %19509 = vmatprep.subr.bf16.mxu1 %v26380_v38 }
 0x110   :  { %15390 = vmatmul.mubr.f32.gmra.mrb[14].mxu0 %v26549_v61 }
 0x111   :  { %19359 = vmatpush3.bf16.msra.mxu0 %v23405_v62  ;;  %15424 = vmatprep.mubr.f32.mxu0 %v26550_v55  ;;  %v26553_v62 = vld [vmem:[#allocation65_spill] sm:$0xff] }
 0x112   :  { %19511 = vmatpush3.bf16.msra.mxu1 %v23407_v27  ;;  %19361 = vmatprep.subr.bf16.mxu0 %v26499_v37 }
 0x113   :  { %19512 = vmatprep.subr.bf16.mxu1 %v26380_v38 }
 0x114   :  { %15425 = vmatmul.mubr.f32.vlgmr.msra.gmra.mrb[0].mxu0 %v26551_v48 }
 0x115   :  { %15677 = vmatmul.mubr.f32.vlgmr.msra.gmra.mrb[0].mxu1 %v26552_v10  ;;  %19363 = vmatpush3.bf16.msra.mxu0 %v26499_v37  ;;  %v26555_v37 = vld [vmem:[#allocation37_spill] sm:$0xff] }
 0x116   :  { %19514 = vmatpush3.bf16.msra.mxu1 %v26502_v14  ;;  %15427 = vmatprep.mubr.f32.mxu0 %v26487_v39 }
 0x117   :  { %19515 = vmatprep.subr.bf16.mxu1 %v26380_v38  ;;  %19365 = vmatprep.subr.bf16.mxu0 %v26504_v50 }
 0x118   :  { %15711 = vmatprep.mubr.msk.f32.mxu1 %vm22456_vm0, %v26417_v4  ;;  %15428 = vmatmul.mubr.f32.gmra.mrb[2].mxu0 %v22863_v2 }
 0x119   :  { %19367 = vmatpush3.bf16.msra.mxu0 %v26504_v50  ;;  %15430 = vmatprep.mubr.f32.mxu0 %v26489_v8 }
 0x11a   :  { %19517 = vmatpush3.bf16.msra.mxu1 %v26506_v58  ;;  %19369 = vmatprep.subr.bf16.mxu0 %v26508_v49 }
 0x11b   :  { %19518 = vmatprep.subr.bf16.mxu1 %v26380_v38 }
 0x11c   :  { %15431 = vmatmul.mubr.f32.gmra.mrb[4].mxu0 %v26490_v15 }
 0x11d   :  { %19371 = vmatpush3.bf16.msra.mxu0 %v26508_v49  ;;  %15433 = vmatprep.mubr.f32.mxu0 %v26492_v40 }
 0x11e   :  { %19520 = vmatpush3.bf16.msra.mxu1 %v26510_v11  ;;  %19373 = vmatprep.subr.bf16.mxu0 %v26512_v33 }
 0x11f   :  { %19521 = vmatprep.subr.bf16.mxu1 %v26380_v38 }
 0x120   :  { %15434 = vmatmul.mubr.f32.gmra.mrb[6].mxu0 %v26493_v45 }
 0x121   :  { %19375 = vmatpush3.bf16.msra.mxu0 %v26512_v33  ;;  %15436 = vmatprep.mubr.f32.mxu0 %v23017_v28 }
 0x122   :  { %19523 = vmatpush3.bf16.msra.mxu1 %v26514_v21  ;;  %19377 = vmatprep.subr.bf16.mxu0 %v26516_v34 }
 0x123   :  { %19524 = vmatprep.subr.bf16.mxu1 %v26380_v38 }
 0x124   :  { %15437 = vmatmul.mubr.f32.gmra.mrb[8].mxu0 %v23073_v12 }
 0x125   :  { %19379 = vmatpush3.bf16.msra.mxu0 %v26516_v34  ;;  %15439 = vmatprep.mubr.f32.mxu0 %v23112_v16 }
 0x126   :  { %19526 = vmatpush3.bf16.msra.mxu1 %v26518_v22  ;;  %19381 = vmatprep.subr.bf16.mxu0 %v26520_v19 }
 0x127   :  { %19527 = vmatprep.subr.bf16.mxu1 %v26380_v38 }
 0x128   :  { %15440 = vmatmul.mubr.f32.gmra.mrb[10].mxu0 %v23129_v18 }
 0x129   :  { %19383 = vmatpush3.bf16.msra.mxu0 %v26520_v19  ;;  %15442 = vmatprep.mubr.f32.mxu0 %v23181_v7 }
 0x12a   :  { %19529 = vmatpush3.bf16.msra.mxu1 %v26522_v29  ;;  %19385 = vmatprep.subr.bf16.mxu0 %v26524_v47 }
 0x12b   :  { %19530 = vmatprep.subr.bf16.mxu1 %v26380_v38 }
 0x12c   :  { %15443 = vmatmul.mubr.f32.gmra.mrb[12].mxu0 %v23188_v35 }
 0x12d   :  { %19387 = vmatpush3.bf16.msra.mxu0 %v26524_v47  ;;  %15445 = vmatprep.mubr.f32.mxu0 %v26553_v62 }
 0x12e   :  { %19532 = vmatpush3.bf16.msra.mxu1 %v26526_v26  ;;  %19389 = vmatprep.subr.bf16.mxu0 %v26528_v1 }
 0x12f   :  { %19533 = vmatprep.subr.bf16.mxu1 %v26380_v38 }
 0x130   :  { %15446 = vmatmul.mubr.f32.gmra.mrb[14].mxu0 %v26554_v5 }
 0x131   :  { %19391 = vmatpush3.bf16.msra.mxu0 %v26528_v1  ;;  %15480 = vmatprep.mubr.f32.mxu0 %v26550_v55 }
 0x132   :  { %19535 = vmatpush3.bf16.msra.mxu1 %v26555_v37  ;;  %19536 = vmatprep.subr.bf16.mxu0 %v26380_v38 }
 0x133   :  { %19680 = vmatprep.subr.bf16.mxu1 %v26380_v38 }
 0x134   :  { %15481 = vmatmul.mubr.f32.vlgmr.msra.gmra.mrb[0].mxu0 %v26551_v48 }
 0x135   :  { %15712 = vmatmul.mubr.f32.vlgmr.msra.gmra.mrb[0].mxu1 %v26552_v10  ;;  %15483 = vmatprep.mubr.f32.mxu0 %v26487_v39  ;;  %v13150_v39 = vld [vmem:[%s26050_s4] ss:$0 sm:$0xff]  ;;  %v26558_v10 = vld [vmem:[#allocation50_spill] sm:$0xff]  ;;  %s22458_s4 = smov [#allocation13]  }
 0x136   :  { %19538 = vmatpush3.bf16.msra.mxu0 %v26502_v14  ;;  %19682 = vmatpush3.bf16.msra.mxu1 %v26502_v14  ;;  %s13132_s21 = sshll.u32 %s22458_s4, 4  ;;  %s13133_s21 = int_to_ptr.vmem [resolvable:$true] %s13132_s21 }
 0x137   :  { %19539 = vmatprep.subr.bf16.mxu0 %v26380_v38  ;;  %19683 = vmatprep.subr.bf16.mxu1 %v26380_v38  ;;  %s22394_s22 = scalar_lea.vmem %s13133_s21, 2048  ;;  %p22399_p13 = scmp.lt.s32.totalorder %s13133_s21, %s13133_s21 }
 0x138   :  { %15956 = vmatprep.mubr.msk.f32.mxu1 %vm22456_vm0, %v26417_v4  ;;  %15484 = vmatmul.mubr.f32.gmra.mrb[2].mxu0 %v22863_v2  ;;  %p22395_p12 = scmp.ne.s32.totalorder %s13133_s21, %s22394_s22  ;;  %p22400_p0 = scmp.lt.s32.totalorder %s22394_s22, %s22394_s22 }
 0x139   :  { %15486 = vmatprep.mubr.f32.mxu0 %v26489_v8 }
 0x13a   :  { %19541 = vmatpush3.bf16.msra.mxu0 %v26506_v58  ;;  %19685 = vmatpush3.bf16.msra.mxu1 %v26506_v58  ;;  %p22401_p1 = por %p22400_p0, %p22399_p13 }
 0x13b   :  { %19542 = vmatprep.subr.bf16.mxu0 %v26380_v38  ;;  %19686 = vmatprep.subr.bf16.mxu1 %v26380_v38 }
 0x13c   :  { %15487 = vmatmul.mubr.f32.gmra.mrb[4].mxu0 %v26490_v15  ;;  %p22402_p2 = pnand %p22401_p1, %p22395_p12 }
 0x13d   :  { %15489 = vmatprep.mubr.f32.mxu0 %v26492_v40 }
 0x13e   :  { %19544 = vmatpush3.bf16.msra.mxu0 %v26510_v11  ;;  %19688 = vmatpush3.bf16.msra.mxu1 %v26510_v11 }
 0x13f   :  { %19545 = vmatprep.subr.bf16.mxu0 %v26380_v38  ;;  %19689 = vmatprep.subr.bf16.mxu1 %v26380_v38 }
 0x140   :  { %15490 = vmatmul.mubr.f32.gmra.mrb[6].mxu0 %v26493_v45 }
 0x141   :  { %15492 = vmatprep.mubr.f32.mxu0 %v23017_v28 }
 0x142   :  { %19547 = vmatpush3.bf16.msra.mxu0 %v26514_v21  ;;  %19691 = vmatpush3.bf16.msra.mxu1 %v26514_v21 }
 0x143   :  { %19548 = vmatprep.subr.bf16.mxu0 %v26380_v38  ;;  %19692 = vmatprep.subr.bf16.mxu1 %v26380_v38 }
 0x144   :  { %15493 = vmatmul.mubr.f32.gmra.mrb[8].mxu0 %v23073_v12 }
 0x145   :  { %15495 = vmatprep.mubr.f32.mxu0 %v23112_v16 }
 0x146   :  { %19550 = vmatpush3.bf16.msra.mxu0 %v26518_v22  ;;  %19694 = vmatpush3.bf16.msra.mxu1 %v26518_v22 }
 0x147   :  { %19551 = vmatprep.subr.bf16.mxu0 %v26380_v38  ;;  %19695 = vmatprep.subr.bf16.mxu1 %v26380_v38 }
 0x148   :  { %15496 = vmatmul.mubr.f32.gmra.mrb[10].mxu0 %v23129_v18 }
 0x149   :  { %15498 = vmatprep.mubr.f32.mxu0 %v23181_v7 }
 0x14a   :  { %19553 = vmatpush3.bf16.msra.mxu0 %v26522_v29  ;;  %19697 = vmatpush3.bf16.msra.mxu1 %v26522_v29 }
 0x14b   :  { %19554 = vmatprep.subr.bf16.mxu0 %v26380_v38  ;;  %19698 = vmatprep.subr.bf16.mxu1 %v26380_v38 }
 0x14c   :  { %15499 = vmatmul.mubr.f32.gmra.mrb[12].mxu0 %v23188_v35 }
 0x14d   :  { %15501 = vmatprep.mubr.f32.mxu0 %v26553_v62  ;;  %v26559_v62 = vld [vmem:[#allocation55_spill] sm:$0xff] }
 0x14e   :  { %19556 = vmatpush3.bf16.msra.mxu0 %v26526_v26  ;;  %19700 = vmatpush3.bf16.msra.mxu1 %v26526_v26 }
 0x14f   :  { %19557 = vmatprep.subr.bf16.mxu0 %v26380_v38  ;;  %19701 = vmatprep.subr.bf16.mxu1 %v26380_v38 }
 0x150   :  { %15502 = vmatmul.mubr.f32.gmra.mrb[14].mxu0 %v26554_v5  ;;  %v26560_v5 = vld [vmem:[#allocation58_spill] sm:$0xff] }
 0x151   :  { %15746 = vmatprep.mubr.msk.f32.mxu0 %vm22456_vm0, %v26417_v4 }
 0x152   :  { %19559 = vmatpush3.bf16.msra.mxu0 %v26555_v37  ;;  %19703 = vmatpush3.bf16.msra.mxu1 %v26555_v37 }
 0x153   :  { %19560 = vmatprep.subr.bf16.mxu0 %v26380_v38  ;;  %19704 = vmatprep.subr.bf16.mxu1 %v26380_v38 }
 0x207   :  { %v15482_v28 = vpop.f32.mrb[0].mxu0 }
 0x208   :  { %v2092_v2 = vpop.f32.mrb[0].mxu1  ;;  %v23703_v16 = vadd.f32 %v15482_v28, %v13150_v39  ;;  %v1327_v18 = vpop.f32.mrb[1].mxu0  ;;  %v26562_v28 = vld [vmem:[#allocation64_spill] sm:$0xff] }
 0x209   :  { %v15713_v12 = vpop.f32.mrb[1].mxu1  ;;  %v21889_v7 = vadd.f32 %v13150_v39, %v1327_v18  ;;  %v26565_v18 = vld [vmem:[#allocation71_spill] sm:$0xff] }
 0x20a   :  { %v26564_v12 = vld [vmem:[#allocation70_spill] sm:$0xff] }
 0x20b   :  { %v2096_v35 = vadd.f32 %v21889_v7, %v2092_v2  ;;  %v15485_v8 = vpop.f32.mrb[2].mxu0  ;;  %v26561_v2 = vld [vmem:[#allocation61_spill] sm:$0xff]  ;;  %v26566_v7 = vld [vmem:[#allocation74_spill] sm:$0xff] }
 0x20c   :  { %v23705_v15 = vadd.f32 %v15485_v8, %v13150_v39  ;;  %v1339_v1 = vpop.f32.mrb[3].mxu0  ;;  %v26568_v8 = vld [vmem:[#allocation46_spill] sm:$0xff] }
 0x20d   :  { %22252 = vtanh.f32 %v2096_v35  ;;  %v23707_v40 = vadd.f32 %v13150_v39, %v1339_v1  ;;  %v26567_v35 = vld [vmem:[#allocation42_spill] sm:$0xff]  ;;  %v26569_v1 = vld [vmem:[#allocation48_spill] sm:$0xff] }
 0x20f   :  { %v15488_v45 = vpop.f32.mrb[4].mxu0 }
 0x210   :  { %v23709_v47 = vadd.f32 %v15488_v45, %v13150_v39  ;;  %v1351_v50 = vpop.f32.mrb[5].mxu0  ;;  %v26570_v45 = vld [vmem:[#allocation51_spill] sm:$0xff] }
 0x211   :  { %v23711_v49 = vadd.f32 %v13150_v39, %v1351_v50  ;;  %v26571_v50 = vld [vmem:[#allocation52_spill] sm:$0xff] }
 0x213   :  { %v15491_v42 = vpop.f32.mrb[6].mxu0 }
 0x214   :  { %v23713_v57 = vadd.f32 %v15491_v42, %v13150_v39  ;;  %v1363_v33 = vpop.f32.mrb[7].mxu0  ;;  %v26572_v42 = vld [vmem:[#allocation75_spill] sm:$0xff] }
 0x215   :  { %v23715_v0 = vadd.f32 %v13150_v39, %v1363_v33 }
 0x217   :  { %v22253_v32 = vpop.eup %22252  ;;  %v15494_v34 = vpop.f32.mrb[8].mxu0 }
 0x218   :  { %2098 = vst [vmem:[#allocation13] sm:$0xff] %v22253_v32  ;;  %v23717_v41 = vadd.f32 %v15494_v34, %v13150_v39  ;;  %v1375_v6 = vpop.f32.mrb[9].mxu0  ;;  %v23719_v19 = vand.u32 4294901760, %v22253_v32 }
 0x219   :  { %v23721_v53 = vadd.f32 %v13150_v39, %v1375_v6 }
 0x21a   :  { %v23724_v46 = vsub.f32 %v22253_v32, %v23719_v19 }
 0x21b   :  { %v15497_v20 = vpop.f32.mrb[10].mxu0 }
 0x21c   :  { %v23726_v13 = vadd.f32 %v15497_v20, %v13150_v39  ;;  %v1387_v17 = vpop.f32.mrb[11].mxu0  ;;  %v2183_v60 = vand.u32 4294901760, %v23724_v46 }
 0x21d   :  { %v23729_v51 = vadd.f32 %v13150_v39, %v1387_v17 }
 0x21e   :  { %v2184_v24 = vsub.f32 %v23724_v46, %v2183_v60 }
 0x21f   :  { %v15500_v31 = vpop.f32.mrb[12].mxu0 }
 0x220   :  { %v23734_v36 = vadd.f32 %v15500_v31, %v13150_v39  ;;  %v1399_v23 = vpop.f32.mrb[13].mxu0  ;;  %v2185_v44 = vand.u32 4294901760, %v2184_v24 }
 0x221   :  { %v23736_v30 = vadd.f32 %v13150_v39, %v1399_v23 }
 0x222   :  { %15747 = vmatmul.mubr.f32.vlgmr.msra.gmra.mrb[16].mxu0 %v2185_v44 }
 0x223   :  { %19562 = vmatpush3.bf16.msra.mxu0 %v26556_v52  ;;  %v15503_v59 = vpop.f32.mrb[14].mxu0  ;;  %15781 = vmatprep.mubr.msk.f32.mxu0 %vm22456_vm0, %v26417_v4 }
 0x224   :  { %v23741_v61 = vadd.f32 %v15503_v59, %v13150_v39  ;;  %v1411_v55 = vpop.f32.mrb[15].mxu0  ;;  %19563 = vmatprep.subr.bf16.mxu0 %v26380_v38 }
 0x225   :  { %v23744_v48 = vadd.f32 %v13150_v39, %v1411_v55  ;;  %v26563_v39 = vld [vmem:[#allocation69_spill] sm:$0xff] }
 0x226   :  { %26557 = vst [vmem:[#allocation38_spill] sm:$0xff] %v23741_v61  ;;  %v25468_v61 = vld [vmem:[#allocation11 + $0x70] sm:$0xff] }
 0x227   :  { %19565 = vmatpush3.bf16.msra.mxu0 %v26558_v10  ;;  %26603 = vst [vmem:[#allocation68_spill] sm:$0xff] %v25468_v61 }
 0x228   :  { %19566 = vmatprep.subr.bf16.mxu0 %v26380_v38 }
 0x22b   :  { %19568 = vmatpush3.bf16.msra.mxu0 %v26559_v62 }
 0x22c   :  { %19569 = vmatprep.subr.bf16.mxu0 %v26380_v38 }
 0x22f   :  { %19571 = vmatpush3.bf16.msra.mxu0 %v26560_v5 }
 0x230   :  { %19572 = vmatprep.subr.bf16.mxu0 %v26380_v38 }
 0x233   :  { %19574 = vmatpush3.bf16.msra.mxu0 %v26561_v2 }
 0x234   :  { %19575 = vmatprep.subr.bf16.mxu0 %v26380_v38 }
 0x237   :  { %19577 = vmatpush3.bf16.msra.mxu0 %v26562_v28 }
 0x238   :  { %19578 = vmatprep.subr.bf16.mxu0 %v26380_v38 }
 0x23b   :  { %19580 = vmatpush3.bf16.msra.mxu0 %v26563_v39 }
 0x23c   :  { %19581 = vmatprep.subr.bf16.mxu0 %v26380_v38 }
 0x23f   :  { %19583 = vmatpush3.bf16.msra.mxu0 %v26564_v12 }
 0x240   :  { %19584 = vmatprep.subr.bf16.mxu0 %v26380_v38 }
 0x242   :  { %15782 = vmatmul.mubr.f32.vlgmr.msra.gmra.mrb[16].mxu0 %v23719_v19 }
 0x243   :  { %19586 = vmatpush3.bf16.msra.mxu0 %v26565_v18  ;;  %15816 = vmatprep.mubr.msk.f32.mxu0 %vm22456_vm0, %v26417_v4 }
 0x244   :  { %19587 = vmatprep.subr.bf16.mxu0 %v26380_v38 }
 0x247   :  { %19589 = vmatpush3.bf16.msra.mxu0 %v26566_v7 }
 0x248   :  { %19590 = vmatprep.subr.bf16.mxu0 %v26380_v38 }
 0x24b   :  { %19592 = vmatpush3.bf16.msra.mxu0 %v26567_v35 }
 0x24c   :  { %19593 = vmatprep.subr.bf16.mxu0 %v26380_v38 }
 0x24f   :  { %19595 = vmatpush3.bf16.msra.mxu0 %v26568_v8 }
 0x250   :  { %19596 = vmatprep.subr.bf16.mxu0 %v26380_v38 }
 0x253   :  { %19598 = vmatpush3.bf16.msra.mxu0 %v26569_v1 }
 0x254   :  { %19599 = vmatprep.subr.bf16.mxu0 %v26380_v38 }
 0x257   :  { %19601 = vmatpush3.bf16.msra.mxu0 %v26570_v45 }
 0x258   :  { %19602 = vmatprep.subr.bf16.mxu0 %v26380_v38 }
 0x25b   :  { %19604 = vmatpush3.bf16.msra.mxu0 %v26571_v50 }
 0x25c   :  { %19605 = vmatprep.subr.bf16.mxu0 %v26380_v38 }
 0x25f   :  { %19607 = vmatpush3.bf16.msra.mxu0 %v26572_v42 }
 0x260   :  { %19608 = vmatprep.subr.bf16.mxu0 %v26380_v38 }
 0x262   :  { %15817 = vmatmul.mubr.f32.vlgmr.msra.gmra.mrb[16].mxu0 %v23724_v46 }
 0x263   :  { %19610 = vmatpush3.bf16.msra.mxu0 %v26502_v14  ;;  %15851 = vmatprep.mubr.msk.f32.mxu0 %vm22456_vm0, %v26417_v4 }
 0x264   :  { %19611 = vmatprep.subr.bf16.mxu0 %v26380_v38 }
 0x267   :  { %19613 = vmatpush3.bf16.msra.mxu0 %v26506_v58 }
 0x268   :  { %19614 = vmatprep.subr.bf16.mxu0 %v26380_v38 }
 0x26b   :  { %19616 = vmatpush3.bf16.msra.mxu0 %v26510_v11 }
 0x26c   :  { %19617 = vmatprep.subr.bf16.mxu0 %v26380_v38 }
 0x26f   :  { %19619 = vmatpush3.bf16.msra.mxu0 %v26514_v21 }
 0x270   :  { %19620 = vmatprep.subr.bf16.mxu0 %v26380_v38 }
 0x273   :  { %19622 = vmatpush3.bf16.msra.mxu0 %v26518_v22 }
 0x274   :  { %19623 = vmatprep.subr.bf16.mxu0 %v26380_v38 }
 0x277   :  { %19625 = vmatpush3.bf16.msra.mxu0 %v26522_v29 }
 0x278   :  { %19626 = vmatprep.subr.bf16.mxu0 %v26380_v38 }
 0x27b   :  { %19628 = vmatpush3.bf16.msra.mxu0 %v26526_v26 }
 0x27c   :  { %19629 = vmatprep.subr.bf16.mxu0 %v26380_v38 }
 0x27f   :  { %19631 = vmatpush3.bf16.msra.mxu0 %v26555_v37 }
 0x280   :  { %19632 = vmatprep.subr.bf16.mxu0 %v26380_v38 }
 0x282   :  { %15852 = vmatmul.mubr.f32.vlgmr.msra.gmra.mrb[16].mxu0 %v2183_v60 }
 0x283   :  { %19634 = vmatpush3.bf16.msra.mxu0 %v23323_v9  ;;  %15886 = vmatprep.mubr.msk.f32.mxu0 %vm22456_vm0, %v26417_v4 }
 0x284   :  { %19635 = vmatprep.subr.bf16.mxu0 %v26380_v38 }
 0x287   :  { %19637 = vmatpush3.bf16.msra.mxu0 %v23335_v43 }
 0x288   :  { %19638 = vmatprep.subr.bf16.mxu0 %v26380_v38 }
 0x28b   :  { %19640 = vmatpush3.bf16.msra.mxu0 %v23348_v63 }
 0x28c   :  { %19641 = vmatprep.subr.bf16.mxu0 %v26380_v38 }
 0x28f   :  { %19643 = vmatpush3.bf16.msra.mxu0 %v23360_v54 }
 0x290   :  { %19644 = vmatprep.subr.bf16.mxu0 %v26380_v38 }
 0x293   :  { %19646 = vmatpush3.bf16.msra.mxu0 %v26543_v25 }
 0x294   :  { %19647 = vmatprep.subr.bf16.mxu0 %v26380_v38 }
 0x297   :  { %19649 = vmatpush3.bf16.msra.mxu0 %v23386_v3 }
 0x298   :  { %19650 = vmatprep.subr.bf16.mxu0 %v26380_v38 }
 0x29b   :  { %19652 = vmatpush3.bf16.msra.mxu0 %v23398_v56 }
 0x29c   :  { %19653 = vmatprep.subr.bf16.mxu0 %v26380_v38 }
 0x29f   :  { %19655 = vmatpush3.bf16.msra.mxu0 %v23407_v27 }
 0x2a0   :  { %19656 = vmatprep.subr.bf16.mxu0 %v26380_v38 }
 0x2a2   :  { %15887 = vmatmul.mubr.f32.vlgmr.msra.gmra.mrb[16].mxu0 %v23719_v19 }
 0x2a3   :  { %19658 = vmatpush3.bf16.msra.mxu0 %v26502_v14  ;;  %15921 = vmatprep.mubr.msk.f32.mxu0 %vm22456_vm0, %v26417_v4 }
 0x2a4   :  { %19659 = vmatprep.subr.bf16.mxu0 %v26380_v38 }
 0x2a7   :  { %19661 = vmatpush3.bf16.msra.mxu0 %v26506_v58 }
 0x2a8   :  { %19662 = vmatprep.subr.bf16.mxu0 %v26380_v38 }
 0x2ab   :  { %19664 = vmatpush3.bf16.msra.mxu0 %v26510_v11 }
 0x2ac   :  { %19665 = vmatprep.subr.bf16.mxu0 %v26380_v38 }
 0x2af   :  { %19667 = vmatpush3.bf16.msra.mxu0 %v26514_v21 }
 0x2b0   :  { %19668 = vmatprep.subr.bf16.mxu0 %v26380_v38 }
 0x2b3   :  { %19670 = vmatpush3.bf16.msra.mxu0 %v26518_v22 }
 0x2b4   :  { %19671 = vmatprep.subr.bf16.mxu0 %v26380_v38 }
 0x2b7   :  { %19673 = vmatpush3.bf16.msra.mxu0 %v26522_v29 }
 0x2b8   :  { %19674 = vmatprep.subr.bf16.mxu0 %v26380_v38 }
 0x2bb   :  { %19676 = vmatpush3.bf16.msra.mxu0 %v26526_v26 }
 0x2bc   :  { %19677 = vmatprep.subr.bf16.mxu0 %v26380_v38 }
 0x2bf   :  { %19679 = vmatpush3.bf16.msra.mxu0 %v26555_v37 }
 0x2c0   :  { %19824 = vmatprep.subr.bf16.mxu0 %v26380_v38 }
 0x2c2   :  { %15922 = vmatmul.mubr.f32.vlgmr.msra.gmra.mrb[16].mxu0 %v23719_v19 }
 0x2c3   :  { %19826 = vmatpush3.bf16.msra.mxu0 %v26502_v14  ;;  %16166 = vmatprep.mubr.msk.f32.mxu0 %vm22456_vm0, %v26417_v4 }
 0x2c4   :  { %19827 = vmatprep.subr.bf16.mxu0 %v26380_v38 }
 0x2c7   :  { %19829 = vmatpush3.bf16.msra.mxu0 %v26506_v58 }
 0x2c8   :  { %19830 = vmatprep.subr.bf16.mxu0 %v26380_v38 }
 0x2cb   :  { %19832 = vmatpush3.bf16.msra.mxu0 %v26510_v11 }
 0x2cc   :  { %19833 = vmatprep.subr.bf16.mxu0 %v26380_v38 }
 0x2cf   :  { %19835 = vmatpush3.bf16.msra.mxu0 %v26514_v21 }
 0x2d0   :  { %19836 = vmatprep.subr.bf16.mxu0 %v26380_v38 }
 0x2d3   :  { %19838 = vmatpush3.bf16.msra.mxu0 %v26518_v22 }
 0x2d4   :  { %19839 = vmatprep.subr.bf16.mxu0 %v26380_v38 }
 0x2d7   :  { %19841 = vmatpush3.bf16.msra.mxu0 %v26522_v29 }
 0x2d8   :  { %19842 = vmatprep.subr.bf16.mxu0 %v26380_v38 }
 0x2db   :  { %19844 = vmatpush3.bf16.msra.mxu0 %v26526_v26 }
 0x2dc   :  { %19845 = vmatprep.subr.bf16.mxu0 %v26380_v38 }
 0x2df   :  { %19847 = vmatpush3.bf16.msra.mxu0 %v26555_v37 }
 0x2e0   :  { %19848 = vmatprep.subr.bf16.mxu0 %v26380_v38 }
 0x395   :  { %v2737_v33 = vpop.f32.mrb[16].mxu0 }
 0x396   :  { %v2741_v32 = vadd.f32 %v23703_v16, %v2737_v33  ;;  %v15923_v34 = vpop.f32.mrb[17].mxu0 }
 0x398   :  { %22254 = vtanh.f32 %v2741_v32 }
 0x3a2   :  { %v22255_v6 = vpop.eup %22254 }
 0x3a3   :  { %2743 = vst [vmem:[#allocation13 + $0x8] sm:$0xff] %v22255_v6  ;;  %v23857_v19 = vand.u32 4294901760, %v22255_v6 }
 0x3a5   :  { %v2827_v46 = vsub.f32 %v22255_v6, %v23857_v19 }
 0x3a7   :  { %v2828_v20 = vand.u32 4294901760, %v2827_v46 }
 0x3a9   :  { %v2829_v17 = vsub.f32 %v2827_v46, %v2828_v20 }
 0x3ab   :  { %v2830_v60 = vand.u32 4294901760, %v2829_v17 }
 0x3ad   :  { %15957 = vmatmul.mubr.f32.vlgmr.msra.gmra.mrb[2].mxu1 %v2830_v60 }
 0x3ae   :  { %19706 = vmatpush3.bf16.msra.mxu1 %v26556_v52  ;;  %15991 = vmatprep.mubr.msk.f32.mxu1 %vm22456_vm0, %v26417_v4 }
 0x3af   :  { %19707 = vmatprep.subr.bf16.mxu1 %v26380_v38 }
 0x3b2   :  { %19709 = vmatpush3.bf16.msra.mxu1 %v26558_v10 }
 0x3b3   :  { %19710 = vmatprep.subr.bf16.mxu1 %v26380_v38 }
 0x3b6   :  { %19712 = vmatpush3.bf16.msra.mxu1 %v26559_v62 }
 0x3b7   :  { %19713 = vmatprep.subr.bf16.mxu1 %v26380_v38 }
 0x3ba   :  { %19715 = vmatpush3.bf16.msra.mxu1 %v26560_v5 }
 0x3bb   :  { %19716 = vmatprep.subr.bf16.mxu1 %v26380_v38 }
 0x3be   :  { %19718 = vmatpush3.bf16.msra.mxu1 %v26561_v2 }
 0x3bf   :  { %19719 = vmatprep.subr.bf16.mxu1 %v26380_v38 }
 0x3c2   :  { %19721 = vmatpush3.bf16.msra.mxu1 %v26562_v28 }
 0x3c3   :  { %19722 = vmatprep.subr.bf16.mxu1 %v26380_v38 }
 0x3c6   :  { %19724 = vmatpush3.bf16.msra.mxu1 %v26563_v39 }
 0x3c7   :  { %19725 = vmatprep.subr.bf16.mxu1 %v26380_v38 }
 0x3ca   :  { %19727 = vmatpush3.bf16.msra.mxu1 %v26564_v12 }
 0x3cb   :  { %19728 = vmatprep.subr.bf16.mxu1 %v26380_v38 }
 0x3cd   :  { %15992 = vmatmul.mubr.f32.vlgmr.msra.gmra.mrb[2].mxu1 %v23857_v19 }
 0x3ce   :  { %19730 = vmatpush3.bf16.msra.mxu1 %v26565_v18  ;;  %16026 = vmatprep.mubr.msk.f32.mxu1 %vm22456_vm0, %v26417_v4 }
 0x3cf   :  { %19731 = vmatprep.subr.bf16.mxu1 %v26380_v38 }
 0x3d2   :  { %19733 = vmatpush3.bf16.msra.mxu1 %v26566_v7 }
 0x3d3   :  { %19734 = vmatprep.subr.bf16.mxu1 %v26380_v38 }
 0x3d6   :  { %19736 = vmatpush3.bf16.msra.mxu1 %v26567_v35 }
 0x3d7   :  { %19737 = vmatprep.subr.bf16.mxu1 %v26380_v38 }
 0x3da   :  { %19739 = vmatpush3.bf16.msra.mxu1 %v26568_v8 }
 0x3db   :  { %19740 = vmatprep.subr.bf16.mxu1 %v26380_v38 }
 0x3de   :  { %19742 = vmatpush3.bf16.msra.mxu1 %v26569_v1 }
 0x3df   :  { %19743 = vmatprep.subr.bf16.mxu1 %v26380_v38 }
 0x3e2   :  { %19745 = vmatpush3.bf16.msra.mxu1 %v26570_v45 }
 0x3e3   :  { %19746 = vmatprep.subr.bf16.mxu1 %v26380_v38 }
 0x3e6   :  { %19748 = vmatpush3.bf16.msra.mxu1 %v26571_v50 }
 0x3e7   :  { %19749 = vmatprep.subr.bf16.mxu1 %v26380_v38 }
 0x3ea   :  { %19751 = vmatpush3.bf16.msra.mxu1 %v26572_v42 }
 0x3eb   :  { %19752 = vmatprep.subr.bf16.mxu1 %v26380_v38 }
 0x3ed   :  { %16027 = vmatmul.mubr.f32.vlgmr.msra.gmra.mrb[2].mxu1 %v2827_v46 }
 0x3ee   :  { %19754 = vmatpush3.bf16.msra.mxu1 %v26502_v14  ;;  %16061 = vmatprep.mubr.msk.f32.mxu1 %vm22456_vm0, %v26417_v4 }
 0x3ef   :  { %19755 = vmatprep.subr.bf16.mxu1 %v26380_v38 }
 0x3f2   :  { %19757 = vmatpush3.bf16.msra.mxu1 %v26506_v58 }
 0x3f3   :  { %19758 = vmatprep.subr.bf16.mxu1 %v26380_v38 }
 0x3f6   :  { %19760 = vmatpush3.bf16.msra.mxu1 %v26510_v11 }
 0x3f7   :  { %19761 = vmatprep.subr.bf16.mxu1 %v26380_v38 }
 0x3fa   :  { %19763 = vmatpush3.bf16.msra.mxu1 %v26514_v21 }
 0x3fb   :  { %19764 = vmatprep.subr.bf16.mxu1 %v26380_v38 }
 0x3fe   :  { %19766 = vmatpush3.bf16.msra.mxu1 %v26518_v22 }
 0x3ff   :  { %19767 = vmatprep.subr.bf16.mxu1 %v26380_v38 }
 0x402   :  { %19769 = vmatpush3.bf16.msra.mxu1 %v26522_v29 }
 0x403   :  { %19770 = vmatprep.subr.bf16.mxu1 %v26380_v38 }
 0x406   :  { %19772 = vmatpush3.bf16.msra.mxu1 %v26526_v26 }
 0x407   :  { %19773 = vmatprep.subr.bf16.mxu1 %v26380_v38 }
 0x40a   :  { %19775 = vmatpush3.bf16.msra.mxu1 %v26555_v37 }
 0x40b   :  { %19776 = vmatprep.subr.bf16.mxu1 %v26380_v38 }
 0x40d   :  { %16062 = vmatmul.mubr.f32.vlgmr.msra.gmra.mrb[2].mxu1 %v2828_v20 }
 0x40e   :  { %19778 = vmatpush3.bf16.msra.mxu1 %v23323_v9  ;;  %16096 = vmatprep.mubr.msk.f32.mxu1 %vm22456_vm0, %v26417_v4 }
 0x40f   :  { %19779 = vmatprep.subr.bf16.mxu1 %v26380_v38 }
 0x412   :  { %19781 = vmatpush3.bf16.msra.mxu1 %v23335_v43 }
 0x413   :  { %19782 = vmatprep.subr.bf16.mxu1 %v26380_v38 }
 0x416   :  { %19784 = vmatpush3.bf16.msra.mxu1 %v23348_v63 }
 0x417   :  { %19785 = vmatprep.subr.bf16.mxu1 %v26380_v38 }
 0x41a   :  { %19787 = vmatpush3.bf16.msra.mxu1 %v23360_v54 }
 0x41b   :  { %19788 = vmatprep.subr.bf16.mxu1 %v26380_v38 }
 0x41e   :  { %19790 = vmatpush3.bf16.msra.mxu1 %v26543_v25 }
 0x41f   :  { %19791 = vmatprep.subr.bf16.mxu1 %v26380_v38 }
 0x422   :  { %19793 = vmatpush3.bf16.msra.mxu1 %v23386_v3 }
 0x423   :  { %19794 = vmatprep.subr.bf16.mxu1 %v26380_v38 }
 0x426   :  { %19796 = vmatpush3.bf16.msra.mxu1 %v23398_v56 }
 0x427   :  { %19797 = vmatprep.subr.bf16.mxu1 %v26380_v38 }
 0x42a   :  { %19799 = vmatpush3.bf16.msra.mxu1 %v23407_v27 }
 0x42b   :  { %19800 = vmatprep.subr.bf16.mxu1 %v26380_v38 }
 0x42d   :  { %16097 = vmatmul.mubr.f32.vlgmr.msra.gmra.mrb[2].mxu1 %v23857_v19 }
 0x42e   :  { %19802 = vmatpush3.bf16.msra.mxu1 %v26502_v14  ;;  %16131 = vmatprep.mubr.msk.f32.mxu1 %vm22456_vm0, %v26417_v4 }
 0x42f   :  { %19803 = vmatprep.subr.bf16.mxu1 %v26380_v38 }
 0x432   :  { %19805 = vmatpush3.bf16.msra.mxu1 %v26506_v58 }
 0x433   :  { %19806 = vmatprep.subr.bf16.mxu1 %v26380_v38 }
 0x436   :  { %19808 = vmatpush3.bf16.msra.mxu1 %v26510_v11 }
 0x437   :  { %19809 = vmatprep.subr.bf16.mxu1 %v26380_v38 }
 0x43a   :  { %19811 = vmatpush3.bf16.msra.mxu1 %v26514_v21 }
 0x43b   :  { %19812 = vmatprep.subr.bf16.mxu1 %v26380_v38 }
 0x43e   :  { %19814 = vmatpush3.bf16.msra.mxu1 %v26518_v22 }
 0x43f   :  { %19815 = vmatprep.subr.bf16.mxu1 %v26380_v38 }
 0x442   :  { %19817 = vmatpush3.bf16.msra.mxu1 %v26522_v29 }
 0x443   :  { %19818 = vmatprep.subr.bf16.mxu1 %v26380_v38 }
 0x446   :  { %19820 = vmatpush3.bf16.msra.mxu1 %v26526_v26 }
 0x447   :  { %19821 = vmatprep.subr.bf16.mxu1 %v26380_v38 }
 0x44a   :  { %19823 = vmatpush3.bf16.msra.mxu1 %v26555_v37 }
 0x44b   :  { %19968 = vmatprep.subr.bf16.mxu1 %v26380_v38 }
 0x44d   :  { %16132 = vmatmul.mubr.f32.vlgmr.msra.gmra.mrb[2].mxu1 %v23857_v19 }
 0x44e   :  { %19970 = vmatpush3.bf16.msra.mxu1 %v26502_v14  ;;  %16376 = vmatprep.mubr.msk.f32.mxu1 %vm22456_vm0, %v26417_v4 }
 0x44f   :  { %19971 = vmatprep.subr.bf16.mxu1 %v26380_v38 }
 0x452   :  { %19973 = vmatpush3.bf16.msra.mxu1 %v26506_v58 }
 0x453   :  { %19974 = vmatprep.subr.bf16.mxu1 %v26380_v38 }
 0x456   :  { %19976 = vmatpush3.bf16.msra.mxu1 %v26510_v11 }
 0x457   :  { %19977 = vmatprep.subr.bf16.mxu1 %v26380_v38 }
 0x45a   :  { %19979 = vmatpush3.bf16.msra.mxu1 %v26514_v21 }
 0x45b   :  { %19980 = vmatprep.subr.bf16.mxu1 %v26380_v38 }
 0x45e   :  { %19982 = vmatpush3.bf16.msra.mxu1 %v26518_v22 }
 0x45f   :  { %19983 = vmatprep.subr.bf16.mxu1 %v26380_v38 }
 0x462   :  { %19985 = vmatpush3.bf16.msra.mxu1 %v26522_v29 }
 0x463   :  { %19986 = vmatprep.subr.bf16.mxu1 %v26380_v38 }
 0x466   :  { %19988 = vmatpush3.bf16.msra.mxu1 %v26526_v26 }
 0x467   :  { %19989 = vmatprep.subr.bf16.mxu1 %v26380_v38 }
 0x46a   :  { %19991 = vmatpush3.bf16.msra.mxu1 %v26555_v37 }
 0x46b   :  { %19992 = vmatprep.subr.bf16.mxu1 %v26380_v38 }
 0x520   :  { %v3382_v16 = vpop.f32.mrb[2].mxu1 }
 0x521   :  { %v3386_v24 = vadd.f32 %v23707_v40, %v3382_v16  ;;  %v16133_v31 = vpop.f32.mrb[3].mxu1 }
 0x523   :  { %22256 = vtanh.f32 %v3386_v24 }
 0x52d   :  { %v22257_v23 = vpop.eup %22256 }
 0x52e   :  { %3388 = vst [vmem:[#allocation13 + $0x10] sm:$0xff] %v22257_v23  ;;  %v23972_v44 = vand.u32 4294901760, %v22257_v23 }
 0x530   :  { %v3472_v59 = vsub.f32 %v22257_v23, %v23972_v44 }
 0x532   :  { %v3473_v55 = vand.u32 4294901760, %v3472_v59 }
 0x534   :  { %v3474_v33 = vsub.f32 %v3472_v59, %v3473_v55 }
 0x536   :  { %v3475_v32 = vand.u32 4294901760, %v3474_v33 }
 0x538   :  { %16167 = vmatmul.mubr.f32.vlgmr.msra.gmra.mrb[18].mxu0 %v3475_v32 }
 0x539   :  { %19850 = vmatpush3.bf16.msra.mxu0 %v26556_v52  ;;  %16201 = vmatprep.mubr.msk.f32.mxu0 %vm22456_vm0, %v26417_v4 }
 0x53a   :  { %19851 = vmatprep.subr.bf16.mxu0 %v26380_v38 }
 0x53d   :  { %19853 = vmatpush3.bf16.msra.mxu0 %v26558_v10 }
 0x53e   :  { %19854 = vmatprep.subr.bf16.mxu0 %v26380_v38 }
 0x541   :  { %19856 = vmatpush3.bf16.msra.mxu0 %v26559_v62 }
 0x542   :  { %19857 = vmatprep.subr.bf16.mxu0 %v26380_v38 }
 0x545   :  { %19859 = vmatpush3.bf16.msra.mxu0 %v26560_v5 }
 0x546   :  { %19860 = vmatprep.subr.bf16.mxu0 %v26380_v38 }
 0x549   :  { %19862 = vmatpush3.bf16.msra.mxu0 %v26561_v2 }
 0x54a   :  { %19863 = vmatprep.subr.bf16.mxu0 %v26380_v38 }
 0x54d   :  { %19865 = vmatpush3.bf16.msra.mxu0 %v26562_v28 }
 0x54e   :  { %19866 = vmatprep.subr.bf16.mxu0 %v26380_v38 }
 0x551   :  { %19868 = vmatpush3.bf16.msra.mxu0 %v26563_v39 }
 0x552   :  { %19869 = vmatprep.subr.bf16.mxu0 %v26380_v38 }
 0x555   :  { %19871 = vmatpush3.bf16.msra.mxu0 %v26564_v12 }
 0x556   :  { %19872 = vmatprep.subr.bf16.mxu0 %v26380_v38 }
 0x558   :  { %16202 = vmatmul.mubr.f32.vlgmr.msra.gmra.mrb[18].mxu0 %v23972_v44 }
 0x559   :  { %19874 = vmatpush3.bf16.msra.mxu0 %v26565_v18  ;;  %16236 = vmatprep.mubr.msk.f32.mxu0 %vm22456_vm0, %v26417_v4 }
 0x55a   :  { %19875 = vmatprep.subr.bf16.mxu0 %v26380_v38 }
 0x55d   :  { %19877 = vmatpush3.bf16.msra.mxu0 %v26566_v7 }
 0x55e   :  { %19878 = vmatprep.subr.bf16.mxu0 %v26380_v38 }
 0x561   :  { %19880 = vmatpush3.bf16.msra.mxu0 %v26567_v35 }
 0x562   :  { %19881 = vmatprep.subr.bf16.mxu0 %v26380_v38 }
 0x565   :  { %19883 = vmatpush3.bf16.msra.mxu0 %v26568_v8 }
 0x566   :  { %19884 = vmatprep.subr.bf16.mxu0 %v26380_v38 }
 0x569   :  { %19886 = vmatpush3.bf16.msra.mxu0 %v26569_v1 }
 0x56a   :  { %19887 = vmatprep.subr.bf16.mxu0 %v26380_v38 }
 0x56d   :  { %19889 = vmatpush3.bf16.msra.mxu0 %v26570_v45 }
 0x56e   :  { %19890 = vmatprep.subr.bf16.mxu0 %v26380_v38 }
 0x571   :  { %19892 = vmatpush3.bf16.msra.mxu0 %v26571_v50 }
 0x572   :  { %19893 = vmatprep.subr.bf16.mxu0 %v26380_v38 }
 0x575   :  { %19895 = vmatpush3.bf16.msra.mxu0 %v26572_v42 }
 0x576   :  { %19896 = vmatprep.subr.bf16.mxu0 %v26380_v38 }
 0x578   :  { %16237 = vmatmul.mubr.f32.vlgmr.msra.gmra.mrb[18].mxu0 %v3472_v59 }
 0x579   :  { %19898 = vmatpush3.bf16.msra.mxu0 %v26502_v14  ;;  %16271 = vmatprep.mubr.msk.f32.mxu0 %vm22456_vm0, %v26417_v4 }
 0x57a   :  { %19899 = vmatprep.subr.bf16.mxu0 %v26380_v38 }
 0x57d   :  { %19901 = vmatpush3.bf16.msra.mxu0 %v26506_v58 }
 0x57e   :  { %19902 = vmatprep.subr.bf16.mxu0 %v26380_v38 }
 0x581   :  { %19904 = vmatpush3.bf16.msra.mxu0 %v26510_v11 }
 0x582   :  { %19905 = vmatprep.subr.bf16.mxu0 %v26380_v38 }
 0x585   :  { %19907 = vmatpush3.bf16.msra.mxu0 %v26514_v21 }
 0x586   :  { %19908 = vmatprep.subr.bf16.mxu0 %v26380_v38 }
 0x589   :  { %19910 = vmatpush3.bf16.msra.mxu0 %v26518_v22 }
 0x58a   :  { %19911 = vmatprep.subr.bf16.mxu0 %v26380_v38 }
 0x58d   :  { %19913 = vmatpush3.bf16.msra.mxu0 %v26522_v29 }
 0x58e   :  { %19914 = vmatprep.subr.bf16.mxu0 %v26380_v38 }
 0x591   :  { %19916 = vmatpush3.bf16.msra.mxu0 %v26526_v26 }
 0x592   :  { %19917 = vmatprep.subr.bf16.mxu0 %v26380_v38 }
 0x595   :  { %19919 = vmatpush3.bf16.msra.mxu0 %v26555_v37 }
 0x596   :  { %19920 = vmatprep.subr.bf16.mxu0 %v26380_v38 }
 0x598   :  { %16272 = vmatmul.mubr.f32.vlgmr.msra.gmra.mrb[18].mxu0 %v3473_v55 }
 0x599   :  { %19922 = vmatpush3.bf16.msra.mxu0 %v23323_v9  ;;  %16306 = vmatprep.mubr.msk.f32.mxu0 %vm22456_vm0, %v26417_v4 }
 0x59a   :  { %19923 = vmatprep.subr.bf16.mxu0 %v26380_v38 }
 0x59d   :  { %19925 = vmatpush3.bf16.msra.mxu0 %v23335_v43 }
 0x59e   :  { %19926 = vmatprep.subr.bf16.mxu0 %v26380_v38 }
 0x5a1   :  { %19928 = vmatpush3.bf16.msra.mxu0 %v23348_v63 }
 0x5a2   :  { %19929 = vmatprep.subr.bf16.mxu0 %v26380_v38 }
 0x5a5   :  { %19931 = vmatpush3.bf16.msra.mxu0 %v23360_v54 }
 0x5a6   :  { %19932 = vmatprep.subr.bf16.mxu0 %v26380_v38 }
 0x5a9   :  { %19934 = vmatpush3.bf16.msra.mxu0 %v26543_v25 }
 0x5aa   :  { %19935 = vmatprep.subr.bf16.mxu0 %v26380_v38 }
 0x5ad   :  { %19937 = vmatpush3.bf16.msra.mxu0 %v23386_v3 }
 0x5ae   :  { %19938 = vmatprep.subr.bf16.mxu0 %v26380_v38 }
 0x5b1   :  { %19940 = vmatpush3.bf16.msra.mxu0 %v23398_v56 }
 0x5b2   :  { %19941 = vmatprep.subr.bf16.mxu0 %v26380_v38 }
 0x5b5   :  { %19943 = vmatpush3.bf16.msra.mxu0 %v23407_v27 }
 0x5b6   :  { %19944 = vmatprep.subr.bf16.mxu0 %v26380_v38 }
 0x5b8   :  { %16307 = vmatmul.mubr.f32.vlgmr.msra.gmra.mrb[18].mxu0 %v23972_v44 }
 0x5b9   :  { %19946 = vmatpush3.bf16.msra.mxu0 %v26502_v14  ;;  %16341 = vmatprep.mubr.msk.f32.mxu0 %vm22456_vm0, %v26417_v4 }
 0x5ba   :  { %19947 = vmatprep.subr.bf16.mxu0 %v26380_v38 }
 0x5bd   :  { %19949 = vmatpush3.bf16.msra.mxu0 %v26506_v58 }
 0x5be   :  { %19950 = vmatprep.subr.bf16.mxu0 %v26380_v38 }
 0x5c1   :  { %19952 = vmatpush3.bf16.msra.mxu0 %v26510_v11 }
 0x5c2   :  { %19953 = vmatprep.subr.bf16.mxu0 %v26380_v38 }
 0x5c5   :  { %19955 = vmatpush3.bf16.msra.mxu0 %v26514_v21 }
 0x5c6   :  { %19956 = vmatprep.subr.bf16.mxu0 %v26380_v38 }
 0x5c9   :  { %19958 = vmatpush3.bf16.msra.mxu0 %v26518_v22 }
 0x5ca   :  { %19959 = vmatprep.subr.bf16.mxu0 %v26380_v38 }
 0x5cd   :  { %19961 = vmatpush3.bf16.msra.mxu0 %v26522_v29 }
 0x5ce   :  { %19962 = vmatprep.subr.bf16.mxu0 %v26380_v38 }
 0x5d1   :  { %19964 = vmatpush3.bf16.msra.mxu0 %v26526_v26 }
 0x5d2   :  { %19965 = vmatprep.subr.bf16.mxu0 %v26380_v38 }
 0x5d5   :  { %19967 = vmatpush3.bf16.msra.mxu0 %v26555_v37 }
 0x5d6   :  { %20112 = vmatprep.subr.bf16.mxu0 %v26380_v38 }
 0x5d8   :  { %16342 = vmatmul.mubr.f32.vlgmr.msra.gmra.mrb[18].mxu0 %v23972_v44 }
 0x5d9   :  { %20114 = vmatpush3.bf16.msra.mxu0 %v26502_v14  ;;  %16586 = vmatprep.mubr.msk.f32.mxu0 %vm22456_vm0, %v26417_v4 }
 0x5da   :  { %20115 = vmatprep.subr.bf16.mxu0 %v26380_v38 }
 0x5dd   :  { %20117 = vmatpush3.bf16.msra.mxu0 %v26506_v58 }
 0x5de   :  { %20118 = vmatprep.subr.bf16.mxu0 %v26380_v38 }
 0x5e1   :  { %20120 = vmatpush3.bf16.msra.mxu0 %v26510_v11 }
 0x5e2   :  { %20121 = vmatprep.subr.bf16.mxu0 %v26380_v38 }
 0x5e5   :  { %20123 = vmatpush3.bf16.msra.mxu0 %v26514_v21 }
 0x5e6   :  { %20124 = vmatprep.subr.bf16.mxu0 %v26380_v38 }
 0x5e9   :  { %20126 = vmatpush3.bf16.msra.mxu0 %v26518_v22 }
 0x5ea   :  { %20127 = vmatprep.subr.bf16.mxu0 %v26380_v38 }
 0x5ed   :  { %20129 = vmatpush3.bf16.msra.mxu0 %v26522_v29 }
 0x5ee   :  { %20130 = vmatprep.subr.bf16.mxu0 %v26380_v38 }
 0x5f1   :  { %20132 = vmatpush3.bf16.msra.mxu0 %v26526_v26 }
 0x5f2   :  { %20133 = vmatprep.subr.bf16.mxu0 %v26380_v38 }
 0x5f5   :  { %20135 = vmatpush3.bf16.msra.mxu0 %v26555_v37 }
 0x5f6   :  { %20136 = vmatprep.subr.bf16.mxu0 %v26380_v38 }
 0x6ab   :  { %v4027_v40 = vpop.f32.mrb[18].mxu0 }
 0x6ac   :  { %v4031_v34 = vadd.f32 %v23705_v15, %v4027_v40  ;;  %v16343_v6 = vpop.f32.mrb[19].mxu0 }
 0x6ae   :  { %22258 = vtanh.f32 %v4031_v34 }
 0x6b8   :  { %v22259_v19 = vpop.eup %22258 }
 0x6b9   :  { %4033 = vst [vmem:[#allocation13 + $0x18] sm:$0xff] %v22259_v19  ;;  %v24087_v46 = vand.u32 4294901760, %v22259_v19 }
 0x6bb   :  { %v4117_v20 = vsub.f32 %v22259_v19, %v24087_v46 }
 0x6bd   :  { %v4118_v17 = vand.u32 4294901760, %v4117_v20 }
 0x6bf   :  { %v4119_v60 = vsub.f32 %v4117_v20, %v4118_v17 }
 0x6c1   :  { %v4120_v16 = vand.u32 4294901760, %v4119_v60 }
 0x6c3   :  { %16377 = vmatmul.mubr.f32.vlgmr.msra.gmra.mrb[4].mxu1 %v4120_v16 }
 0x6c4   :  { %19994 = vmatpush3.bf16.msra.mxu1 %v26556_v52  ;;  %16411 = vmatprep.mubr.msk.f32.mxu1 %vm22456_vm0, %v26417_v4 }
 0x6c5   :  { %19995 = vmatprep.subr.bf16.mxu1 %v26380_v38 }
 0x6c8   :  { %19997 = vmatpush3.bf16.msra.mxu1 %v26558_v10 }
 0x6c9   :  { %19998 = vmatprep.subr.bf16.mxu1 %v26380_v38 }
 0x6cc   :  { %20000 = vmatpush3.bf16.msra.mxu1 %v26559_v62 }
 0x6cd   :  { %20001 = vmatprep.subr.bf16.mxu1 %v26380_v38 }
 0x6d0   :  { %20003 = vmatpush3.bf16.msra.mxu1 %v26560_v5 }
 0x6d1   :  { %20004 = vmatprep.subr.bf16.mxu1 %v26380_v38 }
 0x6d4   :  { %20006 = vmatpush3.bf16.msra.mxu1 %v26561_v2 }
 0x6d5   :  { %20007 = vmatprep.subr.bf16.mxu1 %v26380_v38 }
 0x6d8   :  { %20009 = vmatpush3.bf16.msra.mxu1 %v26562_v28 }
 0x6d9   :  { %20010 = vmatprep.subr.bf16.mxu1 %v26380_v38 }
 0x6dc   :  { %20012 = vmatpush3.bf16.msra.mxu1 %v26563_v39 }
 0x6dd   :  { %20013 = vmatprep.subr.bf16.mxu1 %v26380_v38 }
 0x6e0   :  { %20015 = vmatpush3.bf16.msra.mxu1 %v26564_v12 }
 0x6e1   :  { %20016 = vmatprep.subr.bf16.mxu1 %v26380_v38 }
 0x6e3   :  { %16412 = vmatmul.mubr.f32.vlgmr.msra.gmra.mrb[4].mxu1 %v24087_v46 }
 0x6e4   :  { %20018 = vmatpush3.bf16.msra.mxu1 %v26565_v18  ;;  %16446 = vmatprep.mubr.msk.f32.mxu1 %vm22456_vm0, %v26417_v4 }
 0x6e5   :  { %20019 = vmatprep.subr.bf16.mxu1 %v26380_v38 }
 0x6e8   :  { %20021 = vmatpush3.bf16.msra.mxu1 %v26566_v7 }
 0x6e9   :  { %20022 = vmatprep.subr.bf16.mxu1 %v26380_v38 }
 0x6ec   :  { %20024 = vmatpush3.bf16.msra.mxu1 %v26567_v35 }
 0x6ed   :  { %20025 = vmatprep.subr.bf16.mxu1 %v26380_v38 }
 0x6f0   :  { %20027 = vmatpush3.bf16.msra.mxu1 %v26568_v8 }
 0x6f1   :  { %20028 = vmatprep.subr.bf16.mxu1 %v26380_v38 }
 0x6f4   :  { %20030 = vmatpush3.bf16.msra.mxu1 %v26569_v1 }
 0x6f5   :  { %20031 = vmatprep.subr.bf16.mxu1 %v26380_v38 }
 0x6f8   :  { %20033 = vmatpush3.bf16.msra.mxu1 %v26570_v45 }
 0x6f9   :  { %20034 = vmatprep.subr.bf16.mxu1 %v26380_v38 }
 0x6fc   :  { %20036 = vmatpush3.bf16.msra.mxu1 %v26571_v50 }
 0x6fd   :  { %20037 = vmatprep.subr.bf16.mxu1 %v26380_v38 }
 0x700   :  { %20039 = vmatpush3.bf16.msra.mxu1 %v26572_v42 }
 0x701   :  { %20040 = vmatprep.subr.bf16.mxu1 %v26380_v38 }
 0x703   :  { %16447 = vmatmul.mubr.f32.vlgmr.msra.gmra.mrb[4].mxu1 %v4117_v20 }
 0x704   :  { %20042 = vmatpush3.bf16.msra.mxu1 %v26502_v14  ;;  %16481 = vmatprep.mubr.msk.f32.mxu1 %vm22456_vm0, %v26417_v4 }
 0x705   :  { %20043 = vmatprep.subr.bf16.mxu1 %v26380_v38 }
 0x708   :  { %20045 = vmatpush3.bf16.msra.mxu1 %v26506_v58 }
 0x709   :  { %20046 = vmatprep.subr.bf16.mxu1 %v26380_v38 }
 0x70c   :  { %20048 = vmatpush3.bf16.msra.mxu1 %v26510_v11 }
 0x70d   :  { %20049 = vmatprep.subr.bf16.mxu1 %v26380_v38 }
 0x710   :  { %20051 = vmatpush3.bf16.msra.mxu1 %v26514_v21 }
 0x711   :  { %20052 = vmatprep.subr.bf16.mxu1 %v26380_v38 }
 0x714   :  { %20054 = vmatpush3.bf16.msra.mxu1 %v26518_v22 }
 0x715   :  { %20055 = vmatprep.subr.bf16.mxu1 %v26380_v38 }
 0x718   :  { %20057 = vmatpush3.bf16.msra.mxu1 %v26522_v29 }
 0x719   :  { %20058 = vmatprep.subr.bf16.mxu1 %v26380_v38 }
 0x71c   :  { %20060 = vmatpush3.bf16.msra.mxu1 %v26526_v26 }
 0x71d   :  { %20061 = vmatprep.subr.bf16.mxu1 %v26380_v38 }
 0x720   :  { %20063 = vmatpush3.bf16.msra.mxu1 %v26555_v37 }
 0x721   :  { %20064 = vmatprep.subr.bf16.mxu1 %v26380_v38 }
 0x723   :  { %16482 = vmatmul.mubr.f32.vlgmr.msra.gmra.mrb[4].mxu1 %v4118_v17 }
 0x724   :  { %20066 = vmatpush3.bf16.msra.mxu1 %v23323_v9  ;;  %16516 = vmatprep.mubr.msk.f32.mxu1 %vm22456_vm0, %v26417_v4 }
 0x725   :  { %20067 = vmatprep.subr.bf16.mxu1 %v26380_v38 }
 0x728   :  { %20069 = vmatpush3.bf16.msra.mxu1 %v23335_v43 }
 0x729   :  { %20070 = vmatprep.subr.bf16.mxu1 %v26380_v38 }
 0x72c   :  { %20072 = vmatpush3.bf16.msra.mxu1 %v23348_v63 }
 0x72d   :  { %20073 = vmatprep.subr.bf16.mxu1 %v26380_v38 }
 0x730   :  { %20075 = vmatpush3.bf16.msra.mxu1 %v23360_v54 }
 0x731   :  { %20076 = vmatprep.subr.bf16.mxu1 %v26380_v38 }
 0x734   :  { %20078 = vmatpush3.bf16.msra.mxu1 %v26543_v25 }
 0x735   :  { %20079 = vmatprep.subr.bf16.mxu1 %v26380_v38 }
 0x738   :  { %20081 = vmatpush3.bf16.msra.mxu1 %v23386_v3 }
 0x739   :  { %20082 = vmatprep.subr.bf16.mxu1 %v26380_v38 }
 0x73c   :  { %20084 = vmatpush3.bf16.msra.mxu1 %v23398_v56 }
 0x73d   :  { %20085 = vmatprep.subr.bf16.mxu1 %v26380_v38 }
 0x740   :  { %20087 = vmatpush3.bf16.msra.mxu1 %v23407_v27 }
 0x741   :  { %20088 = vmatprep.subr.bf16.mxu1 %v26380_v38 }
 0x743   :  { %16517 = vmatmul.mubr.f32.vlgmr.msra.gmra.mrb[4].mxu1 %v24087_v46 }
 0x744   :  { %20090 = vmatpush3.bf16.msra.mxu1 %v26502_v14  ;;  %16551 = vmatprep.mubr.msk.f32.mxu1 %vm22456_vm0, %v26417_v4 }
 0x745   :  { %20091 = vmatprep.subr.bf16.mxu1 %v26380_v38 }
 0x748   :  { %20093 = vmatpush3.bf16.msra.mxu1 %v26506_v58 }
 0x749   :  { %20094 = vmatprep.subr.bf16.mxu1 %v26380_v38 }
 0x74c   :  { %20096 = vmatpush3.bf16.msra.mxu1 %v26510_v11 }
 0x74d   :  { %20097 = vmatprep.subr.bf16.mxu1 %v26380_v38 }
 0x750   :  { %20099 = vmatpush3.bf16.msra.mxu1 %v26514_v21 }
 0x751   :  { %20100 = vmatprep.subr.bf16.mxu1 %v26380_v38 }
 0x754   :  { %20102 = vmatpush3.bf16.msra.mxu1 %v26518_v22 }
 0x755   :  { %20103 = vmatprep.subr.bf16.mxu1 %v26380_v38 }
 0x758   :  { %20105 = vmatpush3.bf16.msra.mxu1 %v26522_v29 }
 0x759   :  { %20106 = vmatprep.subr.bf16.mxu1 %v26380_v38 }
 0x75c   :  { %20108 = vmatpush3.bf16.msra.mxu1 %v26526_v26 }
 0x75d   :  { %20109 = vmatprep.subr.bf16.mxu1 %v26380_v38 }
 0x760   :  { %20111 = vmatpush3.bf16.msra.mxu1 %v26555_v37 }
 0x761   :  { %20256 = vmatprep.subr.bf16.mxu1 %v26380_v38 }
 0x763   :  { %16552 = vmatmul.mubr.f32.vlgmr.msra.gmra.mrb[4].mxu1 %v24087_v46 }
 0x764   :  { %20258 = vmatpush3.bf16.msra.mxu1 %v26502_v14  ;;  %16796 = vmatprep.mubr.msk.f32.mxu1 %vm22456_vm0, %v26417_v4 }
 0x765   :  { %20259 = vmatprep.subr.bf16.mxu1 %v26380_v38 }
 0x768   :  { %20261 = vmatpush3.bf16.msra.mxu1 %v26506_v58 }
 0x769   :  { %20262 = vmatprep.subr.bf16.mxu1 %v26380_v38 }
 0x76c   :  { %20264 = vmatpush3.bf16.msra.mxu1 %v26510_v11 }
 0x76d   :  { %20265 = vmatprep.subr.bf16.mxu1 %v26380_v38 }
 0x770   :  { %20267 = vmatpush3.bf16.msra.mxu1 %v26514_v21 }
 0x771   :  { %20268 = vmatprep.subr.bf16.mxu1 %v26380_v38 }
 0x774   :  { %20270 = vmatpush3.bf16.msra.mxu1 %v26518_v22 }
 0x775   :  { %20271 = vmatprep.subr.bf16.mxu1 %v26380_v38 }
 0x778   :  { %20273 = vmatpush3.bf16.msra.mxu1 %v26522_v29 }
 0x779   :  { %20274 = vmatprep.subr.bf16.mxu1 %v26380_v38 }
 0x77c   :  { %20276 = vmatpush3.bf16.msra.mxu1 %v26526_v26 }
 0x77d   :  { %20277 = vmatprep.subr.bf16.mxu1 %v26380_v38 }
 0x780   :  { %20279 = vmatpush3.bf16.msra.mxu1 %v26555_v37 }
 0x781   :  { %20280 = vmatprep.subr.bf16.mxu1 %v26380_v38 }
 0x836   :  { %v4672_v15 = vpop.f32.mrb[4].mxu1 }
 0x837   :  { %v4676_v24 = vadd.f32 %v23711_v49, %v4672_v15  ;;  %v16553_v31 = vpop.f32.mrb[5].mxu1 }
 0x839   :  { %22260 = vtanh.f32 %v4676_v24 }
 0x843   :  { %v22261_v23 = vpop.eup %22260 }
 0x844   :  { %4678 = vst [vmem:[#allocation13 + $0x20] sm:$0xff] %v22261_v23  ;;  %v24202_v44 = vand.u32 4294901760, %v22261_v23 }
 0x846   :  { %v4762_v59 = vsub.f32 %v22261_v23, %v24202_v44 }
 0x848   :  { %v4763_v55 = vand.u32 4294901760, %v4762_v59 }
 0x84a   :  { %v4764_v33 = vsub.f32 %v4762_v59, %v4763_v55 }
 0x84c   :  { %v4765_v32 = vand.u32 4294901760, %v4764_v33 }
 0x84e   :  { %16587 = vmatmul.mubr.f32.vlgmr.msra.gmra.mrb[20].mxu0 %v4765_v32 }
 0x84f   :  { %20138 = vmatpush3.bf16.msra.mxu0 %v26556_v52  ;;  %16621 = vmatprep.mubr.msk.f32.mxu0 %vm22456_vm0, %v26417_v4 }
 0x850   :  { %20139 = vmatprep.subr.bf16.mxu0 %v26380_v38 }
 0x853   :  { %20141 = vmatpush3.bf16.msra.mxu0 %v26558_v10 }
 0x854   :  { %20142 = vmatprep.subr.bf16.mxu0 %v26380_v38 }
 0x857   :  { %20144 = vmatpush3.bf16.msra.mxu0 %v26559_v62 }
 0x858   :  { %20145 = vmatprep.subr.bf16.mxu0 %v26380_v38 }
 0x85b   :  { %20147 = vmatpush3.bf16.msra.mxu0 %v26560_v5 }
 0x85c   :  { %20148 = vmatprep.subr.bf16.mxu0 %v26380_v38 }
 0x85f   :  { %20150 = vmatpush3.bf16.msra.mxu0 %v26561_v2 }
 0x860   :  { %20151 = vmatprep.subr.bf16.mxu0 %v26380_v38 }
 0x863   :  { %20153 = vmatpush3.bf16.msra.mxu0 %v26562_v28 }
 0x864   :  { %20154 = vmatprep.subr.bf16.mxu0 %v26380_v38 }
 0x867   :  { %20156 = vmatpush3.bf16.msra.mxu0 %v26563_v39 }
 0x868   :  { %20157 = vmatprep.subr.bf16.mxu0 %v26380_v38 }
 0x86b   :  { %20159 = vmatpush3.bf16.msra.mxu0 %v26564_v12 }
 0x86c   :  { %20160 = vmatprep.subr.bf16.mxu0 %v26380_v38 }
 0x86e   :  { %16622 = vmatmul.mubr.f32.vlgmr.msra.gmra.mrb[20].mxu0 %v24202_v44 }
 0x86f   :  { %20162 = vmatpush3.bf16.msra.mxu0 %v26565_v18  ;;  %16656 = vmatprep.mubr.msk.f32.mxu0 %vm22456_vm0, %v26417_v4 }
 0x870   :  { %20163 = vmatprep.subr.bf16.mxu0 %v26380_v38 }
 0x873   :  { %20165 = vmatpush3.bf16.msra.mxu0 %v26566_v7 }
 0x874   :  { %20166 = vmatprep.subr.bf16.mxu0 %v26380_v38 }
 0x877   :  { %20168 = vmatpush3.bf16.msra.mxu0 %v26567_v35 }
 0x878   :  { %20169 = vmatprep.subr.bf16.mxu0 %v26380_v38 }
 0x87b   :  { %20171 = vmatpush3.bf16.msra.mxu0 %v26568_v8 }
 0x87c   :  { %20172 = vmatprep.subr.bf16.mxu0 %v26380_v38 }
 0x87f   :  { %20174 = vmatpush3.bf16.msra.mxu0 %v26569_v1 }
 0x880   :  { %20175 = vmatprep.subr.bf16.mxu0 %v26380_v38 }
 0x883   :  { %20177 = vmatpush3.bf16.msra.mxu0 %v26570_v45 }
 0x884   :  { %20178 = vmatprep.subr.bf16.mxu0 %v26380_v38 }
 0x887   :  { %20180 = vmatpush3.bf16.msra.mxu0 %v26571_v50 }
 0x888   :  { %20181 = vmatprep.subr.bf16.mxu0 %v26380_v38 }
 0x88b   :  { %20183 = vmatpush3.bf16.msra.mxu0 %v26572_v42 }
 0x88c   :  { %20184 = vmatprep.subr.bf16.mxu0 %v26380_v38 }
 0x88e   :  { %16657 = vmatmul.mubr.f32.vlgmr.msra.gmra.mrb[20].mxu0 %v4762_v59 }
 0x88f   :  { %20186 = vmatpush3.bf16.msra.mxu0 %v26502_v14  ;;  %16691 = vmatprep.mubr.msk.f32.mxu0 %vm22456_vm0, %v26417_v4 }
 0x890   :  { %20187 = vmatprep.subr.bf16.mxu0 %v26380_v38 }
 0x893   :  { %20189 = vmatpush3.bf16.msra.mxu0 %v26506_v58 }
 0x894   :  { %20190 = vmatprep.subr.bf16.mxu0 %v26380_v38 }
 0x897   :  { %20192 = vmatpush3.bf16.msra.mxu0 %v26510_v11 }
 0x898   :  { %20193 = vmatprep.subr.bf16.mxu0 %v26380_v38 }
 0x89b   :  { %20195 = vmatpush3.bf16.msra.mxu0 %v26514_v21 }
 0x89c   :  { %20196 = vmatprep.subr.bf16.mxu0 %v26380_v38 }
 0x89f   :  { %20198 = vmatpush3.bf16.msra.mxu0 %v26518_v22 }
 0x8a0   :  { %20199 = vmatprep.subr.bf16.mxu0 %v26380_v38 }
 0x8a3   :  { %20201 = vmatpush3.bf16.msra.mxu0 %v26522_v29 }
 0x8a4   :  { %20202 = vmatprep.subr.bf16.mxu0 %v26380_v38 }
 0x8a7   :  { %20204 = vmatpush3.bf16.msra.mxu0 %v26526_v26 }
 0x8a8   :  { %20205 = vmatprep.subr.bf16.mxu0 %v26380_v38 }
 0x8ab   :  { %20207 = vmatpush3.bf16.msra.mxu0 %v26555_v37 }
 0x8ac   :  { %20208 = vmatprep.subr.bf16.mxu0 %v26380_v38 }
 0x8ae   :  { %16692 = vmatmul.mubr.f32.vlgmr.msra.gmra.mrb[20].mxu0 %v4763_v55 }
 0x8af   :  { %20210 = vmatpush3.bf16.msra.mxu0 %v23323_v9  ;;  %16726 = vmatprep.mubr.msk.f32.mxu0 %vm22456_vm0, %v26417_v4 }
 0x8b0   :  { %20211 = vmatprep.subr.bf16.mxu0 %v26380_v38 }
 0x8b3   :  { %20213 = vmatpush3.bf16.msra.mxu0 %v23335_v43 }
 0x8b4   :  { %20214 = vmatprep.subr.bf16.mxu0 %v26380_v38 }
 0x8b7   :  { %20216 = vmatpush3.bf16.msra.mxu0 %v23348_v63 }
 0x8b8   :  { %20217 = vmatprep.subr.bf16.mxu0 %v26380_v38 }
 0x8bb   :  { %20219 = vmatpush3.bf16.msra.mxu0 %v23360_v54 }
 0x8bc   :  { %20220 = vmatprep.subr.bf16.mxu0 %v26380_v38 }
 0x8bf   :  { %20222 = vmatpush3.bf16.msra.mxu0 %v26543_v25 }
 0x8c0   :  { %20223 = vmatprep.subr.bf16.mxu0 %v26380_v38 }
 0x8c3   :  { %20225 = vmatpush3.bf16.msra.mxu0 %v23386_v3 }
 0x8c4   :  { %20226 = vmatprep.subr.bf16.mxu0 %v26380_v38 }
 0x8c7   :  { %20228 = vmatpush3.bf16.msra.mxu0 %v23398_v56 }
 0x8c8   :  { %20229 = vmatprep.subr.bf16.mxu0 %v26380_v38 }
 0x8cb   :  { %20231 = vmatpush3.bf16.msra.mxu0 %v23407_v27 }
 0x8cc   :  { %20232 = vmatprep.subr.bf16.mxu0 %v26380_v38 }
 0x8ce   :  { %16727 = vmatmul.mubr.f32.vlgmr.msra.gmra.mrb[20].mxu0 %v24202_v44 }
 0x8cf   :  { %20234 = vmatpush3.bf16.msra.mxu0 %v26502_v14  ;;  %16761 = vmatprep.mubr.msk.f32.mxu0 %vm22456_vm0, %v26417_v4 }
 0x8d0   :  { %20235 = vmatprep.subr.bf16.mxu0 %v26380_v38 }
 0x8d3   :  { %20237 = vmatpush3.bf16.msra.mxu0 %v26506_v58 }
 0x8d4   :  { %20238 = vmatprep.subr.bf16.mxu0 %v26380_v38 }
 0x8d7   :  { %20240 = vmatpush3.bf16.msra.mxu0 %v26510_v11 }
 0x8d8   :  { %20241 = vmatprep.subr.bf16.mxu0 %v26380_v38 }
 0x8db   :  { %20243 = vmatpush3.bf16.msra.mxu0 %v26514_v21 }
 0x8dc   :  { %20244 = vmatprep.subr.bf16.mxu0 %v26380_v38 }
 0x8df   :  { %20246 = vmatpush3.bf16.msra.mxu0 %v26518_v22 }
 0x8e0   :  { %20247 = vmatprep.subr.bf16.mxu0 %v26380_v38 }
 0x8e3   :  { %20249 = vmatpush3.bf16.msra.mxu0 %v26522_v29 }
 0x8e4   :  { %20250 = vmatprep.subr.bf16.mxu0 %v26380_v38 }
 0x8e7   :  { %20252 = vmatpush3.bf16.msra.mxu0 %v26526_v26 }
 0x8e8   :  { %20253 = vmatprep.subr.bf16.mxu0 %v26380_v38 }
 0x8eb   :  { %20255 = vmatpush3.bf16.msra.mxu0 %v26555_v37 }
 0x8ec   :  { %20400 = vmatprep.subr.bf16.mxu0 %v26380_v38 }
 0x8ee   :  { %16762 = vmatmul.mubr.f32.vlgmr.msra.gmra.mrb[20].mxu0 %v24202_v44 }
 0x8ef   :  { %20402 = vmatpush3.bf16.msra.mxu0 %v26502_v14  ;;  %17006 = vmatprep.mubr.msk.f32.mxu0 %vm22456_vm0, %v26417_v4 }
 0x8f0   :  { %20403 = vmatprep.subr.bf16.mxu0 %v26380_v38 }
 0x8f3   :  { %20405 = vmatpush3.bf16.msra.mxu0 %v26506_v58 }
 0x8f4   :  { %20406 = vmatprep.subr.bf16.mxu0 %v26380_v38 }
 0x8f7   :  { %20408 = vmatpush3.bf16.msra.mxu0 %v26510_v11 }
 0x8f8   :  { %20409 = vmatprep.subr.bf16.mxu0 %v26380_v38 }
 0x8fb   :  { %20411 = vmatpush3.bf16.msra.mxu0 %v26514_v21 }
 0x8fc   :  { %20412 = vmatprep.subr.bf16.mxu0 %v26380_v38 }
 0x8ff   :  { %20414 = vmatpush3.bf16.msra.mxu0 %v26518_v22 }
 0x900   :  { %20415 = vmatprep.subr.bf16.mxu0 %v26380_v38 }
 0x903   :  { %20417 = vmatpush3.bf16.msra.mxu0 %v26522_v29 }
 0x904   :  { %20418 = vmatprep.subr.bf16.mxu0 %v26380_v38 }
 0x907   :  { %20420 = vmatpush3.bf16.msra.mxu0 %v26526_v26 }
 0x908   :  { %20421 = vmatprep.subr.bf16.mxu0 %v26380_v38 }
 0x90b   :  { %20423 = vmatpush3.bf16.msra.mxu0 %v26555_v37 }
 0x90c   :  { %20424 = vmatprep.subr.bf16.mxu0 %v26380_v38 }
 0x9c1   :  { %v5317_v49 = vpop.f32.mrb[20].mxu0 }
 0x9c2   :  { %v5321_v40 = vadd.f32 %v23709_v47, %v5317_v49  ;;  %v16763_v34 = vpop.f32.mrb[21].mxu0 }
 0x9c4   :  { %22262 = vtanh.f32 %v5321_v40 }
 0x9ce   :  { %v22263_v6 = vpop.eup %22262 }
 0x9cf   :  { %5323 = vst [vmem:[#allocation13 + $0x28] sm:$0xff] %v22263_v6  ;;  %v24317_v19 = vand.u32 4294901760, %v22263_v6 }
 0x9d1   :  { %v5407_v46 = vsub.f32 %v22263_v6, %v24317_v19 }
 0x9d3   :  { %v5408_v20 = vand.u32 4294901760, %v5407_v46 }
 0x9d5   :  { %v5409_v17 = vsub.f32 %v5407_v46, %v5408_v20 }
 0x9d7   :  { %v5410_v60 = vand.u32 4294901760, %v5409_v17 }
 0x9d9   :  { %16797 = vmatmul.mubr.f32.vlgmr.msra.gmra.mrb[6].mxu1 %v5410_v60 }
 0x9da   :  { %20282 = vmatpush3.bf16.msra.mxu1 %v26556_v52  ;;  %16831 = vmatprep.mubr.msk.f32.mxu1 %vm22456_vm0, %v26417_v4 }
 0x9db   :  { %20283 = vmatprep.subr.bf16.mxu1 %v26380_v38 }
 0x9de   :  { %20285 = vmatpush3.bf16.msra.mxu1 %v26558_v10 }
 0x9df   :  { %20286 = vmatprep.subr.bf16.mxu1 %v26380_v38 }
 0x9e2   :  { %20288 = vmatpush3.bf16.msra.mxu1 %v26559_v62 }
 0x9e3   :  { %20289 = vmatprep.subr.bf16.mxu1 %v26380_v38 }
 0x9e6   :  { %20291 = vmatpush3.bf16.msra.mxu1 %v26560_v5 }
 0x9e7   :  { %20292 = vmatprep.subr.bf16.mxu1 %v26380_v38 }
 0x9ea   :  { %20294 = vmatpush3.bf16.msra.mxu1 %v26561_v2 }
 0x9eb   :  { %20295 = vmatprep.subr.bf16.mxu1 %v26380_v38 }
 0x9ee   :  { %20297 = vmatpush3.bf16.msra.mxu1 %v26562_v28 }
 0x9ef   :  { %20298 = vmatprep.subr.bf16.mxu1 %v26380_v38 }
 0x9f2   :  { %20300 = vmatpush3.bf16.msra.mxu1 %v26563_v39 }
 0x9f3   :  { %20301 = vmatprep.subr.bf16.mxu1 %v26380_v38 }
 0x9f6   :  { %20303 = vmatpush3.bf16.msra.mxu1 %v26564_v12 }
 0x9f7   :  { %20304 = vmatprep.subr.bf16.mxu1 %v26380_v38 }
 0x9f9   :  { %16832 = vmatmul.mubr.f32.vlgmr.msra.gmra.mrb[6].mxu1 %v24317_v19 }
 0x9fa   :  { %20306 = vmatpush3.bf16.msra.mxu1 %v26565_v18  ;;  %16866 = vmatprep.mubr.msk.f32.mxu1 %vm22456_vm0, %v26417_v4 }
 0x9fb   :  { %20307 = vmatprep.subr.bf16.mxu1 %v26380_v38 }
 0x9fe   :  { %20309 = vmatpush3.bf16.msra.mxu1 %v26566_v7 }
 0x9ff   :  { %20310 = vmatprep.subr.bf16.mxu1 %v26380_v38 }
 0xa02   :  { %20312 = vmatpush3.bf16.msra.mxu1 %v26567_v35 }
 0xa03   :  { %20313 = vmatprep.subr.bf16.mxu1 %v26380_v38 }
 0xa06   :  { %20315 = vmatpush3.bf16.msra.mxu1 %v26568_v8 }
 0xa07   :  { %20316 = vmatprep.subr.bf16.mxu1 %v26380_v38 }
 0xa0a   :  { %20318 = vmatpush3.bf16.msra.mxu1 %v26569_v1 }
 0xa0b   :  { %20319 = vmatprep.subr.bf16.mxu1 %v26380_v38 }
 0xa0e   :  { %20321 = vmatpush3.bf16.msra.mxu1 %v26570_v45 }
 0xa0f   :  { %20322 = vmatprep.subr.bf16.mxu1 %v26380_v38 }
 0xa12   :  { %20324 = vmatpush3.bf16.msra.mxu1 %v26571_v50 }
 0xa13   :  { %20325 = vmatprep.subr.bf16.mxu1 %v26380_v38 }
 0xa16   :  { %20327 = vmatpush3.bf16.msra.mxu1 %v26572_v42 }
 0xa17   :  { %20328 = vmatprep.subr.bf16.mxu1 %v26380_v38 }
 0xa19   :  { %16867 = vmatmul.mubr.f32.vlgmr.msra.gmra.mrb[6].mxu1 %v5407_v46 }
 0xa1a   :  { %20330 = vmatpush3.bf16.msra.mxu1 %v26502_v14  ;;  %16901 = vmatprep.mubr.msk.f32.mxu1 %vm22456_vm0, %v26417_v4 }
 0xa1b   :  { %20331 = vmatprep.subr.bf16.mxu1 %v26380_v38 }
 0xa1e   :  { %20333 = vmatpush3.bf16.msra.mxu1 %v26506_v58 }
 0xa1f   :  { %20334 = vmatprep.subr.bf16.mxu1 %v26380_v38 }
 0xa22   :  { %20336 = vmatpush3.bf16.msra.mxu1 %v26510_v11 }
 0xa23   :  { %20337 = vmatprep.subr.bf16.mxu1 %v26380_v38 }
 0xa26   :  { %20339 = vmatpush3.bf16.msra.mxu1 %v26514_v21 }
 0xa27   :  { %20340 = vmatprep.subr.bf16.mxu1 %v26380_v38 }
 0xa2a   :  { %20342 = vmatpush3.bf16.msra.mxu1 %v26518_v22 }
 0xa2b   :  { %20343 = vmatprep.subr.bf16.mxu1 %v26380_v38 }
 0xa2e   :  { %20345 = vmatpush3.bf16.msra.mxu1 %v26522_v29 }
 0xa2f   :  { %20346 = vmatprep.subr.bf16.mxu1 %v26380_v38 }
 0xa32   :  { %20348 = vmatpush3.bf16.msra.mxu1 %v26526_v26 }
 0xa33   :  { %20349 = vmatprep.subr.bf16.mxu1 %v26380_v38 }
 0xa36   :  { %20351 = vmatpush3.bf16.msra.mxu1 %v26555_v37 }
 0xa37   :  { %20352 = vmatprep.subr.bf16.mxu1 %v26380_v38 }
 0xa39   :  { %16902 = vmatmul.mubr.f32.vlgmr.msra.gmra.mrb[6].mxu1 %v5408_v20 }
 0xa3a   :  { %20354 = vmatpush3.bf16.msra.mxu1 %v23323_v9  ;;  %16936 = vmatprep.mubr.msk.f32.mxu1 %vm22456_vm0, %v26417_v4 }
 0xa3b   :  { %20355 = vmatprep.subr.bf16.mxu1 %v26380_v38 }
 0xa3e   :  { %20357 = vmatpush3.bf16.msra.mxu1 %v23335_v43 }
 0xa3f   :  { %20358 = vmatprep.subr.bf16.mxu1 %v26380_v38 }
 0xa42   :  { %20360 = vmatpush3.bf16.msra.mxu1 %v23348_v63 }
 0xa43   :  { %20361 = vmatprep.subr.bf16.mxu1 %v26380_v38 }
 0xa46   :  { %20363 = vmatpush3.bf16.msra.mxu1 %v23360_v54 }
 0xa47   :  { %20364 = vmatprep.subr.bf16.mxu1 %v26380_v38 }
 0xa4a   :  { %20366 = vmatpush3.bf16.msra.mxu1 %v26543_v25 }
 0xa4b   :  { %20367 = vmatprep.subr.bf16.mxu1 %v26380_v38 }
 0xa4e   :  { %20369 = vmatpush3.bf16.msra.mxu1 %v23386_v3 }
 0xa4f   :  { %20370 = vmatprep.subr.bf16.mxu1 %v26380_v38 }
 0xa52   :  { %20372 = vmatpush3.bf16.msra.mxu1 %v23398_v56 }
 0xa53   :  { %20373 = vmatprep.subr.bf16.mxu1 %v26380_v38 }
 0xa56   :  { %20375 = vmatpush3.bf16.msra.mxu1 %v23407_v27 }
 0xa57   :  { %20376 = vmatprep.subr.bf16.mxu1 %v26380_v38 }
 0xa59   :  { %16937 = vmatmul.mubr.f32.vlgmr.msra.gmra.mrb[6].mxu1 %v24317_v19 }
 0xa5a   :  { %20378 = vmatpush3.bf16.msra.mxu1 %v26502_v14  ;;  %16971 = vmatprep.mubr.msk.f32.mxu1 %vm22456_vm0, %v26417_v4 }
 0xa5b   :  { %20379 = vmatprep.subr.bf16.mxu1 %v26380_v38 }
 0xa5e   :  { %20381 = vmatpush3.bf16.msra.mxu1 %v26506_v58 }
 0xa5f   :  { %20382 = vmatprep.subr.bf16.mxu1 %v26380_v38 }
 0xa62   :  { %20384 = vmatpush3.bf16.msra.mxu1 %v26510_v11 }
 0xa63   :  { %20385 = vmatprep.subr.bf16.mxu1 %v26380_v38 }
 0xa66   :  { %20387 = vmatpush3.bf16.msra.mxu1 %v26514_v21 }
 0xa67   :  { %20388 = vmatprep.subr.bf16.mxu1 %v26380_v38 }
 0xa6a   :  { %20390 = vmatpush3.bf16.msra.mxu1 %v26518_v22 }
 0xa6b   :  { %20391 = vmatprep.subr.bf16.mxu1 %v26380_v38 }
 0xa6e   :  { %20393 = vmatpush3.bf16.msra.mxu1 %v26522_v29 }
 0xa6f   :  { %20394 = vmatprep.subr.bf16.mxu1 %v26380_v38 }
 0xa72   :  { %20396 = vmatpush3.bf16.msra.mxu1 %v26526_v26 }
 0xa73   :  { %20397 = vmatprep.subr.bf16.mxu1 %v26380_v38 }
 0xa76   :  { %20399 = vmatpush3.bf16.msra.mxu1 %v26555_v37 }
 0xa77   :  { %20544 = vmatprep.subr.bf16.mxu1 %v26380_v38 }
 0xa79   :  { %16972 = vmatmul.mubr.f32.vlgmr.msra.gmra.mrb[6].mxu1 %v24317_v19 }
 0xa7a   :  { %20546 = vmatpush3.bf16.msra.mxu1 %v26502_v14  ;;  %17216 = vmatprep.mubr.msk.f32.mxu1 %vm22456_vm0, %v26417_v4 }
 0xa7b   :  { %20547 = vmatprep.subr.bf16.mxu1 %v26380_v38 }
 0xa7e   :  { %20549 = vmatpush3.bf16.msra.mxu1 %v26506_v58 }
 0xa7f   :  { %20550 = vmatprep.subr.bf16.mxu1 %v26380_v38 }
 0xa82   :  { %20552 = vmatpush3.bf16.msra.mxu1 %v26510_v11 }
 0xa83   :  { %20553 = vmatprep.subr.bf16.mxu1 %v26380_v38 }
 0xa86   :  { %20555 = vmatpush3.bf16.msra.mxu1 %v26514_v21 }
 0xa87   :  { %20556 = vmatprep.subr.bf16.mxu1 %v26380_v38 }
 0xa8a   :  { %20558 = vmatpush3.bf16.msra.mxu1 %v26518_v22 }
 0xa8b   :  { %20559 = vmatprep.subr.bf16.mxu1 %v26380_v38 }
 0xa8e   :  { %20561 = vmatpush3.bf16.msra.mxu1 %v26522_v29 }
 0xa8f   :  { %20562 = vmatprep.subr.bf16.mxu1 %v26380_v38 }
 0xa92   :  { %20564 = vmatpush3.bf16.msra.mxu1 %v26526_v26 }
 0xa93   :  { %20565 = vmatprep.subr.bf16.mxu1 %v26380_v38 }
 0xa96   :  { %20567 = vmatpush3.bf16.msra.mxu1 %v26555_v37 }
 0xa97   :  { %20568 = vmatprep.subr.bf16.mxu1 %v26380_v38 }
 0xb4c   :  { %v5962_v47 = vpop.f32.mrb[6].mxu1 }
 0xb4d   :  { %v5966_v16 = vadd.f32 %v23715_v0, %v5962_v47  ;;  %v16973_v15 = vpop.f32.mrb[7].mxu1 }
 0xb4f   :  { %22264 = vtanh.f32 %v5966_v16 }
 0xb59   :  { %v22265_v24 = vpop.eup %22264 }
 0xb5a   :  { %5968 = vst [vmem:[#allocation13 + $0x30] sm:$0xff] %v22265_v24  ;;  %v24432_v31 = vand.u32 4294901760, %v22265_v24 }
 0xb5c   :  { %v6052_v23 = vsub.f32 %v22265_v24, %v24432_v31 }
 0xb5e   :  { %v6053_v44 = vand.u32 4294901760, %v6052_v23 }
 0xb60   :  { %v6054_v59 = vsub.f32 %v6052_v23, %v6053_v44 }
 0xb62   :  { %v6055_v55 = vand.u32 4294901760, %v6054_v59 }
 0xb64   :  { %17007 = vmatmul.mubr.f32.vlgmr.msra.gmra.mrb[22].mxu0 %v6055_v55 }
 0xb65   :  { %20426 = vmatpush3.bf16.msra.mxu0 %v26556_v52  ;;  %17041 = vmatprep.mubr.msk.f32.mxu0 %vm22456_vm0, %v26417_v4 }
 0xb66   :  { %20427 = vmatprep.subr.bf16.mxu0 %v26380_v38 }
 0xb69   :  { %20429 = vmatpush3.bf16.msra.mxu0 %v26558_v10 }
 0xb6a   :  { %20430 = vmatprep.subr.bf16.mxu0 %v26380_v38 }
 0xb6d   :  { %20432 = vmatpush3.bf16.msra.mxu0 %v26559_v62 }
 0xb6e   :  { %20433 = vmatprep.subr.bf16.mxu0 %v26380_v38 }
 0xb71   :  { %20435 = vmatpush3.bf16.msra.mxu0 %v26560_v5 }
 0xb72   :  { %20436 = vmatprep.subr.bf16.mxu0 %v26380_v38 }
 0xb75   :  { %20438 = vmatpush3.bf16.msra.mxu0 %v26561_v2 }
 0xb76   :  { %20439 = vmatprep.subr.bf16.mxu0 %v26380_v38 }
 0xb79   :  { %20441 = vmatpush3.bf16.msra.mxu0 %v26562_v28 }
 0xb7a   :  { %20442 = vmatprep.subr.bf16.mxu0 %v26380_v38 }
 0xb7d   :  { %20444 = vmatpush3.bf16.msra.mxu0 %v26563_v39 }
 0xb7e   :  { %20445 = vmatprep.subr.bf16.mxu0 %v26380_v38 }
 0xb81   :  { %20447 = vmatpush3.bf16.msra.mxu0 %v26564_v12 }
 0xb82   :  { %20448 = vmatprep.subr.bf16.mxu0 %v26380_v38 }
 0xb84   :  { %17042 = vmatmul.mubr.f32.vlgmr.msra.gmra.mrb[22].mxu0 %v24432_v31 }
 0xb85   :  { %20450 = vmatpush3.bf16.msra.mxu0 %v26565_v18  ;;  %17076 = vmatprep.mubr.msk.f32.mxu0 %vm22456_vm0, %v26417_v4 }
 0xb86   :  { %20451 = vmatprep.subr.bf16.mxu0 %v26380_v38 }
 0xb89   :  { %20453 = vmatpush3.bf16.msra.mxu0 %v26566_v7 }
 0xb8a   :  { %20454 = vmatprep.subr.bf16.mxu0 %v26380_v38 }
 0xb8d   :  { %20456 = vmatpush3.bf16.msra.mxu0 %v26567_v35 }
 0xb8e   :  { %20457 = vmatprep.subr.bf16.mxu0 %v26380_v38 }
 0xb91   :  { %20459 = vmatpush3.bf16.msra.mxu0 %v26568_v8 }
 0xb92   :  { %20460 = vmatprep.subr.bf16.mxu0 %v26380_v38 }
 0xb95   :  { %20462 = vmatpush3.bf16.msra.mxu0 %v26569_v1 }
 0xb96   :  { %20463 = vmatprep.subr.bf16.mxu0 %v26380_v38 }
 0xb99   :  { %20465 = vmatpush3.bf16.msra.mxu0 %v26570_v45 }
 0xb9a   :  { %20466 = vmatprep.subr.bf16.mxu0 %v26380_v38 }
 0xb9d   :  { %20468 = vmatpush3.bf16.msra.mxu0 %v26571_v50 }
 0xb9e   :  { %20469 = vmatprep.subr.bf16.mxu0 %v26380_v38 }
 0xba1   :  { %20471 = vmatpush3.bf16.msra.mxu0 %v26572_v42 }
 0xba2   :  { %20472 = vmatprep.subr.bf16.mxu0 %v26380_v38 }
 0xba4   :  { %17077 = vmatmul.mubr.f32.vlgmr.msra.gmra.mrb[22].mxu0 %v6052_v23 }
 0xba5   :  { %20474 = vmatpush3.bf16.msra.mxu0 %v26502_v14  ;;  %17111 = vmatprep.mubr.msk.f32.mxu0 %vm22456_vm0, %v26417_v4 }
 0xba6   :  { %20475 = vmatprep.subr.bf16.mxu0 %v26380_v38 }
 0xba9   :  { %20477 = vmatpush3.bf16.msra.mxu0 %v26506_v58 }
 0xbaa   :  { %20478 = vmatprep.subr.bf16.mxu0 %v26380_v38 }
 0xbad   :  { %20480 = vmatpush3.bf16.msra.mxu0 %v26510_v11 }
 0xbae   :  { %20481 = vmatprep.subr.bf16.mxu0 %v26380_v38 }
 0xbb1   :  { %20483 = vmatpush3.bf16.msra.mxu0 %v26514_v21 }
 0xbb2   :  { %20484 = vmatprep.subr.bf16.mxu0 %v26380_v38 }
 0xbb5   :  { %20486 = vmatpush3.bf16.msra.mxu0 %v26518_v22 }
 0xbb6   :  { %20487 = vmatprep.subr.bf16.mxu0 %v26380_v38 }
 0xbb9   :  { %20489 = vmatpush3.bf16.msra.mxu0 %v26522_v29 }
 0xbba   :  { %20490 = vmatprep.subr.bf16.mxu0 %v26380_v38 }
 0xbbd   :  { %20492 = vmatpush3.bf16.msra.mxu0 %v26526_v26 }
 0xbbe   :  { %20493 = vmatprep.subr.bf16.mxu0 %v26380_v38 }
 0xbc1   :  { %20495 = vmatpush3.bf16.msra.mxu0 %v26555_v37 }
 0xbc2   :  { %20496 = vmatprep.subr.bf16.mxu0 %v26380_v38 }
 0xbc4   :  { %17112 = vmatmul.mubr.f32.vlgmr.msra.gmra.mrb[22].mxu0 %v6053_v44 }
 0xbc5   :  { %20498 = vmatpush3.bf16.msra.mxu0 %v23323_v9  ;;  %17146 = vmatprep.mubr.msk.f32.mxu0 %vm22456_vm0, %v26417_v4 }
 0xbc6   :  { %20499 = vmatprep.subr.bf16.mxu0 %v26380_v38 }
 0xbc9   :  { %20501 = vmatpush3.bf16.msra.mxu0 %v23335_v43 }
 0xbca   :  { %20502 = vmatprep.subr.bf16.mxu0 %v26380_v38 }
 0xbcd   :  { %20504 = vmatpush3.bf16.msra.mxu0 %v23348_v63 }
 0xbce   :  { %20505 = vmatprep.subr.bf16.mxu0 %v26380_v38 }
 0xbd1   :  { %20507 = vmatpush3.bf16.msra.mxu0 %v23360_v54 }
 0xbd2   :  { %20508 = vmatprep.subr.bf16.mxu0 %v26380_v38 }
 0xbd5   :  { %20510 = vmatpush3.bf16.msra.mxu0 %v26543_v25 }
 0xbd6   :  { %20511 = vmatprep.subr.bf16.mxu0 %v26380_v38 }
 0xbd9   :  { %20513 = vmatpush3.bf16.msra.mxu0 %v23386_v3 }
 0xbda   :  { %20514 = vmatprep.subr.bf16.mxu0 %v26380_v38 }
 0xbdd   :  { %20516 = vmatpush3.bf16.msra.mxu0 %v23398_v56 }
 0xbde   :  { %20517 = vmatprep.subr.bf16.mxu0 %v26380_v38 }
 0xbe1   :  { %20519 = vmatpush3.bf16.msra.mxu0 %v23407_v27 }
 0xbe2   :  { %20520 = vmatprep.subr.bf16.mxu0 %v26380_v38 }
 0xbe4   :  { %17147 = vmatmul.mubr.f32.vlgmr.msra.gmra.mrb[22].mxu0 %v24432_v31 }
 0xbe5   :  { %20522 = vmatpush3.bf16.msra.mxu0 %v26502_v14  ;;  %17181 = vmatprep.mubr.msk.f32.mxu0 %vm22456_vm0, %v26417_v4 }
 0xbe6   :  { %20523 = vmatprep.subr.bf16.mxu0 %v26380_v38 }
 0xbe9   :  { %20525 = vmatpush3.bf16.msra.mxu0 %v26506_v58 }
 0xbea   :  { %20526 = vmatprep.subr.bf16.mxu0 %v26380_v38 }
 0xbed   :  { %20528 = vmatpush3.bf16.msra.mxu0 %v26510_v11 }
 0xbee   :  { %20529 = vmatprep.subr.bf16.mxu0 %v26380_v38 }
 0xbf1   :  { %20531 = vmatpush3.bf16.msra.mxu0 %v26514_v21 }
 0xbf2   :  { %20532 = vmatprep.subr.bf16.mxu0 %v26380_v38 }
 0xbf5   :  { %20534 = vmatpush3.bf16.msra.mxu0 %v26518_v22 }
 0xbf6   :  { %20535 = vmatprep.subr.bf16.mxu0 %v26380_v38 }
 0xbf9   :  { %20537 = vmatpush3.bf16.msra.mxu0 %v26522_v29 }
 0xbfa   :  { %20538 = vmatprep.subr.bf16.mxu0 %v26380_v38 }
 0xbfd   :  { %20540 = vmatpush3.bf16.msra.mxu0 %v26526_v26 }
 0xbfe   :  { %20541 = vmatprep.subr.bf16.mxu0 %v26380_v38 }
 0xc01   :  { %20543 = vmatpush3.bf16.msra.mxu0 %v26555_v37 }
 0xc02   :  { %20688 = vmatprep.subr.bf16.mxu0 %v26380_v38 }
 0xc04   :  { %17182 = vmatmul.mubr.f32.vlgmr.msra.gmra.mrb[22].mxu0 %v24432_v31 }
 0xc05   :  { %20690 = vmatpush3.bf16.msra.mxu0 %v26502_v14  ;;  %17426 = vmatprep.mubr.msk.f32.mxu0 %vm22456_vm0, %v26417_v4 }
 0xc06   :  { %20691 = vmatprep.subr.bf16.mxu0 %v26380_v38 }
 0xc09   :  { %20693 = vmatpush3.bf16.msra.mxu0 %v26506_v58 }
 0xc0a   :  { %20694 = vmatprep.subr.bf16.mxu0 %v26380_v38 }
 0xc0d   :  { %20696 = vmatpush3.bf16.msra.mxu0 %v26510_v11 }
 0xc0e   :  { %20697 = vmatprep.subr.bf16.mxu0 %v26380_v38 }
 0xc11   :  { %20699 = vmatpush3.bf16.msra.mxu0 %v26514_v21 }
 0xc12   :  { %20700 = vmatprep.subr.bf16.mxu0 %v26380_v38 }
 0xc15   :  { %20702 = vmatpush3.bf16.msra.mxu0 %v26518_v22 }
 0xc16   :  { %20703 = vmatprep.subr.bf16.mxu0 %v26380_v38 }
 0xc19   :  { %20705 = vmatpush3.bf16.msra.mxu0 %v26522_v29 }
 0xc1a   :  { %20706 = vmatprep.subr.bf16.mxu0 %v26380_v38 }
 0xc1d   :  { %20708 = vmatpush3.bf16.msra.mxu0 %v26526_v26 }
 0xc1e   :  { %20709 = vmatprep.subr.bf16.mxu0 %v26380_v38 }
 0xc21   :  { %20711 = vmatpush3.bf16.msra.mxu0 %v26555_v37 }
 0xc22   :  { %20712 = vmatprep.subr.bf16.mxu0 %v26380_v38 }
 0xcd7   :  { %v6607_v0 = vpop.f32.mrb[22].mxu0 }
 0xcd8   :  { %v6611_v33 = vadd.f32 %v23713_v57, %v6607_v0  ;;  %v17183_v32 = vpop.f32.mrb[23].mxu0 }
 0xcda   :  { %22266 = vtanh.f32 %v6611_v33 }
 0xce4   :  { %v22267_v49 = vpop.eup %22266 }
 0xce5   :  { %6613 = vst [vmem:[#allocation13 + $0x38] sm:$0xff] %v22267_v49  ;;  %v24547_v40 = vand.u32 4294901760, %v22267_v49 }
 0xce7   :  { %v6697_v34 = vsub.f32 %v22267_v49, %v24547_v40 }
 0xce9   :  { %v6698_v6 = vand.u32 4294901760, %v6697_v34 }
 0xceb   :  { %v6699_v19 = vsub.f32 %v6697_v34, %v6698_v6 }
 0xced   :  { %v6700_v46 = vand.u32 4294901760, %v6699_v19 }
 0xcef   :  { %17217 = vmatmul.mubr.f32.vlgmr.msra.gmra.mrb[8].mxu1 %v6700_v46 }
 0xcf0   :  { %20570 = vmatpush3.bf16.msra.mxu1 %v26556_v52  ;;  %17251 = vmatprep.mubr.msk.f32.mxu1 %vm22456_vm0, %v26417_v4 }
 0xcf1   :  { %20571 = vmatprep.subr.bf16.mxu1 %v26380_v38 }
 0xcf4   :  { %20573 = vmatpush3.bf16.msra.mxu1 %v26558_v10 }
 0xcf5   :  { %20574 = vmatprep.subr.bf16.mxu1 %v26380_v38 }
 0xcf8   :  { %20576 = vmatpush3.bf16.msra.mxu1 %v26559_v62 }
 0xcf9   :  { %20577 = vmatprep.subr.bf16.mxu1 %v26380_v38 }
 0xcfc   :  { %20579 = vmatpush3.bf16.msra.mxu1 %v26560_v5 }
 0xcfd   :  { %20580 = vmatprep.subr.bf16.mxu1 %v26380_v38 }
 0xd00   :  { %20582 = vmatpush3.bf16.msra.mxu1 %v26561_v2 }
 0xd01   :  { %20583 = vmatprep.subr.bf16.mxu1 %v26380_v38 }
 0xd04   :  { %20585 = vmatpush3.bf16.msra.mxu1 %v26562_v28 }
 0xd05   :  { %20586 = vmatprep.subr.bf16.mxu1 %v26380_v38 }
 0xd08   :  { %20588 = vmatpush3.bf16.msra.mxu1 %v26563_v39 }
 0xd09   :  { %20589 = vmatprep.subr.bf16.mxu1 %v26380_v38 }
 0xd0c   :  { %20591 = vmatpush3.bf16.msra.mxu1 %v26564_v12 }
 0xd0d   :  { %20592 = vmatprep.subr.bf16.mxu1 %v26380_v38 }
 0xd0f   :  { %17252 = vmatmul.mubr.f32.vlgmr.msra.gmra.mrb[8].mxu1 %v24547_v40 }
 0xd10   :  { %20594 = vmatpush3.bf16.msra.mxu1 %v26565_v18  ;;  %17286 = vmatprep.mubr.msk.f32.mxu1 %vm22456_vm0, %v26417_v4 }
 0xd11   :  { %20595 = vmatprep.subr.bf16.mxu1 %v26380_v38 }
 0xd14   :  { %20597 = vmatpush3.bf16.msra.mxu1 %v26566_v7 }
 0xd15   :  { %20598 = vmatprep.subr.bf16.mxu1 %v26380_v38 }
 0xd18   :  { %20600 = vmatpush3.bf16.msra.mxu1 %v26567_v35 }
 0xd19   :  { %20601 = vmatprep.subr.bf16.mxu1 %v26380_v38 }
 0xd1c   :  { %20603 = vmatpush3.bf16.msra.mxu1 %v26568_v8 }
 0xd1d   :  { %20604 = vmatprep.subr.bf16.mxu1 %v26380_v38 }
 0xd20   :  { %20606 = vmatpush3.bf16.msra.mxu1 %v26569_v1 }
 0xd21   :  { %20607 = vmatprep.subr.bf16.mxu1 %v26380_v38 }
 0xd24   :  { %20609 = vmatpush3.bf16.msra.mxu1 %v26570_v45 }
 0xd25   :  { %20610 = vmatprep.subr.bf16.mxu1 %v26380_v38 }
 0xd28   :  { %20612 = vmatpush3.bf16.msra.mxu1 %v26571_v50 }
 0xd29   :  { %20613 = vmatprep.subr.bf16.mxu1 %v26380_v38 }
 0xd2c   :  { %20615 = vmatpush3.bf16.msra.mxu1 %v26572_v42 }
 0xd2d   :  { %20616 = vmatprep.subr.bf16.mxu1 %v26380_v38 }
 0xd2f   :  { %17287 = vmatmul.mubr.f32.vlgmr.msra.gmra.mrb[8].mxu1 %v6697_v34 }
 0xd30   :  { %20618 = vmatpush3.bf16.msra.mxu1 %v26502_v14  ;;  %17321 = vmatprep.mubr.msk.f32.mxu1 %vm22456_vm0, %v26417_v4 }
 0xd31   :  { %20619 = vmatprep.subr.bf16.mxu1 %v26380_v38 }
 0xd34   :  { %20621 = vmatpush3.bf16.msra.mxu1 %v26506_v58 }
 0xd35   :  { %20622 = vmatprep.subr.bf16.mxu1 %v26380_v38 }
 0xd38   :  { %20624 = vmatpush3.bf16.msra.mxu1 %v26510_v11 }
 0xd39   :  { %20625 = vmatprep.subr.bf16.mxu1 %v26380_v38 }
 0xd3c   :  { %20627 = vmatpush3.bf16.msra.mxu1 %v26514_v21 }
 0xd3d   :  { %20628 = vmatprep.subr.bf16.mxu1 %v26380_v38 }
 0xd40   :  { %20630 = vmatpush3.bf16.msra.mxu1 %v26518_v22 }
 0xd41   :  { %20631 = vmatprep.subr.bf16.mxu1 %v26380_v38 }
 0xd44   :  { %20633 = vmatpush3.bf16.msra.mxu1 %v26522_v29 }
 0xd45   :  { %20634 = vmatprep.subr.bf16.mxu1 %v26380_v38 }
 0xd48   :  { %20636 = vmatpush3.bf16.msra.mxu1 %v26526_v26 }
 0xd49   :  { %20637 = vmatprep.subr.bf16.mxu1 %v26380_v38 }
 0xd4c   :  { %20639 = vmatpush3.bf16.msra.mxu1 %v26555_v37 }
 0xd4d   :  { %20640 = vmatprep.subr.bf16.mxu1 %v26380_v38 }
 0xd4f   :  { %17322 = vmatmul.mubr.f32.vlgmr.msra.gmra.mrb[8].mxu1 %v6698_v6 }
 0xd50   :  { %20642 = vmatpush3.bf16.msra.mxu1 %v23323_v9  ;;  %17356 = vmatprep.mubr.msk.f32.mxu1 %vm22456_vm0, %v26417_v4 }
 0xd51   :  { %20643 = vmatprep.subr.bf16.mxu1 %v26380_v38 }
 0xd54   :  { %20645 = vmatpush3.bf16.msra.mxu1 %v23335_v43 }
 0xd55   :  { %20646 = vmatprep.subr.bf16.mxu1 %v26380_v38 }
 0xd58   :  { %20648 = vmatpush3.bf16.msra.mxu1 %v23348_v63 }
 0xd59   :  { %20649 = vmatprep.subr.bf16.mxu1 %v26380_v38 }
 0xd5c   :  { %20651 = vmatpush3.bf16.msra.mxu1 %v23360_v54 }
 0xd5d   :  { %20652 = vmatprep.subr.bf16.mxu1 %v26380_v38 }
 0xd60   :  { %20654 = vmatpush3.bf16.msra.mxu1 %v26543_v25 }
 0xd61   :  { %20655 = vmatprep.subr.bf16.mxu1 %v26380_v38 }
 0xd64   :  { %20657 = vmatpush3.bf16.msra.mxu1 %v23386_v3 }
 0xd65   :  { %20658 = vmatprep.subr.bf16.mxu1 %v26380_v38 }
 0xd68   :  { %20660 = vmatpush3.bf16.msra.mxu1 %v23398_v56 }
 0xd69   :  { %20661 = vmatprep.subr.bf16.mxu1 %v26380_v38 }
 0xd6c   :  { %20663 = vmatpush3.bf16.msra.mxu1 %v23407_v27 }
 0xd6d   :  { %20664 = vmatprep.subr.bf16.mxu1 %v26380_v38 }
 0xd6f   :  { %17357 = vmatmul.mubr.f32.vlgmr.msra.gmra.mrb[8].mxu1 %v24547_v40 }
 0xd70   :  { %20666 = vmatpush3.bf16.msra.mxu1 %v26502_v14  ;;  %17391 = vmatprep.mubr.msk.f32.mxu1 %vm22456_vm0, %v26417_v4 }
 0xd71   :  { %20667 = vmatprep.subr.bf16.mxu1 %v26380_v38 }
 0xd74   :  { %20669 = vmatpush3.bf16.msra.mxu1 %v26506_v58 }
 0xd75   :  { %20670 = vmatprep.subr.bf16.mxu1 %v26380_v38 }
 0xd78   :  { %20672 = vmatpush3.bf16.msra.mxu1 %v26510_v11 }
 0xd79   :  { %20673 = vmatprep.subr.bf16.mxu1 %v26380_v38 }
 0xd7c   :  { %20675 = vmatpush3.bf16.msra.mxu1 %v26514_v21 }
 0xd7d   :  { %20676 = vmatprep.subr.bf16.mxu1 %v26380_v38 }
 0xd80   :  { %20678 = vmatpush3.bf16.msra.mxu1 %v26518_v22 }
 0xd81   :  { %20679 = vmatprep.subr.bf16.mxu1 %v26380_v38 }
 0xd84   :  { %20681 = vmatpush3.bf16.msra.mxu1 %v26522_v29 }
 0xd85   :  { %20682 = vmatprep.subr.bf16.mxu1 %v26380_v38 }
 0xd88   :  { %20684 = vmatpush3.bf16.msra.mxu1 %v26526_v26 }
 0xd89   :  { %20685 = vmatprep.subr.bf16.mxu1 %v26380_v38 }
 0xd8c   :  { %20687 = vmatpush3.bf16.msra.mxu1 %v26555_v37 }
 0xd8d   :  { %20832 = vmatprep.subr.bf16.mxu1 %v26380_v38 }
 0xd8f   :  { %17392 = vmatmul.mubr.f32.vlgmr.msra.gmra.mrb[8].mxu1 %v24547_v40 }
 0xd90   :  { %20834 = vmatpush3.bf16.msra.mxu1 %v26502_v14  ;;  %17636 = vmatprep.mubr.msk.f32.mxu1 %vm22456_vm0, %v26417_v4 }
 0xd91   :  { %20835 = vmatprep.subr.bf16.mxu1 %v26380_v38 }
 0xd94   :  { %20837 = vmatpush3.bf16.msra.mxu1 %v26506_v58 }
 0xd95   :  { %20838 = vmatprep.subr.bf16.mxu1 %v26380_v38 }
 0xd98   :  { %20840 = vmatpush3.bf16.msra.mxu1 %v26510_v11 }
 0xd99   :  { %20841 = vmatprep.subr.bf16.mxu1 %v26380_v38 }
 0xd9c   :  { %20843 = vmatpush3.bf16.msra.mxu1 %v26514_v21 }
 0xd9d   :  { %20844 = vmatprep.subr.bf16.mxu1 %v26380_v38 }
 0xda0   :  { %20846 = vmatpush3.bf16.msra.mxu1 %v26518_v22 }
 0xda1   :  { %20847 = vmatprep.subr.bf16.mxu1 %v26380_v38 }
 0xda4   :  { %20849 = vmatpush3.bf16.msra.mxu1 %v26522_v29 }
 0xda5   :  { %20850 = vmatprep.subr.bf16.mxu1 %v26380_v38 }
 0xda8   :  { %20852 = vmatpush3.bf16.msra.mxu1 %v26526_v26 }
 0xda9   :  { %20853 = vmatprep.subr.bf16.mxu1 %v26380_v38 }
 0xdac   :  { %20855 = vmatpush3.bf16.msra.mxu1 %v26555_v37 }
 0xdad   :  { %20856 = vmatprep.subr.bf16.mxu1 %v26380_v38 }
 0xe62   :  { %v7252_v57 = vpop.f32.mrb[8].mxu1 }
 0xe63   :  { %v7256_v20 = vadd.f32 %v23721_v53, %v7252_v57  ;;  %v17393_v17 = vpop.f32.mrb[9].mxu1 }
 0xe65   :  { %22268 = vtanh.f32 %v7256_v20 }
 0xe6f   :  { %v22269_v60 = vpop.eup %22268 }
 0xe70   :  { %7258 = vst [vmem:[#allocation13 + $0x40] sm:$0xff] %v22269_v60  ;;  %v24662_v47 = vand.u32 4294901760, %v22269_v60 }
 0xe72   :  { %v7342_v16 = vsub.f32 %v22269_v60, %v24662_v47 }
 0xe74   :  { %v7343_v15 = vand.u32 4294901760, %v7342_v16 }
 0xe76   :  { %v7344_v24 = vsub.f32 %v7342_v16, %v7343_v15 }
 0xe78   :  { %v7345_v31 = vand.u32 4294901760, %v7344_v24 }
 0xe7a   :  { %17427 = vmatmul.mubr.f32.vlgmr.msra.gmra.mrb[24].mxu0 %v7345_v31 }
 0xe7b   :  { %20714 = vmatpush3.bf16.msra.mxu0 %v26556_v52  ;;  %17461 = vmatprep.mubr.msk.f32.mxu0 %vm22456_vm0, %v26417_v4 }
 0xe7c   :  { %20715 = vmatprep.subr.bf16.mxu0 %v26380_v38 }
 0xe7f   :  { %20717 = vmatpush3.bf16.msra.mxu0 %v26558_v10 }
 0xe80   :  { %20718 = vmatprep.subr.bf16.mxu0 %v26380_v38 }
 0xe83   :  { %20720 = vmatpush3.bf16.msra.mxu0 %v26559_v62 }
 0xe84   :  { %20721 = vmatprep.subr.bf16.mxu0 %v26380_v38 }
 0xe87   :  { %20723 = vmatpush3.bf16.msra.mxu0 %v26560_v5 }
 0xe88   :  { %20724 = vmatprep.subr.bf16.mxu0 %v26380_v38 }
 0xe8b   :  { %20726 = vmatpush3.bf16.msra.mxu0 %v26561_v2 }
 0xe8c   :  { %20727 = vmatprep.subr.bf16.mxu0 %v26380_v38 }
 0xe8f   :  { %20729 = vmatpush3.bf16.msra.mxu0 %v26562_v28 }
 0xe90   :  { %20730 = vmatprep.subr.bf16.mxu0 %v26380_v38 }
 0xe93   :  { %20732 = vmatpush3.bf16.msra.mxu0 %v26563_v39 }
 0xe94   :  { %20733 = vmatprep.subr.bf16.mxu0 %v26380_v38 }
 0xe97   :  { %20735 = vmatpush3.bf16.msra.mxu0 %v26564_v12 }
 0xe98   :  { %20736 = vmatprep.subr.bf16.mxu0 %v26380_v38 }
 0xe9a   :  { %17462 = vmatmul.mubr.f32.vlgmr.msra.gmra.mrb[24].mxu0 %v24662_v47 }
 0xe9b   :  { %20738 = vmatpush3.bf16.msra.mxu0 %v26565_v18  ;;  %17496 = vmatprep.mubr.msk.f32.mxu0 %vm22456_vm0, %v26417_v4 }
 0xe9c   :  { %20739 = vmatprep.subr.bf16.mxu0 %v26380_v38 }
 0xe9f   :  { %20741 = vmatpush3.bf16.msra.mxu0 %v26566_v7 }
 0xea0   :  { %20742 = vmatprep.subr.bf16.mxu0 %v26380_v38 }
 0xea3   :  { %20744 = vmatpush3.bf16.msra.mxu0 %v26567_v35 }
 0xea4   :  { %20745 = vmatprep.subr.bf16.mxu0 %v26380_v38 }
 0xea7   :  { %20747 = vmatpush3.bf16.msra.mxu0 %v26568_v8 }
 0xea8   :  { %20748 = vmatprep.subr.bf16.mxu0 %v26380_v38 }
 0xeab   :  { %20750 = vmatpush3.bf16.msra.mxu0 %v26569_v1 }
 0xeac   :  { %20751 = vmatprep.subr.bf16.mxu0 %v26380_v38 }
 0xeaf   :  { %20753 = vmatpush3.bf16.msra.mxu0 %v26570_v45 }
 0xeb0   :  { %20754 = vmatprep.subr.bf16.mxu0 %v26380_v38 }
 0xeb3   :  { %20756 = vmatpush3.bf16.msra.mxu0 %v26571_v50 }
 0xeb4   :  { %20757 = vmatprep.subr.bf16.mxu0 %v26380_v38 }
 0xeb7   :  { %20759 = vmatpush3.bf16.msra.mxu0 %v26572_v42 }
 0xeb8   :  { %20760 = vmatprep.subr.bf16.mxu0 %v26380_v38 }
 0xeba   :  { %17497 = vmatmul.mubr.f32.vlgmr.msra.gmra.mrb[24].mxu0 %v7342_v16 }
 0xebb   :  { %20762 = vmatpush3.bf16.msra.mxu0 %v26502_v14  ;;  %17531 = vmatprep.mubr.msk.f32.mxu0 %vm22456_vm0, %v26417_v4 }
 0xebc   :  { %20763 = vmatprep.subr.bf16.mxu0 %v26380_v38 }
 0xebf   :  { %20765 = vmatpush3.bf16.msra.mxu0 %v26506_v58 }
 0xec0   :  { %20766 = vmatprep.subr.bf16.mxu0 %v26380_v38 }
 0xec3   :  { %20768 = vmatpush3.bf16.msra.mxu0 %v26510_v11 }
 0xec4   :  { %20769 = vmatprep.subr.bf16.mxu0 %v26380_v38 }
 0xec7   :  { %20771 = vmatpush3.bf16.msra.mxu0 %v26514_v21 }
 0xec8   :  { %20772 = vmatprep.subr.bf16.mxu0 %v26380_v38 }
 0xecb   :  { %20774 = vmatpush3.bf16.msra.mxu0 %v26518_v22 }
 0xecc   :  { %20775 = vmatprep.subr.bf16.mxu0 %v26380_v38 }
 0xecf   :  { %20777 = vmatpush3.bf16.msra.mxu0 %v26522_v29 }
 0xed0   :  { %20778 = vmatprep.subr.bf16.mxu0 %v26380_v38 }
 0xed3   :  { %20780 = vmatpush3.bf16.msra.mxu0 %v26526_v26 }
 0xed4   :  { %20781 = vmatprep.subr.bf16.mxu0 %v26380_v38 }
 0xed7   :  { %20783 = vmatpush3.bf16.msra.mxu0 %v26555_v37 }
 0xed8   :  { %20784 = vmatprep.subr.bf16.mxu0 %v26380_v38 }
 0xeda   :  { %17532 = vmatmul.mubr.f32.vlgmr.msra.gmra.mrb[24].mxu0 %v7343_v15 }
 0xedb   :  { %20786 = vmatpush3.bf16.msra.mxu0 %v23323_v9  ;;  %17566 = vmatprep.mubr.msk.f32.mxu0 %vm22456_vm0, %v26417_v4 }
 0xedc   :  { %20787 = vmatprep.subr.bf16.mxu0 %v26380_v38 }
 0xedf   :  { %20789 = vmatpush3.bf16.msra.mxu0 %v23335_v43 }
 0xee0   :  { %20790 = vmatprep.subr.bf16.mxu0 %v26380_v38 }
 0xee3   :  { %20792 = vmatpush3.bf16.msra.mxu0 %v23348_v63 }
 0xee4   :  { %20793 = vmatprep.subr.bf16.mxu0 %v26380_v38 }
 0xee7   :  { %20795 = vmatpush3.bf16.msra.mxu0 %v23360_v54 }
 0xee8   :  { %20796 = vmatprep.subr.bf16.mxu0 %v26380_v38 }
 0xeeb   :  { %20798 = vmatpush3.bf16.msra.mxu0 %v26543_v25 }
 0xeec   :  { %20799 = vmatprep.subr.bf16.mxu0 %v26380_v38 }
 0xeef   :  { %20801 = vmatpush3.bf16.msra.mxu0 %v23386_v3 }
 0xef0   :  { %20802 = vmatprep.subr.bf16.mxu0 %v26380_v38 }
 0xef3   :  { %20804 = vmatpush3.bf16.msra.mxu0 %v23398_v56 }
 0xef4   :  { %20805 = vmatprep.subr.bf16.mxu0 %v26380_v38 }
 0xef7   :  { %20807 = vmatpush3.bf16.msra.mxu0 %v23407_v27 }
 0xef8   :  { %20808 = vmatprep.subr.bf16.mxu0 %v26380_v38 }
 0xefa   :  { %17567 = vmatmul.mubr.f32.vlgmr.msra.gmra.mrb[24].mxu0 %v24662_v47 }
 0xefb   :  { %20810 = vmatpush3.bf16.msra.mxu0 %v26502_v14  ;;  %17601 = vmatprep.mubr.msk.f32.mxu0 %vm22456_vm0, %v26417_v4 }
 0xefc   :  { %20811 = vmatprep.subr.bf16.mxu0 %v26380_v38 }
 0xeff   :  { %20813 = vmatpush3.bf16.msra.mxu0 %v26506_v58 }
 0xf00   :  { %20814 = vmatprep.subr.bf16.mxu0 %v26380_v38 }
 0xf03   :  { %20816 = vmatpush3.bf16.msra.mxu0 %v26510_v11 }
 0xf04   :  { %20817 = vmatprep.subr.bf16.mxu0 %v26380_v38 }
 0xf07   :  { %20819 = vmatpush3.bf16.msra.mxu0 %v26514_v21 }
 0xf08   :  { %20820 = vmatprep.subr.bf16.mxu0 %v26380_v38 }
 0xf0b   :  { %20822 = vmatpush3.bf16.msra.mxu0 %v26518_v22 }
 0xf0c   :  { %20823 = vmatprep.subr.bf16.mxu0 %v26380_v38 }
 0xf0f   :  { %20825 = vmatpush3.bf16.msra.mxu0 %v26522_v29 }
 0xf10   :  { %20826 = vmatprep.subr.bf16.mxu0 %v26380_v38 }
 0xf13   :  { %20828 = vmatpush3.bf16.msra.mxu0 %v26526_v26 }
 0xf14   :  { %20829 = vmatprep.subr.bf16.mxu0 %v26380_v38 }
 0xf17   :  { %20831 = vmatpush3.bf16.msra.mxu0 %v26555_v37 }
 0xf18   :  { %20976 = vmatprep.subr.bf16.mxu0 %v26380_v38 }
 0xf1a   :  { %17602 = vmatmul.mubr.f32.vlgmr.msra.gmra.mrb[24].mxu0 %v24662_v47 }
 0xf1b   :  { %20978 = vmatpush3.bf16.msra.mxu0 %v26502_v14  ;;  %17846 = vmatprep.mubr.msk.f32.mxu0 %vm22456_vm0, %v26417_v4 }
 0xf1c   :  { %20979 = vmatprep.subr.bf16.mxu0 %v26380_v38 }
 0xf1f   :  { %20981 = vmatpush3.bf16.msra.mxu0 %v26506_v58 }
 0xf20   :  { %20982 = vmatprep.subr.bf16.mxu0 %v26380_v38 }
 0xf23   :  { %20984 = vmatpush3.bf16.msra.mxu0 %v26510_v11 }
 0xf24   :  { %20985 = vmatprep.subr.bf16.mxu0 %v26380_v38 }
 0xf27   :  { %20987 = vmatpush3.bf16.msra.mxu0 %v26514_v21 }
 0xf28   :  { %20988 = vmatprep.subr.bf16.mxu0 %v26380_v38 }
 0xf2b   :  { %20990 = vmatpush3.bf16.msra.mxu0 %v26518_v22 }
 0xf2c   :  { %20991 = vmatprep.subr.bf16.mxu0 %v26380_v38 }
 0xf2f   :  { %20993 = vmatpush3.bf16.msra.mxu0 %v26522_v29 }
 0xf30   :  { %20994 = vmatprep.subr.bf16.mxu0 %v26380_v38 }
 0xf33   :  { %20996 = vmatpush3.bf16.msra.mxu0 %v26526_v26 }
 0xf34   :  { %20997 = vmatprep.subr.bf16.mxu0 %v26380_v38 }
 0xf37   :  { %20999 = vmatpush3.bf16.msra.mxu0 %v26555_v37 }
 0xf38   :  { %21000 = vmatprep.subr.bf16.mxu0 %v26380_v38 }
 0xfed   :  { %v7897_v53 = vpop.f32.mrb[24].mxu0 }
 0xfee   :  { %v7901_v23 = vadd.f32 %v23717_v41, %v7897_v53  ;;  %v17603_v44 = vpop.f32.mrb[25].mxu0 }
 0xff0   :  { %22270 = vtanh.f32 %v7901_v23 }
 0xffa   :  { %v22271_v59 = vpop.eup %22270 }
 0xffb   :  { %7903 = vst [vmem:[#allocation13 + $0x48] sm:$0xff] %v22271_v59  ;;  %v24777_v55 = vand.u32 4294901760, %v22271_v59 }
 0xffd   :  { %v7987_v0 = vsub.f32 %v22271_v59, %v24777_v55 }
 0xfff   :  { %v7988_v33 = vand.u32 4294901760, %v7987_v0 }
0x1001   :  { %v7989_v32 = vsub.f32 %v7987_v0, %v7988_v33 }
0x1003   :  { %v7990_v49 = vand.u32 4294901760, %v7989_v32 }
0x1005   :  { %17637 = vmatmul.mubr.f32.vlgmr.msra.gmra.mrb[10].mxu1 %v7990_v49 }
0x1006   :  { %20858 = vmatpush3.bf16.msra.mxu1 %v26556_v52  ;;  %17671 = vmatprep.mubr.msk.f32.mxu1 %vm22456_vm0, %v26417_v4 }
0x1007   :  { %20859 = vmatprep.subr.bf16.mxu1 %v26380_v38 }
0x100a   :  { %20861 = vmatpush3.bf16.msra.mxu1 %v26558_v10 }
0x100b   :  { %20862 = vmatprep.subr.bf16.mxu1 %v26380_v38 }
0x100e   :  { %20864 = vmatpush3.bf16.msra.mxu1 %v26559_v62 }
0x100f   :  { %20865 = vmatprep.subr.bf16.mxu1 %v26380_v38 }
0x1012   :  { %20867 = vmatpush3.bf16.msra.mxu1 %v26560_v5 }
0x1013   :  { %20868 = vmatprep.subr.bf16.mxu1 %v26380_v38 }
0x1016   :  { %20870 = vmatpush3.bf16.msra.mxu1 %v26561_v2 }
0x1017   :  { %20871 = vmatprep.subr.bf16.mxu1 %v26380_v38 }
0x101a   :  { %20873 = vmatpush3.bf16.msra.mxu1 %v26562_v28 }
0x101b   :  { %20874 = vmatprep.subr.bf16.mxu1 %v26380_v38 }
0x101e   :  { %20876 = vmatpush3.bf16.msra.mxu1 %v26563_v39 }
0x101f   :  { %20877 = vmatprep.subr.bf16.mxu1 %v26380_v38 }
0x1022   :  { %20879 = vmatpush3.bf16.msra.mxu1 %v26564_v12 }
0x1023   :  { %20880 = vmatprep.subr.bf16.mxu1 %v26380_v38 }
0x1025   :  { %17672 = vmatmul.mubr.f32.vlgmr.msra.gmra.mrb[10].mxu1 %v24777_v55 }
0x1026   :  { %20882 = vmatpush3.bf16.msra.mxu1 %v26565_v18  ;;  %17706 = vmatprep.mubr.msk.f32.mxu1 %vm22456_vm0, %v26417_v4 }
0x1027   :  { %20883 = vmatprep.subr.bf16.mxu1 %v26380_v38 }
0x102a   :  { %20885 = vmatpush3.bf16.msra.mxu1 %v26566_v7 }
0x102b   :  { %20886 = vmatprep.subr.bf16.mxu1 %v26380_v38 }
0x102e   :  { %20888 = vmatpush3.bf16.msra.mxu1 %v26567_v35 }
0x102f   :  { %20889 = vmatprep.subr.bf16.mxu1 %v26380_v38 }
0x1032   :  { %20891 = vmatpush3.bf16.msra.mxu1 %v26568_v8 }
0x1033   :  { %20892 = vmatprep.subr.bf16.mxu1 %v26380_v38 }
0x1036   :  { %20894 = vmatpush3.bf16.msra.mxu1 %v26569_v1 }
0x1037   :  { %20895 = vmatprep.subr.bf16.mxu1 %v26380_v38 }
0x103a   :  { %20897 = vmatpush3.bf16.msra.mxu1 %v26570_v45 }
0x103b   :  { %20898 = vmatprep.subr.bf16.mxu1 %v26380_v38 }
0x103e   :  { %20900 = vmatpush3.bf16.msra.mxu1 %v26571_v50 }
0x103f   :  { %20901 = vmatprep.subr.bf16.mxu1 %v26380_v38 }
0x1042   :  { %20903 = vmatpush3.bf16.msra.mxu1 %v26572_v42 }
0x1043   :  { %20904 = vmatprep.subr.bf16.mxu1 %v26380_v38 }
0x1045   :  { %17707 = vmatmul.mubr.f32.vlgmr.msra.gmra.mrb[10].mxu1 %v7987_v0 }
0x1046   :  { %20906 = vmatpush3.bf16.msra.mxu1 %v26502_v14  ;;  %17741 = vmatprep.mubr.msk.f32.mxu1 %vm22456_vm0, %v26417_v4 }
0x1047   :  { %20907 = vmatprep.subr.bf16.mxu1 %v26380_v38 }
0x104a   :  { %20909 = vmatpush3.bf16.msra.mxu1 %v26506_v58 }
0x104b   :  { %20910 = vmatprep.subr.bf16.mxu1 %v26380_v38 }
0x104e   :  { %20912 = vmatpush3.bf16.msra.mxu1 %v26510_v11 }
0x104f   :  { %20913 = vmatprep.subr.bf16.mxu1 %v26380_v38 }
0x1052   :  { %20915 = vmatpush3.bf16.msra.mxu1 %v26514_v21 }
0x1053   :  { %20916 = vmatprep.subr.bf16.mxu1 %v26380_v38 }
0x1056   :  { %20918 = vmatpush3.bf16.msra.mxu1 %v26518_v22 }
0x1057   :  { %20919 = vmatprep.subr.bf16.mxu1 %v26380_v38 }
0x105a   :  { %20921 = vmatpush3.bf16.msra.mxu1 %v26522_v29 }
0x105b   :  { %20922 = vmatprep.subr.bf16.mxu1 %v26380_v38 }
0x105e   :  { %20924 = vmatpush3.bf16.msra.mxu1 %v26526_v26 }
0x105f   :  { %20925 = vmatprep.subr.bf16.mxu1 %v26380_v38 }
0x1062   :  { %20927 = vmatpush3.bf16.msra.mxu1 %v26555_v37 }
0x1063   :  { %20928 = vmatprep.subr.bf16.mxu1 %v26380_v38 }
0x1065   :  { %17742 = vmatmul.mubr.f32.vlgmr.msra.gmra.mrb[10].mxu1 %v7988_v33 }
0x1066   :  { %20930 = vmatpush3.bf16.msra.mxu1 %v23323_v9  ;;  %17776 = vmatprep.mubr.msk.f32.mxu1 %vm22456_vm0, %v26417_v4 }
0x1067   :  { %20931 = vmatprep.subr.bf16.mxu1 %v26380_v38 }
0x106a   :  { %20933 = vmatpush3.bf16.msra.mxu1 %v23335_v43 }
0x106b   :  { %20934 = vmatprep.subr.bf16.mxu1 %v26380_v38 }
0x106e   :  { %20936 = vmatpush3.bf16.msra.mxu1 %v23348_v63 }
0x106f   :  { %20937 = vmatprep.subr.bf16.mxu1 %v26380_v38 }
0x1072   :  { %20939 = vmatpush3.bf16.msra.mxu1 %v23360_v54 }
0x1073   :  { %20940 = vmatprep.subr.bf16.mxu1 %v26380_v38 }
0x1076   :  { %20942 = vmatpush3.bf16.msra.mxu1 %v26543_v25 }
0x1077   :  { %20943 = vmatprep.subr.bf16.mxu1 %v26380_v38 }
0x107a   :  { %20945 = vmatpush3.bf16.msra.mxu1 %v23386_v3 }
0x107b   :  { %20946 = vmatprep.subr.bf16.mxu1 %v26380_v38 }
0x107e   :  { %20948 = vmatpush3.bf16.msra.mxu1 %v23398_v56 }
0x107f   :  { %20949 = vmatprep.subr.bf16.mxu1 %v26380_v38 }
0x1082   :  { %20951 = vmatpush3.bf16.msra.mxu1 %v23407_v27 }
0x1083   :  { %20952 = vmatprep.subr.bf16.mxu1 %v26380_v38 }
0x1085   :  { %17777 = vmatmul.mubr.f32.vlgmr.msra.gmra.mrb[10].mxu1 %v24777_v55 }
0x1086   :  { %20954 = vmatpush3.bf16.msra.mxu1 %v26502_v14  ;;  %17811 = vmatprep.mubr.msk.f32.mxu1 %vm22456_vm0, %v26417_v4 }
0x1087   :  { %20955 = vmatprep.subr.bf16.mxu1 %v26380_v38 }
0x108a   :  { %20957 = vmatpush3.bf16.msra.mxu1 %v26506_v58 }
0x108b   :  { %20958 = vmatprep.subr.bf16.mxu1 %v26380_v38 }
0x108e   :  { %20960 = vmatpush3.bf16.msra.mxu1 %v26510_v11 }
0x108f   :  { %20961 = vmatprep.subr.bf16.mxu1 %v26380_v38 }
0x1092   :  { %20963 = vmatpush3.bf16.msra.mxu1 %v26514_v21 }
0x1093   :  { %20964 = vmatprep.subr.bf16.mxu1 %v26380_v38 }
0x1096   :  { %20966 = vmatpush3.bf16.msra.mxu1 %v26518_v22 }
0x1097   :  { %20967 = vmatprep.subr.bf16.mxu1 %v26380_v38 }
0x109a   :  { %20969 = vmatpush3.bf16.msra.mxu1 %v26522_v29 }
0x109b   :  { %20970 = vmatprep.subr.bf16.mxu1 %v26380_v38 }
0x109e   :  { %20972 = vmatpush3.bf16.msra.mxu1 %v26526_v26 }
0x109f   :  { %20973 = vmatprep.subr.bf16.mxu1 %v26380_v38 }
0x10a2   :  { %20975 = vmatpush3.bf16.msra.mxu1 %v26555_v37 }
0x10a3   :  { %21120 = vmatprep.subr.bf16.mxu1 %v26380_v38 }
0x10a5   :  { %17812 = vmatmul.mubr.f32.vlgmr.msra.gmra.mrb[10].mxu1 %v24777_v55 }
0x10a6   :  { %21122 = vmatpush3.bf16.msra.mxu1 %v26502_v14  ;;  %18056 = vmatprep.mubr.msk.f32.mxu1 %vm22456_vm0, %v26417_v4 }
0x10a7   :  { %21123 = vmatprep.subr.bf16.mxu1 %v26380_v38 }
0x10aa   :  { %21125 = vmatpush3.bf16.msra.mxu1 %v26506_v58 }
0x10ab   :  { %21126 = vmatprep.subr.bf16.mxu1 %v26380_v38 }
0x10ae   :  { %21128 = vmatpush3.bf16.msra.mxu1 %v26510_v11 }
0x10af   :  { %21129 = vmatprep.subr.bf16.mxu1 %v26380_v38 }
0x10b2   :  { %21131 = vmatpush3.bf16.msra.mxu1 %v26514_v21 }
0x10b3   :  { %21132 = vmatprep.subr.bf16.mxu1 %v26380_v38 }
0x10b6   :  { %21134 = vmatpush3.bf16.msra.mxu1 %v26518_v22 }
0x10b7   :  { %21135 = vmatprep.subr.bf16.mxu1 %v26380_v38 }
0x10ba   :  { %21137 = vmatpush3.bf16.msra.mxu1 %v26522_v29 }
0x10bb   :  { %21138 = vmatprep.subr.bf16.mxu1 %v26380_v38 }
0x10be   :  { %21140 = vmatpush3.bf16.msra.mxu1 %v26526_v26 }
0x10bf   :  { %21141 = vmatprep.subr.bf16.mxu1 %v26380_v38 }
0x10c2   :  { %21143 = vmatpush3.bf16.msra.mxu1 %v26555_v37 }
0x10c3   :  { %21144 = vmatprep.subr.bf16.mxu1 %v26380_v38 }
0x1178   :  { %v8542_v41 = vpop.f32.mrb[10].mxu1 }
0x1179   :  { %v8546_v40 = vadd.f32 %v23729_v51, %v8542_v41  ;;  %v17813_v34 = vpop.f32.mrb[11].mxu1 }
0x117b   :  { %22272 = vtanh.f32 %v8546_v40 }
0x1185   :  { %v22273_v6 = vpop.eup %22272 }
0x1186   :  { %8548 = vst [vmem:[#allocation13 + $0x50] sm:$0xff] %v22273_v6  ;;  %v24892_v19 = vand.u32 4294901760, %v22273_v6 }
0x1188   :  { %v8632_v46 = vsub.f32 %v22273_v6, %v24892_v19 }
0x118a   :  { %v8633_v57 = vand.u32 4294901760, %v8632_v46 }
0x118c   :  { %v8634_v20 = vsub.f32 %v8632_v46, %v8633_v57 }
0x118e   :  { %v8635_v17 = vand.u32 4294901760, %v8634_v20 }
0x1190   :  { %17847 = vmatmul.mubr.f32.vlgmr.msra.gmra.mrb[26].mxu0 %v8635_v17 }
0x1191   :  { %21002 = vmatpush3.bf16.msra.mxu0 %v26556_v52  ;;  %17881 = vmatprep.mubr.msk.f32.mxu0 %vm22456_vm0, %v26417_v4 }
0x1192   :  { %21003 = vmatprep.subr.bf16.mxu0 %v26380_v38 }
0x1195   :  { %21005 = vmatpush3.bf16.msra.mxu0 %v26558_v10 }
0x1196   :  { %21006 = vmatprep.subr.bf16.mxu0 %v26380_v38 }
0x1199   :  { %21008 = vmatpush3.bf16.msra.mxu0 %v26559_v62 }
0x119a   :  { %21009 = vmatprep.subr.bf16.mxu0 %v26380_v38 }
0x119d   :  { %21011 = vmatpush3.bf16.msra.mxu0 %v26560_v5 }
0x119e   :  { %21012 = vmatprep.subr.bf16.mxu0 %v26380_v38 }
0x11a1   :  { %21014 = vmatpush3.bf16.msra.mxu0 %v26561_v2 }
0x11a2   :  { %21015 = vmatprep.subr.bf16.mxu0 %v26380_v38 }
0x11a5   :  { %21017 = vmatpush3.bf16.msra.mxu0 %v26562_v28 }
0x11a6   :  { %21018 = vmatprep.subr.bf16.mxu0 %v26380_v38 }
0x11a9   :  { %21020 = vmatpush3.bf16.msra.mxu0 %v26563_v39 }
0x11aa   :  { %21021 = vmatprep.subr.bf16.mxu0 %v26380_v38 }
0x11ad   :  { %21023 = vmatpush3.bf16.msra.mxu0 %v26564_v12 }
0x11ae   :  { %21024 = vmatprep.subr.bf16.mxu0 %v26380_v38 }
0x11b0   :  { %17882 = vmatmul.mubr.f32.vlgmr.msra.gmra.mrb[26].mxu0 %v24892_v19 }
0x11b1   :  { %21026 = vmatpush3.bf16.msra.mxu0 %v26565_v18  ;;  %17916 = vmatprep.mubr.msk.f32.mxu0 %vm22456_vm0, %v26417_v4 }
0x11b2   :  { %21027 = vmatprep.subr.bf16.mxu0 %v26380_v38 }
0x11b5   :  { %21029 = vmatpush3.bf16.msra.mxu0 %v26566_v7 }
0x11b6   :  { %21030 = vmatprep.subr.bf16.mxu0 %v26380_v38 }
0x11b9   :  { %21032 = vmatpush3.bf16.msra.mxu0 %v26567_v35 }
0x11ba   :  { %21033 = vmatprep.subr.bf16.mxu0 %v26380_v38 }
0x11bd   :  { %21035 = vmatpush3.bf16.msra.mxu0 %v26568_v8 }
0x11be   :  { %21036 = vmatprep.subr.bf16.mxu0 %v26380_v38 }
0x11c1   :  { %21038 = vmatpush3.bf16.msra.mxu0 %v26569_v1 }
0x11c2   :  { %21039 = vmatprep.subr.bf16.mxu0 %v26380_v38 }
0x11c5   :  { %21041 = vmatpush3.bf16.msra.mxu0 %v26570_v45 }
0x11c6   :  { %21042 = vmatprep.subr.bf16.mxu0 %v26380_v38 }
0x11c9   :  { %21044 = vmatpush3.bf16.msra.mxu0 %v26571_v50 }
0x11ca   :  { %21045 = vmatprep.subr.bf16.mxu0 %v26380_v38 }
0x11cd   :  { %21047 = vmatpush3.bf16.msra.mxu0 %v26572_v42 }
0x11ce   :  { %21048 = vmatprep.subr.bf16.mxu0 %v26380_v38 }
0x11d0   :  { %17917 = vmatmul.mubr.f32.vlgmr.msra.gmra.mrb[26].mxu0 %v8632_v46 }
0x11d1   :  { %21050 = vmatpush3.bf16.msra.mxu0 %v26502_v14  ;;  %17951 = vmatprep.mubr.msk.f32.mxu0 %vm22456_vm0, %v26417_v4 }
0x11d2   :  { %21051 = vmatprep.subr.bf16.mxu0 %v26380_v38 }
0x11d5   :  { %21053 = vmatpush3.bf16.msra.mxu0 %v26506_v58 }
0x11d6   :  { %21054 = vmatprep.subr.bf16.mxu0 %v26380_v38 }
0x11d9   :  { %21056 = vmatpush3.bf16.msra.mxu0 %v26510_v11 }
0x11da   :  { %21057 = vmatprep.subr.bf16.mxu0 %v26380_v38 }
0x11dd   :  { %21059 = vmatpush3.bf16.msra.mxu0 %v26514_v21 }
0x11de   :  { %21060 = vmatprep.subr.bf16.mxu0 %v26380_v38 }
0x11e1   :  { %21062 = vmatpush3.bf16.msra.mxu0 %v26518_v22 }
0x11e2   :  { %21063 = vmatprep.subr.bf16.mxu0 %v26380_v38 }
0x11e5   :  { %21065 = vmatpush3.bf16.msra.mxu0 %v26522_v29 }
0x11e6   :  { %21066 = vmatprep.subr.bf16.mxu0 %v26380_v38 }
0x11e9   :  { %21068 = vmatpush3.bf16.msra.mxu0 %v26526_v26 }
0x11ea   :  { %21069 = vmatprep.subr.bf16.mxu0 %v26380_v38 }
0x11ed   :  { %21071 = vmatpush3.bf16.msra.mxu0 %v26555_v37 }
0x11ee   :  { %21072 = vmatprep.subr.bf16.mxu0 %v26380_v38 }
0x11f0   :  { %17952 = vmatmul.mubr.f32.vlgmr.msra.gmra.mrb[26].mxu0 %v8633_v57 }
0x11f1   :  { %21074 = vmatpush3.bf16.msra.mxu0 %v23323_v9  ;;  %17986 = vmatprep.mubr.msk.f32.mxu0 %vm22456_vm0, %v26417_v4 }
0x11f2   :  { %21075 = vmatprep.subr.bf16.mxu0 %v26380_v38 }
0x11f5   :  { %21077 = vmatpush3.bf16.msra.mxu0 %v23335_v43 }
0x11f6   :  { %21078 = vmatprep.subr.bf16.mxu0 %v26380_v38 }
0x11f9   :  { %21080 = vmatpush3.bf16.msra.mxu0 %v23348_v63 }
0x11fa   :  { %21081 = vmatprep.subr.bf16.mxu0 %v26380_v38 }
0x11fd   :  { %21083 = vmatpush3.bf16.msra.mxu0 %v23360_v54 }
0x11fe   :  { %21084 = vmatprep.subr.bf16.mxu0 %v26380_v38 }
0x1201   :  { %21086 = vmatpush3.bf16.msra.mxu0 %v26543_v25 }
0x1202   :  { %21087 = vmatprep.subr.bf16.mxu0 %v26380_v38 }
0x1205   :  { %21089 = vmatpush3.bf16.msra.mxu0 %v23386_v3 }
0x1206   :  { %21090 = vmatprep.subr.bf16.mxu0 %v26380_v38 }
0x1209   :  { %21092 = vmatpush3.bf16.msra.mxu0 %v23398_v56 }
0x120a   :  { %21093 = vmatprep.subr.bf16.mxu0 %v26380_v38 }
0x120d   :  { %21095 = vmatpush3.bf16.msra.mxu0 %v23407_v27 }
0x120e   :  { %21096 = vmatprep.subr.bf16.mxu0 %v26380_v38 }
0x1210   :  { %17987 = vmatmul.mubr.f32.vlgmr.msra.gmra.mrb[26].mxu0 %v24892_v19 }
0x1211   :  { %21098 = vmatpush3.bf16.msra.mxu0 %v26502_v14  ;;  %18021 = vmatprep.mubr.msk.f32.mxu0 %vm22456_vm0, %v26417_v4 }
0x1212   :  { %21099 = vmatprep.subr.bf16.mxu0 %v26380_v38 }
0x1215   :  { %21101 = vmatpush3.bf16.msra.mxu0 %v26506_v58 }
0x1216   :  { %21102 = vmatprep.subr.bf16.mxu0 %v26380_v38 }
0x1219   :  { %21104 = vmatpush3.bf16.msra.mxu0 %v26510_v11 }
0x121a   :  { %21105 = vmatprep.subr.bf16.mxu0 %v26380_v38 }
0x121d   :  { %21107 = vmatpush3.bf16.msra.mxu0 %v26514_v21 }
0x121e   :  { %21108 = vmatprep.subr.bf16.mxu0 %v26380_v38 }
0x1221   :  { %21110 = vmatpush3.bf16.msra.mxu0 %v26518_v22 }
0x1222   :  { %21111 = vmatprep.subr.bf16.mxu0 %v26380_v38 }
0x1225   :  { %21113 = vmatpush3.bf16.msra.mxu0 %v26522_v29 }
0x1226   :  { %21114 = vmatprep.subr.bf16.mxu0 %v26380_v38 }
0x1229   :  { %21116 = vmatpush3.bf16.msra.mxu0 %v26526_v26 }
0x122a   :  { %21117 = vmatprep.subr.bf16.mxu0 %v26380_v38 }
0x122d   :  { %21119 = vmatpush3.bf16.msra.mxu0 %v26555_v37 }
0x122e   :  { %21264 = vmatprep.subr.bf16.mxu0 %v26380_v38 }
0x1230   :  { %18022 = vmatmul.mubr.f32.vlgmr.msra.gmra.mrb[26].mxu0 %v24892_v19 }
0x1231   :  { %21266 = vmatpush3.bf16.msra.mxu0 %v26502_v14  ;;  %18266 = vmatprep.mubr.msk.f32.mxu0 %vm22456_vm0, %v26417_v4 }
0x1232   :  { %21267 = vmatprep.subr.bf16.mxu0 %v26380_v38 }
0x1235   :  { %21269 = vmatpush3.bf16.msra.mxu0 %v26506_v58 }
0x1236   :  { %21270 = vmatprep.subr.bf16.mxu0 %v26380_v38 }
0x1239   :  { %21272 = vmatpush3.bf16.msra.mxu0 %v26510_v11 }
0x123a   :  { %21273 = vmatprep.subr.bf16.mxu0 %v26380_v38 }
0x123d   :  { %21275 = vmatpush3.bf16.msra.mxu0 %v26514_v21 }
0x123e   :  { %21276 = vmatprep.subr.bf16.mxu0 %v26380_v38 }
0x1241   :  { %21278 = vmatpush3.bf16.msra.mxu0 %v26518_v22 }
0x1242   :  { %21279 = vmatprep.subr.bf16.mxu0 %v26380_v38 }
0x1245   :  { %21281 = vmatpush3.bf16.msra.mxu0 %v26522_v29 }
0x1246   :  { %21282 = vmatprep.subr.bf16.mxu0 %v26380_v38 }
0x1249   :  { %21284 = vmatpush3.bf16.msra.mxu0 %v26526_v26 }
0x124a   :  { %21285 = vmatprep.subr.bf16.mxu0 %v26380_v38 }
0x124d   :  { %21287 = vmatpush3.bf16.msra.mxu0 %v26555_v37 }
0x124e   :  { %21288 = vmatprep.subr.bf16.mxu0 %v26380_v38 }
0x1303   :  { %v9187_v51 = vpop.f32.mrb[26].mxu0 }
0x1304   :  { %v9191_v60 = vadd.f32 %v23726_v13, %v9187_v51  ;;  %v18023_v47 = vpop.f32.mrb[27].mxu0 }
0x1305   :  { %v25366_v47 = vld [vmem:[#allocation11 + $0x8] sm:$0xff] }
0x1306   :  { %22274 = vtanh.f32 %v9191_v60  ;;  %v25364_v60 = vld [vmem:[#allocation11] sm:$0xff] }
0x1310   :  { %v22275_v16 = vpop.eup %22274 }
0x1311   :  { %9193 = vst [vmem:[#allocation13 + $0x58] sm:$0xff] %v22275_v16  ;;  %v25007_v15 = vand.u32 4294901760, %v22275_v16 }
0x1313   :  { %26573 = vst [vmem:[#allocation20_spill] sm:$0xff] %v25007_v15  ;;  %v25010_v24 = vsub.f32 %v22275_v16, %v25007_v15 }
0x1315   :  { %26574 = vst [vmem:[#allocation40_spill] sm:$0xff] %v25010_v24  ;;  %v25013_v31 = vand.u32 4294901760, %v25010_v24 }
0x1317   :  { %26575 = vst [vmem:[#allocation41_spill] sm:$0xff] %v25013_v31  ;;  %v9279_v53 = vsub.f32 %v25010_v24, %v25013_v31 }
0x1319   :  { %v25017_v23 = vand.u32 4294901760, %v9279_v53  ;;  %v26242_v53 = vand.u32 4294901760, %v25364_v60 }
0x131b   :  { %18057 = vmatmul.mubr.f32.vlgmr.msra.gmra.mrb[12].mxu1 %v25017_v23 }
0x131c   :  { %21146 = vmatpush3.bf16.msra.mxu1 %v26556_v52  ;;  %18091 = vmatprep.mubr.msk.f32.mxu1 %vm22456_vm0, %v26417_v4 }
0x131d   :  { %21147 = vmatprep.subr.bf16.mxu1 %v26380_v38 }
0x1320   :  { %21149 = vmatpush3.bf16.msra.mxu1 %v26558_v10 }
0x1321   :  { %21150 = vmatprep.subr.bf16.mxu1 %v26380_v38 }
0x1324   :  { %21152 = vmatpush3.bf16.msra.mxu1 %v26559_v62 }
0x1325   :  { %21153 = vmatprep.subr.bf16.mxu1 %v26380_v38 }
0x1328   :  { %21155 = vmatpush3.bf16.msra.mxu1 %v26560_v5 }
0x1329   :  { %21156 = vmatprep.subr.bf16.mxu1 %v26380_v38 }
0x132c   :  { %21158 = vmatpush3.bf16.msra.mxu1 %v26561_v2 }
0x132d   :  { %21159 = vmatprep.subr.bf16.mxu1 %v26380_v38 }
0x1330   :  { %21161 = vmatpush3.bf16.msra.mxu1 %v26562_v28 }
0x1331   :  { %21162 = vmatprep.subr.bf16.mxu1 %v26380_v38 }
0x1334   :  { %21164 = vmatpush3.bf16.msra.mxu1 %v26563_v39 }
0x1335   :  { %21165 = vmatprep.subr.bf16.mxu1 %v26380_v38 }
0x1338   :  { %21167 = vmatpush3.bf16.msra.mxu1 %v26564_v12 }
0x1339   :  { %21168 = vmatprep.subr.bf16.mxu1 %v26380_v38 }
0x133b   :  { %18092 = vmatmul.mubr.f32.vlgmr.msra.gmra.mrb[12].mxu1 %v25007_v15 }
0x133c   :  { %21170 = vmatpush3.bf16.msra.mxu1 %v26565_v18  ;;  %18126 = vmatprep.mubr.msk.f32.mxu1 %vm22456_vm0, %v26417_v4 }
0x133d   :  { %21171 = vmatprep.subr.bf16.mxu1 %v26380_v38 }
0x1340   :  { %21173 = vmatpush3.bf16.msra.mxu1 %v26566_v7 }
0x1341   :  { %21174 = vmatprep.subr.bf16.mxu1 %v26380_v38 }
0x1344   :  { %21176 = vmatpush3.bf16.msra.mxu1 %v26567_v35 }
0x1345   :  { %21177 = vmatprep.subr.bf16.mxu1 %v26380_v38 }
0x1348   :  { %21179 = vmatpush3.bf16.msra.mxu1 %v26568_v8 }
0x1349   :  { %21180 = vmatprep.subr.bf16.mxu1 %v26380_v38 }
0x134c   :  { %21182 = vmatpush3.bf16.msra.mxu1 %v26569_v1 }
0x134d   :  { %21183 = vmatprep.subr.bf16.mxu1 %v26380_v38 }
0x1350   :  { %21185 = vmatpush3.bf16.msra.mxu1 %v26570_v45 }
0x1351   :  { %21186 = vmatprep.subr.bf16.mxu1 %v26380_v38 }
0x1354   :  { %21188 = vmatpush3.bf16.msra.mxu1 %v26571_v50 }
0x1355   :  { %21189 = vmatprep.subr.bf16.mxu1 %v26380_v38 }
0x1358   :  { %21191 = vmatpush3.bf16.msra.mxu1 %v26572_v42 }
0x1359   :  { %21192 = vmatprep.subr.bf16.mxu1 %v26380_v38 }
0x135b   :  { %18127 = vmatmul.mubr.f32.vlgmr.msra.gmra.mrb[12].mxu1 %v25010_v24  ;;  %v25438_v24 = vld [vmem:[#allocation11 + $0x58] sm:$0xff] }
0x135c   :  { %21194 = vmatpush3.bf16.msra.mxu1 %v26502_v14  ;;  %18161 = vmatprep.mubr.msk.f32.mxu1 %vm22456_vm0, %v26417_v4  ;;  %26596 = vst [vmem:[#allocation31_spill] sm:$0xff] %v25438_v24 }
0x135d   :  { %21195 = vmatprep.subr.bf16.mxu1 %v26380_v38 }
0x1360   :  { %21197 = vmatpush3.bf16.msra.mxu1 %v26506_v58 }
0x1361   :  { %21198 = vmatprep.subr.bf16.mxu1 %v26380_v38 }
0x1364   :  { %21200 = vmatpush3.bf16.msra.mxu1 %v26510_v11 }
0x1365   :  { %21201 = vmatprep.subr.bf16.mxu1 %v26380_v38 }
0x1368   :  { %21203 = vmatpush3.bf16.msra.mxu1 %v26514_v21 }
0x1369   :  { %21204 = vmatprep.subr.bf16.mxu1 %v26380_v38 }
0x136c   :  { %21206 = vmatpush3.bf16.msra.mxu1 %v26518_v22 }
0x136d   :  { %21207 = vmatprep.subr.bf16.mxu1 %v26380_v38 }
0x1370   :  { %21209 = vmatpush3.bf16.msra.mxu1 %v26522_v29 }
0x1371   :  { %21210 = vmatprep.subr.bf16.mxu1 %v26380_v38 }
0x1374   :  { %21212 = vmatpush3.bf16.msra.mxu1 %v26526_v26 }
0x1375   :  { %21213 = vmatprep.subr.bf16.mxu1 %v26380_v38 }
0x1378   :  { %21215 = vmatpush3.bf16.msra.mxu1 %v26555_v37 }
0x1379   :  { %21216 = vmatprep.subr.bf16.mxu1 %v26380_v38 }
0x137b   :  { %18162 = vmatmul.mubr.f32.vlgmr.msra.gmra.mrb[12].mxu1 %v25013_v31  ;;  %v25422_v31 = vld [vmem:[#allocation11 + $0x40] sm:$0xff] }
0x137c   :  { %21218 = vmatpush3.bf16.msra.mxu1 %v23323_v9  ;;  %18196 = vmatprep.mubr.msk.f32.mxu1 %vm22456_vm0, %v26417_v4  ;;  %26592 = vst [vmem:[#allocation29_spill] sm:$0xff] %v25422_v31 }
0x137d   :  { %21219 = vmatprep.subr.bf16.mxu1 %v26380_v38 }
0x1380   :  { %21221 = vmatpush3.bf16.msra.mxu1 %v23335_v43 }
0x1381   :  { %21222 = vmatprep.subr.bf16.mxu1 %v26380_v38 }
0x1384   :  { %21224 = vmatpush3.bf16.msra.mxu1 %v23348_v63 }
0x1385   :  { %21225 = vmatprep.subr.bf16.mxu1 %v26380_v38 }
0x1388   :  { %21227 = vmatpush3.bf16.msra.mxu1 %v23360_v54 }
0x1389   :  { %21228 = vmatprep.subr.bf16.mxu1 %v26380_v38 }
0x138c   :  { %21230 = vmatpush3.bf16.msra.mxu1 %v26543_v25 }
0x138d   :  { %21231 = vmatprep.subr.bf16.mxu1 %v26380_v38 }
0x1390   :  { %21233 = vmatpush3.bf16.msra.mxu1 %v23386_v3 }
0x1391   :  { %21234 = vmatprep.subr.bf16.mxu1 %v26380_v38 }
0x1394   :  { %21236 = vmatpush3.bf16.msra.mxu1 %v23398_v56 }
0x1395   :  { %21237 = vmatprep.subr.bf16.mxu1 %v26380_v38 }
0x1398   :  { %21239 = vmatpush3.bf16.msra.mxu1 %v23407_v27 }
0x1399   :  { %21240 = vmatprep.subr.bf16.mxu1 %v26380_v38 }
0x139b   :  { %18197 = vmatmul.mubr.f32.vlgmr.msra.gmra.mrb[12].mxu1 %v25007_v15 }
0x139c   :  { %21242 = vmatpush3.bf16.msra.mxu1 %v26502_v14  ;;  %18231 = vmatprep.mubr.msk.f32.mxu1 %vm22456_vm0, %v26417_v4 }
0x139d   :  { %21243 = vmatprep.subr.bf16.mxu1 %v26380_v38 }
0x13a0   :  { %21245 = vmatpush3.bf16.msra.mxu1 %v26506_v58 }
0x13a1   :  { %21246 = vmatprep.subr.bf16.mxu1 %v26380_v38 }
0x13a4   :  { %21248 = vmatpush3.bf16.msra.mxu1 %v26510_v11 }
0x13a5   :  { %21249 = vmatprep.subr.bf16.mxu1 %v26380_v38 }
0x13a8   :  { %21251 = vmatpush3.bf16.msra.mxu1 %v26514_v21 }
0x13a9   :  { %21252 = vmatprep.subr.bf16.mxu1 %v26380_v38 }
0x13ac   :  { %21254 = vmatpush3.bf16.msra.mxu1 %v26518_v22 }
0x13ad   :  { %21255 = vmatprep.subr.bf16.mxu1 %v26380_v38 }
0x13b0   :  { %21257 = vmatpush3.bf16.msra.mxu1 %v26522_v29 }
0x13b1   :  { %21258 = vmatprep.subr.bf16.mxu1 %v26380_v38 }
0x13b4   :  { %21260 = vmatpush3.bf16.msra.mxu1 %v26526_v26 }
0x13b5   :  { %21261 = vmatprep.subr.bf16.mxu1 %v26380_v38 }
0x13b8   :  { %21263 = vmatpush3.bf16.msra.mxu1 %v26555_v37 }
0x13b9   :  { %21408 = vmatprep.subr.bf16.mxu1 %v26380_v38 }
0x13bb   :  { %18232 = vmatmul.mubr.f32.vlgmr.msra.gmra.mrb[12].mxu1 %v25007_v15 }
0x13bc   :  { %21410 = vmatpush3.bf16.msra.mxu1 %v26502_v14  ;;  %18476 = vmatprep.mubr.msk.f32.mxu1 %vm22456_vm0, %v26417_v4 }
0x13bd   :  { %21411 = vmatprep.subr.bf16.mxu1 %v26380_v38 }
0x13c0   :  { %21413 = vmatpush3.bf16.msra.mxu1 %v26506_v58 }
0x13c1   :  { %21414 = vmatprep.subr.bf16.mxu1 %v26380_v38 }
0x13c4   :  { %21416 = vmatpush3.bf16.msra.mxu1 %v26510_v11 }
0x13c5   :  { %21417 = vmatprep.subr.bf16.mxu1 %v26380_v38 }
0x13c8   :  { %21419 = vmatpush3.bf16.msra.mxu1 %v26514_v21 }
0x13c9   :  { %21420 = vmatprep.subr.bf16.mxu1 %v26380_v38 }
0x13cc   :  { %21422 = vmatpush3.bf16.msra.mxu1 %v26518_v22 }
0x13cd   :  { %21423 = vmatprep.subr.bf16.mxu1 %v26380_v38 }
0x13d0   :  { %21425 = vmatpush3.bf16.msra.mxu1 %v26522_v29 }
0x13d1   :  { %21426 = vmatprep.subr.bf16.mxu1 %v26380_v38 }
0x13d4   :  { %21428 = vmatpush3.bf16.msra.mxu1 %v26526_v26 }
0x13d5   :  { %21429 = vmatprep.subr.bf16.mxu1 %v26380_v38 }
0x13d8   :  { %21431 = vmatpush3.bf16.msra.mxu1 %v26555_v37 }
0x13d9   :  { %21432 = vmatprep.subr.bf16.mxu1 %v26380_v38 }
0x148e   :  { %v9832_v13 = vpop.f32.mrb[12].mxu1 }
0x148f   :  { %v9836_v44 = vadd.f32 %v23736_v30, %v9832_v13  ;;  %v18233_v59 = vpop.f32.mrb[13].mxu1  ;;  %v26241_v13 = vand.u32 4294901760, %v25366_v47 }
0x1490   :  { %v25376_v59 = vld [vmem:[#allocation11 + $0x10] sm:$0xff] }
0x1491   :  { %22276 = vtanh.f32 %v9836_v44 }
0x149b   :  { %v22277_v55 = vpop.eup %22276 }
0x149c   :  { %9838 = vst [vmem:[#allocation13 + $0x60] sm:$0xff] %v22277_v55  ;;  %v25134_v0 = vand.u32 4294901760, %v22277_v55 }
0x149e   :  { %26576 = vst [vmem:[#allocation21_spill] sm:$0xff] %v25134_v0  ;;  %v25137_v33 = vsub.f32 %v22277_v55, %v25134_v0  ;;  %v25378_v55 = vld [vmem:[#allocation11 + $0x18] sm:$0xff] }
0x149f   :  { %26584 = vst [vmem:[#allocation25_spill] sm:$0xff] %v25378_v55 }
0x14a0   :  { %26577 = vst [vmem:[#allocation43_spill] sm:$0xff] %v25137_v33  ;;  %v25140_v32 = vand.u32 4294901760, %v25137_v33 }
0x14a2   :  { %26578 = vst [vmem:[#allocation22_spill] sm:$0xff] %v25140_v32  ;;  %v9924_v49 = vsub.f32 %v25137_v33, %v25140_v32 }
0x14a4   :  { %v25144_v41 = vand.u32 4294901760, %v9924_v49  ;;  %v25386_v49 = vpack.c.bf16 %v26241_v13, %v26242_v53 }
0x14a6   :  { %18267 = vmatmul.mubr.f32.vlgmr.msra.gmra.mrb[28].mxu0 %v25144_v41  ;;  %26585 = vst [vmem:[#allocation53_spill] sm:$0xff] %v25386_v49 }
0x14a7   :  { %21290 = vmatpush3.bf16.msra.mxu0 %v26556_v52  ;;  %18301 = vmatprep.mubr.msk.f32.mxu0 %vm22456_vm0, %v26417_v4 }
0x14a8   :  { %21291 = vmatprep.subr.bf16.mxu0 %v26380_v38 }
0x14ab   :  { %21293 = vmatpush3.bf16.msra.mxu0 %v26558_v10 }
0x14ac   :  { %21294 = vmatprep.subr.bf16.mxu0 %v26380_v38 }
0x14af   :  { %21296 = vmatpush3.bf16.msra.mxu0 %v26559_v62 }
0x14b0   :  { %21297 = vmatprep.subr.bf16.mxu0 %v26380_v38 }
0x14b3   :  { %21299 = vmatpush3.bf16.msra.mxu0 %v26560_v5 }
0x14b4   :  { %21300 = vmatprep.subr.bf16.mxu0 %v26380_v38 }
0x14b7   :  { %21302 = vmatpush3.bf16.msra.mxu0 %v26561_v2 }
0x14b8   :  { %21303 = vmatprep.subr.bf16.mxu0 %v26380_v38 }
0x14bb   :  { %21305 = vmatpush3.bf16.msra.mxu0 %v26562_v28 }
0x14bc   :  { %21306 = vmatprep.subr.bf16.mxu0 %v26380_v38 }
0x14bf   :  { %21308 = vmatpush3.bf16.msra.mxu0 %v26563_v39 }
0x14c0   :  { %21309 = vmatprep.subr.bf16.mxu0 %v26380_v38 }
0x14c3   :  { %21311 = vmatpush3.bf16.msra.mxu0 %v26564_v12 }
0x14c4   :  { %21312 = vmatprep.subr.bf16.mxu0 %v26380_v38 }
0x14c6   :  { %18302 = vmatmul.mubr.f32.vlgmr.msra.gmra.mrb[28].mxu0 %v25134_v0 }
0x14c7   :  { %21314 = vmatpush3.bf16.msra.mxu0 %v26565_v18  ;;  %18336 = vmatprep.mubr.msk.f32.mxu0 %vm22456_vm0, %v26417_v4 }
0x14c8   :  { %21315 = vmatprep.subr.bf16.mxu0 %v26380_v38 }
0x14cb   :  { %21317 = vmatpush3.bf16.msra.mxu0 %v26566_v7 }
0x14cc   :  { %21318 = vmatprep.subr.bf16.mxu0 %v26380_v38 }
0x14cf   :  { %21320 = vmatpush3.bf16.msra.mxu0 %v26567_v35 }
0x14d0   :  { %21321 = vmatprep.subr.bf16.mxu0 %v26380_v38 }
0x14d3   :  { %21323 = vmatpush3.bf16.msra.mxu0 %v26568_v8 }
0x14d4   :  { %21324 = vmatprep.subr.bf16.mxu0 %v26380_v38 }
0x14d7   :  { %21326 = vmatpush3.bf16.msra.mxu0 %v26569_v1 }
0x14d8   :  { %21327 = vmatprep.subr.bf16.mxu0 %v26380_v38 }
0x14db   :  { %21329 = vmatpush3.bf16.msra.mxu0 %v26570_v45 }
0x14dc   :  { %21330 = vmatprep.subr.bf16.mxu0 %v26380_v38 }
0x14df   :  { %21332 = vmatpush3.bf16.msra.mxu0 %v26571_v50 }
0x14e0   :  { %21333 = vmatprep.subr.bf16.mxu0 %v26380_v38 }
0x14e3   :  { %21335 = vmatpush3.bf16.msra.mxu0 %v26572_v42 }
0x14e4   :  { %21336 = vmatprep.subr.bf16.mxu0 %v26380_v38 }
0x14e6   :  { %18337 = vmatmul.mubr.f32.vlgmr.msra.gmra.mrb[28].mxu0 %v25137_v33  ;;  %v25436_v33 = vld [vmem:[#allocation11 + $0x50] sm:$0xff] }
0x14e7   :  { %21338 = vmatpush3.bf16.msra.mxu0 %v26502_v14  ;;  %18371 = vmatprep.mubr.msk.f32.mxu0 %vm22456_vm0, %v26417_v4  ;;  %26595 = vst [vmem:[#allocation60_spill] sm:$0xff] %v25436_v33 }
0x14e8   :  { %21339 = vmatprep.subr.bf16.mxu0 %v26380_v38 }
0x14eb   :  { %21341 = vmatpush3.bf16.msra.mxu0 %v26506_v58 }
0x14ec   :  { %21342 = vmatprep.subr.bf16.mxu0 %v26380_v38 }
0x14ef   :  { %21344 = vmatpush3.bf16.msra.mxu0 %v26510_v11 }
0x14f0   :  { %21345 = vmatprep.subr.bf16.mxu0 %v26380_v38 }
0x14f3   :  { %21347 = vmatpush3.bf16.msra.mxu0 %v26514_v21 }
0x14f4   :  { %21348 = vmatprep.subr.bf16.mxu0 %v26380_v38 }
0x14f7   :  { %21350 = vmatpush3.bf16.msra.mxu0 %v26518_v22 }
0x14f8   :  { %21351 = vmatprep.subr.bf16.mxu0 %v26380_v38 }
0x14fb   :  { %21353 = vmatpush3.bf16.msra.mxu0 %v26522_v29 }
0x14fc   :  { %21354 = vmatprep.subr.bf16.mxu0 %v26380_v38 }
0x14ff   :  { %21356 = vmatpush3.bf16.msra.mxu0 %v26526_v26 }
0x1500   :  { %21357 = vmatprep.subr.bf16.mxu0 %v26380_v38 }
0x1503   :  { %21359 = vmatpush3.bf16.msra.mxu0 %v26555_v37 }
0x1504   :  { %21360 = vmatprep.subr.bf16.mxu0 %v26380_v38 }
0x1506   :  { %18372 = vmatmul.mubr.f32.vlgmr.msra.gmra.mrb[28].mxu0 %v25140_v32  ;;  %v25409_v32 = vld [vmem:[#allocation11 + $0x38] sm:$0xff] }
0x1507   :  { %21362 = vmatpush3.bf16.msra.mxu0 %v23323_v9  ;;  %18406 = vmatprep.mubr.msk.f32.mxu0 %vm22456_vm0, %v26417_v4  ;;  %26590 = vst [vmem:[#allocation28_spill] sm:$0xff] %v25409_v32 }
0x1508   :  { %21363 = vmatprep.subr.bf16.mxu0 %v26380_v38 }
0x150b   :  { %21365 = vmatpush3.bf16.msra.mxu0 %v23335_v43 }
0x150c   :  { %21366 = vmatprep.subr.bf16.mxu0 %v26380_v38 }
0x150f   :  { %21368 = vmatpush3.bf16.msra.mxu0 %v23348_v63 }
0x1510   :  { %21369 = vmatprep.subr.bf16.mxu0 %v26380_v38 }
0x1513   :  { %21371 = vmatpush3.bf16.msra.mxu0 %v23360_v54 }
0x1514   :  { %21372 = vmatprep.subr.bf16.mxu0 %v26380_v38 }
0x1517   :  { %21374 = vmatpush3.bf16.msra.mxu0 %v26543_v25 }
0x1518   :  { %21375 = vmatprep.subr.bf16.mxu0 %v26380_v38 }
0x151b   :  { %21377 = vmatpush3.bf16.msra.mxu0 %v23386_v3 }
0x151c   :  { %21378 = vmatprep.subr.bf16.mxu0 %v26380_v38 }
0x151f   :  { %21380 = vmatpush3.bf16.msra.mxu0 %v23398_v56 }
0x1520   :  { %21381 = vmatprep.subr.bf16.mxu0 %v26380_v38 }
0x1523   :  { %21383 = vmatpush3.bf16.msra.mxu0 %v23407_v27 }
0x1524   :  { %21384 = vmatprep.subr.bf16.mxu0 %v26380_v38 }
0x1526   :  { %18407 = vmatmul.mubr.f32.vlgmr.msra.gmra.mrb[28].mxu0 %v25134_v0 }
0x1527   :  { %21386 = vmatpush3.bf16.msra.mxu0 %v26502_v14  ;;  %18441 = vmatprep.mubr.msk.f32.mxu0 %vm22456_vm0, %v26417_v4 }
0x1528   :  { %21387 = vmatprep.subr.bf16.mxu0 %v26380_v38 }
0x152b   :  { %21389 = vmatpush3.bf16.msra.mxu0 %v26506_v58 }
0x152c   :  { %21390 = vmatprep.subr.bf16.mxu0 %v26380_v38 }
0x152f   :  { %21392 = vmatpush3.bf16.msra.mxu0 %v26510_v11 }
0x1530   :  { %21393 = vmatprep.subr.bf16.mxu0 %v26380_v38 }
0x1533   :  { %21395 = vmatpush3.bf16.msra.mxu0 %v26514_v21 }
0x1534   :  { %21396 = vmatprep.subr.bf16.mxu0 %v26380_v38 }
0x1537   :  { %21398 = vmatpush3.bf16.msra.mxu0 %v26518_v22 }
0x1538   :  { %21399 = vmatprep.subr.bf16.mxu0 %v26380_v38 }
0x153b   :  { %21401 = vmatpush3.bf16.msra.mxu0 %v26522_v29 }
0x153c   :  { %21402 = vmatprep.subr.bf16.mxu0 %v26380_v38 }
0x153f   :  { %21404 = vmatpush3.bf16.msra.mxu0 %v26526_v26 }
0x1540   :  { %21405 = vmatprep.subr.bf16.mxu0 %v26380_v38 }
0x1543   :  { %21407 = vmatpush3.bf16.msra.mxu0 %v26555_v37 }
0x1544   :  { %21552 = vmatprep.subr.bf16.mxu0 %v26380_v38 }
0x1546   :  { %18442 = vmatmul.mubr.f32.vlgmr.msra.gmra.mrb[28].mxu0 %v25134_v0  ;;  %v25452_v0 = vld [vmem:[#allocation11 + $0x68] sm:$0xff] }
0x1547   :  { %21554 = vmatpush3.bf16.msra.mxu0 %v26502_v14  ;;  %18686 = vmatprep.mubr.msk.f32.mxu0 %vm22456_vm0, %v26417_v4  ;;  %26599 = vst [vmem:[#allocation63_spill] sm:$0xff] %v25452_v0 }
0x1548   :  { %21555 = vmatprep.subr.bf16.mxu0 %v26380_v38 }
0x154b   :  { %21557 = vmatpush3.bf16.msra.mxu0 %v26506_v58 }
0x154c   :  { %21558 = vmatprep.subr.bf16.mxu0 %v26380_v38 }
0x154f   :  { %21560 = vmatpush3.bf16.msra.mxu0 %v26510_v11 }
0x1550   :  { %21561 = vmatprep.subr.bf16.mxu0 %v26380_v38 }
0x1553   :  { %21563 = vmatpush3.bf16.msra.mxu0 %v26514_v21 }
0x1554   :  { %21564 = vmatprep.subr.bf16.mxu0 %v26380_v38 }
0x1557   :  { %21566 = vmatpush3.bf16.msra.mxu0 %v26518_v22 }
0x1558   :  { %21567 = vmatprep.subr.bf16.mxu0 %v26380_v38 }
0x155b   :  { %21569 = vmatpush3.bf16.msra.mxu0 %v26522_v29 }
0x155c   :  { %21570 = vmatprep.subr.bf16.mxu0 %v26380_v38 }
0x155f   :  { %21572 = vmatpush3.bf16.msra.mxu0 %v26526_v26 }
0x1560   :  { %21573 = vmatprep.subr.bf16.mxu0 %v26380_v38 }
0x1563   :  { %21575 = vmatpush3.bf16.msra.mxu0 %v26555_v37 }
0x1564   :  { %21576 = vmatprep.subr.bf16.mxu0 %v26380_v38 }
0x1619   :  { %v10477_v30 = vpop.f32.mrb[28].mxu0 }
0x161a   :  { %v10481_v40 = vadd.f32 %v23734_v36, %v10477_v30  ;;  %v18443_v34 = vpop.f32.mrb[29].mxu0  ;;  %v11774_v36 = vld [vmem:[#allocation13] sm:$0xff]  ;;  %v26247_v30 = vand.u32 4294901760, %v25376_v59 }
0x161b   :  { %v25360_v51 = vand.u32 4294901760, %v11774_v36 }
0x161c   :  { %22278 = vtanh.f32 %v10481_v40  ;;  %v26246_v40 = vand.u32 4294901760, %v25378_v55 }
0x161d   :  { %26582 = vst [vmem:[#allocation24_spill] sm:$0xff] %v25360_v51  ;;  %v25369_v16 = vsub.f32 %v11774_v36, %v25360_v51  ;;  %v26296_v51 = vand.u32 4294901760, %v25452_v0 }
0x161e   :  { %v25403_v36 = vpack.c.bf16 %v26246_v40, %v26247_v30 }
0x161f   :  { %26583 = vst [vmem:[#allocation49_spill] sm:$0xff] %v25369_v16  ;;  %v26244_v44 = vand.u32 4294901760, %v25369_v16 }
0x1620   :  { %26588 = vst [vmem:[#allocation27_spill] sm:$0xff] %v25403_v36 }
0x1621   :  { %v11897_v34 = vsub.f32 %v25369_v16, %v26244_v44  ;;  %v25407_v44 = vld [vmem:[#allocation11 + $0x30] sm:$0xff] }
0x1622   :  { %26589 = vst [vmem:[#allocation56_spill] sm:$0xff] %v25407_v44  ;;  %v26257_v30 = vand.u32 4294901760, %v25407_v44  ;;  %v11776_v16 = vld [vmem:[#allocation13 + $0x10] sm:$0xff] }
0x1623   :  { %v25457_v15 = vand.u32 4294901760, %v11776_v16 }
0x1625   :  { %26601 = vst [vmem:[#allocation66_spill] sm:$0xff] %v25457_v15 }
0x1626   :  { %v22279_v6 = vpop.eup %22278 }
0x1627   :  { %10483 = vst [vmem:[#allocation13 + $0x68] sm:$0xff] %v22279_v6  ;;  %v25261_v19 = vand.u32 4294901760, %v22279_v6 }
0x1629   :  { %26579 = vst [vmem:[#allocation45_spill] sm:$0xff] %v25261_v19  ;;  %v25264_v46 = vsub.f32 %v22279_v6, %v25261_v19  ;;  %v25393_v6 = vld [vmem:[#allocation11 + $0x20] sm:$0xff] }
0x162a   :  { %26586 = vst [vmem:[#allocation26_spill] sm:$0xff] %v25393_v6  ;;  %v26251_v13 = vand.u32 4294901760, %v25393_v6 }
0x162b   :  { %26580 = vst [vmem:[#allocation23_spill] sm:$0xff] %v25264_v46  ;;  %v25267_v57 = vand.u32 4294901760, %v25264_v46 }
0x162d   :  { %26581 = vst [vmem:[#allocation47_spill] sm:$0xff] %v25267_v57  ;;  %v10569_v20 = vsub.f32 %v25264_v46, %v25267_v57 }
0x162f   :  { %v25271_v17 = vand.u32 4294901760, %v10569_v20  ;;  %v25395_v20 = vld [vmem:[#allocation11 + $0x28] sm:$0xff] }
0x1630   :  { %26587 = vst [vmem:[#allocation54_spill] sm:$0xff] %v25395_v20  ;;  %v26250_v53 = vand.u32 4294901760, %v25395_v20 }
0x1631   :  { %18477 = vmatmul.mubr.f32.vlgmr.msra.gmra.mrb[14].mxu1 %v25271_v17 }
0x1632   :  { %21434 = vmatpush3.bf16.msra.mxu1 %v26556_v52  ;;  %18511 = vmatprep.mubr.msk.f32.mxu1 %vm22456_vm0, %v26417_v4  ;;  %v25418_v40 = vpack.c.bf16 %v26250_v53, %v26251_v13  ;;  %v26271_v53 = vand.u32 4294901760, %v25422_v31  ;;  %v11778_v31 = vld [vmem:[#allocation13 + $0x20] sm:$0xff] }
0x1633   :  { %21435 = vmatprep.subr.bf16.mxu1 %v26380_v38 }
0x1634   :  { %26591 = vst [vmem:[#allocation57_spill] sm:$0xff] %v25418_v40 }
0x1636   :  { %21437 = vmatpush3.bf16.msra.mxu1 %v26558_v10 }
0x1637   :  { %21438 = vmatprep.subr.bf16.mxu1 %v26380_v38 }
0x163a   :  { %21440 = vmatpush3.bf16.msra.mxu1 %v26559_v62 }
0x163b   :  { %21441 = vmatprep.subr.bf16.mxu1 %v26380_v38 }
0x163e   :  { %21443 = vmatpush3.bf16.msra.mxu1 %v26560_v5 }
0x163f   :  { %21444 = vmatprep.subr.bf16.mxu1 %v26380_v38 }
0x1642   :  { %21446 = vmatpush3.bf16.msra.mxu1 %v26561_v2 }
0x1643   :  { %21447 = vmatprep.subr.bf16.mxu1 %v26380_v38 }
0x1646   :  { %21449 = vmatpush3.bf16.msra.mxu1 %v26562_v28 }
0x1647   :  { %21450 = vmatprep.subr.bf16.mxu1 %v26380_v38 }
0x164a   :  { %21452 = vmatpush3.bf16.msra.mxu1 %v26563_v39 }
0x164b   :  { %21453 = vmatprep.subr.bf16.mxu1 %v26380_v38 }
0x164e   :  { %21455 = vmatpush3.bf16.msra.mxu1 %v26564_v12 }
0x164f   :  { %21456 = vmatprep.subr.bf16.mxu1 %v26380_v38 }
0x1651   :  { %18512 = vmatmul.mubr.f32.vlgmr.msra.gmra.mrb[14].mxu1 %v25261_v19 }
0x1652   :  { %21458 = vmatpush3.bf16.msra.mxu1 %v26565_v18  ;;  %18546 = vmatprep.mubr.msk.f32.mxu1 %vm22456_vm0, %v26417_v4 }
0x1653   :  { %21459 = vmatprep.subr.bf16.mxu1 %v26380_v38 }
0x1656   :  { %21461 = vmatpush3.bf16.msra.mxu1 %v26566_v7 }
0x1657   :  { %21462 = vmatprep.subr.bf16.mxu1 %v26380_v38 }
0x165a   :  { %21464 = vmatpush3.bf16.msra.mxu1 %v26567_v35 }
0x165b   :  { %21465 = vmatprep.subr.bf16.mxu1 %v26380_v38 }
0x165e   :  { %21467 = vmatpush3.bf16.msra.mxu1 %v26568_v8 }
0x165f   :  { %21468 = vmatprep.subr.bf16.mxu1 %v26380_v38 }
0x1662   :  { %21470 = vmatpush3.bf16.msra.mxu1 %v26569_v1 }
0x1663   :  { %21471 = vmatprep.subr.bf16.mxu1 %v26380_v38 }
0x1666   :  { %21473 = vmatpush3.bf16.msra.mxu1 %v26570_v45 }
0x1667   :  { %21474 = vmatprep.subr.bf16.mxu1 %v26380_v38 }
0x166a   :  { %21476 = vmatpush3.bf16.msra.mxu1 %v26571_v50 }
0x166b   :  { %21477 = vmatprep.subr.bf16.mxu1 %v26380_v38 }
0x166e   :  { %21479 = vmatpush3.bf16.msra.mxu1 %v26572_v42 }
0x166f   :  { %21480 = vmatprep.subr.bf16.mxu1 %v26380_v38 }
0x1671   :  { %18547 = vmatmul.mubr.f32.vlgmr.msra.gmra.mrb[14].mxu1 %v25264_v46  ;;  %v25424_v46 = vld [vmem:[#allocation11 + $0x48] sm:$0xff] }
0x1672   :  { %21482 = vmatpush3.bf16.msra.mxu1 %v26502_v14  ;;  %18581 = vmatprep.mubr.msk.f32.mxu1 %vm22456_vm0, %v26417_v4  ;;  %26593 = vst [vmem:[#allocation59_spill] sm:$0xff] %v25424_v46  ;;  %v26270_v13 = vand.u32 4294901760, %v25424_v46  ;;  %v25470_v46 = vld [vmem:[#allocation11 + $0x78] sm:$0xff] }
0x1673   :  { %21483 = vmatprep.subr.bf16.mxu1 %v26380_v38  ;;  %26604 = vst [vmem:[#allocation72_spill] sm:$0xff] %v25470_v46 }
0x1676   :  { %21485 = vmatpush3.bf16.msra.mxu1 %v26506_v58 }
0x1677   :  { %21486 = vmatprep.subr.bf16.mxu1 %v26380_v38 }
0x167a   :  { %21488 = vmatpush3.bf16.msra.mxu1 %v26510_v11 }
0x167b   :  { %21489 = vmatprep.subr.bf16.mxu1 %v26380_v38 }
0x167e   :  { %21491 = vmatpush3.bf16.msra.mxu1 %v26514_v21 }
0x167f   :  { %21492 = vmatprep.subr.bf16.mxu1 %v26380_v38 }
0x1682   :  { %21494 = vmatpush3.bf16.msra.mxu1 %v26518_v22 }
0x1683   :  { %21495 = vmatprep.subr.bf16.mxu1 %v26380_v38 }
0x1686   :  { %21497 = vmatpush3.bf16.msra.mxu1 %v26522_v29 }
0x1687   :  { %21498 = vmatprep.subr.bf16.mxu1 %v26380_v38 }
0x168a   :  { %21500 = vmatpush3.bf16.msra.mxu1 %v26526_v26 }
0x168b   :  { %21501 = vmatprep.subr.bf16.mxu1 %v26380_v38 }
0x168e   :  { %21503 = vmatpush3.bf16.msra.mxu1 %v26555_v37 }
0x168f   :  { %21504 = vmatprep.subr.bf16.mxu1 %v26380_v38 }
0x1691   :  { %18582 = vmatmul.mubr.f32.vlgmr.msra.gmra.mrb[14].mxu1 %v25267_v57  ;;  %v11898_v57 = vand.u32 4294901760, %v11897_v34  ;;  %v26256_v34 = vand.u32 4294901760, %v25409_v32 }
0x1692   :  { %21506 = vmatpush3.bf16.msra.mxu1 %v23323_v9  ;;  %18616 = vmatprep.mubr.msk.f32.mxu1 %vm22456_vm0, %v26417_v4 }
0x1693   :  { %21507 = vmatprep.subr.bf16.mxu1 %v26380_v38 }
0x1696   :  { %21509 = vmatpush3.bf16.msra.mxu1 %v23335_v43 }
0x1697   :  { %21510 = vmatprep.subr.bf16.mxu1 %v26380_v38 }
0x169a   :  { %21512 = vmatpush3.bf16.msra.mxu1 %v23348_v63 }
0x169b   :  { %21513 = vmatprep.subr.bf16.mxu1 %v26380_v38 }
0x169e   :  { %21515 = vmatpush3.bf16.msra.mxu1 %v23360_v54 }
0x169f   :  { %21516 = vmatprep.subr.bf16.mxu1 %v26380_v38 }
0x16a2   :  { %21518 = vmatpush3.bf16.msra.mxu1 %v26543_v25 }
0x16a3   :  { %21519 = vmatprep.subr.bf16.mxu1 %v26380_v38 }
0x16a6   :  { %21521 = vmatpush3.bf16.msra.mxu1 %v23386_v3 }
0x16a7   :  { %21522 = vmatprep.subr.bf16.mxu1 %v26380_v38 }
0x16aa   :  { %21524 = vmatpush3.bf16.msra.mxu1 %v23398_v56 }
0x16ab   :  { %21525 = vmatprep.subr.bf16.mxu1 %v26380_v38 }
0x16ae   :  { %21527 = vmatpush3.bf16.msra.mxu1 %v23407_v27 }
0x16af   :  { %21528 = vmatprep.subr.bf16.mxu1 %v26380_v38 }
0x16b1   :  { %18617 = vmatmul.mubr.f32.vlgmr.msra.gmra.mrb[14].mxu1 %v25261_v19 }
0x16b2   :  { %21530 = vmatpush3.bf16.msra.mxu1 %v26502_v14  ;;  %18651 = vmatprep.mubr.msk.f32.mxu1 %vm22456_vm0, %v26417_v4 }
0x16b3   :  { %21531 = vmatprep.subr.bf16.mxu1 %v26380_v38 }
0x16b6   :  { %21533 = vmatpush3.bf16.msra.mxu1 %v26506_v58 }
0x16b7   :  { %21534 = vmatprep.subr.bf16.mxu1 %v26380_v38 }
0x16ba   :  { %21536 = vmatpush3.bf16.msra.mxu1 %v26510_v11 }
0x16bb   :  { %21537 = vmatprep.subr.bf16.mxu1 %v26380_v38 }
0x16be   :  { %21539 = vmatpush3.bf16.msra.mxu1 %v26514_v21 }
0x16bf   :  { %21540 = vmatprep.subr.bf16.mxu1 %v26380_v38 }
0x16c2   :  { %21542 = vmatpush3.bf16.msra.mxu1 %v26518_v22 }
0x16c3   :  { %21543 = vmatprep.subr.bf16.mxu1 %v26380_v38 }
0x16c6   :  { %21545 = vmatpush3.bf16.msra.mxu1 %v26522_v29 }
0x16c7   :  { %21546 = vmatprep.subr.bf16.mxu1 %v26380_v38 }
0x16ca   :  { %21548 = vmatpush3.bf16.msra.mxu1 %v26526_v26 }
0x16cb   :  { %21549 = vmatprep.subr.bf16.mxu1 %v26380_v38 }
0x16ce   :  { %21551 = vmatpush3.bf16.msra.mxu1 %v26555_v37 }
0x16cf   :  { %21697 = vmatprep.subr.bf16.mxu1 %v25386_v49 }
0x16d1   :  { %18652 = vmatmul.mubr.f32.vlgmr.msra.gmra.mrb[14].mxu1 %v25261_v19  ;;  %v25450_v19 = vld [vmem:[#allocation11 + $0x60] sm:$0xff] }
0x16d2   :  { %21699 = vmatpush3.bf16.msra.mxu1 %v25386_v49  ;;  %18896 = vmatprep.mubr.f32.mxu1 %v11898_v57  ;;  %v25432_v57 = vpack.c.bf16 %v26256_v34, %v26257_v30  ;;  %v26285_v34 = vand.u32 4294901760, %v25436_v33  ;;  %v26284_v30 = vand.u32 4294901760, %v25438_v24  ;;  %v11775_v49 = vld [vmem:[#allocation13 + $0x8] sm:$0xff]  ;;  %26598 = vst [vmem:[#allocation32_spill] sm:$0xff] %v25450_v19  ;;  %v25477_v33 = vsub.f32 %v11776_v16, %v25457_v15  ;;  %v11781_v16 = vld [vmem:[#allocation13 + $0x38] sm:$0xff]  ;;  %v11782_v15 = vld [vmem:[#allocation13 + $0x40] sm:$0xff] }
0x16d3   :  { %21701 = vmatprep.subr.bf16.mxu1 %v25403_v36  ;;  %v26308_v24 = vand.u32 4294901760, %v25470_v46  ;;  %v25530_v20 = vand.u32 4294901760, %v11782_v15 }
0x16d4   :  { %26594 = vst [vmem:[#allocation30_spill] sm:$0xff] %v25432_v57  ;;  %26606 = vst [vmem:[#allocation33_spill] sm:$0xff] %v25477_v33 }
0x16d6   :  { %21703 = vmatpush3.bf16.msra.mxu1 %v25403_v36  ;;  %v25446_v36 = vpack.c.bf16 %v26270_v13, %v26271_v53  ;;  %v25464_v13 = vpack.c.bf16 %v26284_v30, %v26285_v34  ;;  %v26297_v53 = vand.u32 4294901760, %v25450_v19  ;;  %v26309_v34 = vand.u32 4294901760, %v25468_v61 }
0x16d7   :  { %21705 = vmatprep.subr.bf16.mxu1 %v25418_v40 }
0x16d8   :  { %26597 = vst [vmem:[#allocation62_spill] sm:$0xff] %v25446_v36  ;;  %26602 = vst [vmem:[#allocation35_spill] sm:$0xff] %v25464_v13  ;;  %v25484_v30 = vpack.c.bf16 %v26296_v51, %v26297_v53  ;;  %v25500_v51 = vpack.c.bf16 %v26308_v24, %v26309_v34  ;;  %v26616_v24 = vand.u32 4294901760, %v25477_v33 }
0x16da   :  { %21707 = vmatpush3.bf16.msra.mxu1 %v25418_v40  ;;  %v25455_v40 = vand.u32 4294901760, %v11775_v49  ;;  %26607 = vst [vmem:[#allocation36_spill] sm:$0xff] %v25484_v30  ;;  %26610 = vst [vmem:[#allocation67_spill] sm:$0xff] %v25500_v51 }
0x16db   :  { %21709 = vmatprep.subr.bf16.mxu1 %v25432_v57 }
0x16dc   :  { %26600 = vst [vmem:[#allocation34_spill] sm:$0xff] %v25455_v40  ;;  %v25474_v32 = vsub.f32 %v11775_v49, %v25455_v40  ;;  %v11779_v49 = vld [vmem:[#allocation13 + $0x28] sm:$0xff]  ;;  %v11780_v40 = vld [vmem:[#allocation13 + $0x30] sm:$0xff] }
0x16dd   :  { %v25505_v0 = vand.u32 4294901760, %v11779_v49 }
0x16de   :  { %21711 = vmatpush3.bf16.msra.mxu1 %v25432_v57  ;;  %v11777_v57 = vld [vmem:[#allocation13 + $0x18] sm:$0xff]  ;;  %26605 = vst [vmem:[#allocation73_spill] sm:$0xff] %v25474_v32  ;;  %v26615_v61 = vand.u32 4294901760, %v25474_v32 }
0x16df   :  { %21713 = vmatprep.subr.bf16.mxu1 %v25446_v36  ;;  %v25488_v44 = vand.u32 4294901760, %v11777_v57  ;;  %26612 = vst [vmem:[#allocation44_spill] sm:$0xff] %v25505_v0 }
0x16e0   :  { %v11907_v46 = vsub.f32 %v25474_v32, %v26615_v61  ;;  %v11783_v61 = vld [vmem:[#allocation13 + $0x48] sm:$0xff]  ;;  %v11784_v32 = vld [vmem:[#allocation13 + $0x50] sm:$0xff] }
0x16e1   :  { %26608 = vst [vmem:[#allocation39_spill] sm:$0xff] %v25488_v44  ;;  %v25503_v53 = vsub.f32 %v11777_v57, %v25488_v44  ;;  %v11917_v57 = vsub.f32 %v25477_v33, %v26616_v24  ;;  %v25540_v44 = vand.u32 4294901760, %v11783_v61 }
0x16e2   :  { %21715 = vmatpush3.bf16.msra.mxu1 %v25446_v36  ;;  %v25490_v36 = vand.u32 4294901760, %v11778_v31  ;;  %v11908_v24 = vand.u32 4294901760, %v11907_v46  ;;  %v25547_v46 = vsub.f32 %v11782_v15, %v25530_v20 }
0x16e3   :  { %21717 = vmatprep.subr.bf16.mxu1 %v25464_v13  ;;  %26611 = vst [vmem:[#allocation37_spill] sm:$0xff] %v25503_v53  ;;  %v26330_v34 = vand.u32 4294901760, %v25503_v53  ;;  %v11918_v33 = vand.u32 4294901760, %v11917_v57  ;;  %v25549_v57 = vand.u32 4294901760, %v11784_v32 }
0x16e4   :  { %26609 = vst [vmem:[#allocation65_spill] sm:$0xff] %v25490_v36  ;;  %v25508_v19 = vsub.f32 %v11778_v31, %v25490_v36  ;;  %v25522_v31 = vsub.f32 %v11779_v49, %v25505_v0  ;;  %v25524_v36 = vand.u32 4294901760, %v11781_v16 }
0x16e5   :  { %v11927_v49 = vsub.f32 %v25503_v53, %v26330_v34  ;;  %v25556_v53 = vsub.f32 %v11783_v61, %v25540_v44 }
0x16e6   :  { %21719 = vmatpush3.bf16.msra.mxu1 %v25464_v13  ;;  %26613 = vst [vmem:[#allocation50_spill] sm:$0xff] %v25508_v19  ;;  %v25510_v13 = vand.u32 4294901760, %v11780_v40  ;;  %v26337_v0 = vand.u32 4294901760, %v25522_v31  ;;  %v25538_v6 = vsub.f32 %v11781_v16, %v25524_v36 }
0x16e7   :  { %21721 = vmatprep.subr.bf16.mxu1 %v25484_v30  ;;  %v11928_v34 = vand.u32 4294901760, %v11927_v49  ;;  %v26346_v61 = vand.u32 4294901760, %v25556_v53 }
0x16e8   :  { %26614 = vst [vmem:[#allocation55_spill] sm:$0xff] %v25510_v13  ;;  %v11947_v16 = vsub.f32 %v25522_v31, %v26337_v0 }
0x16ea   :  { %21723 = vmatpush3.bf16.msra.mxu1 %v25484_v30  ;;  %v25528_v30 = vsub.f32 %v11780_v40, %v25510_v13  ;;  %v26617_v40 = vand.u32 4294901760, %v25508_v19 }
0x16eb   :  { %21725 = vmatprep.subr.bf16.mxu1 %v25500_v51 }
0x16ec   :  { %v11937_v13 = vsub.f32 %v25508_v19, %v26617_v40  ;;  %v26338_v55 = vand.u32 4294901760, %v25528_v30  ;;  %v26349_v19 = vand.u32 4294901760, %v25547_v46 }
0x16ee   :  { %21727 = vmatpush3.bf16.msra.mxu1 %v25500_v51  ;;  %v26339_v51 = vand.u32 4294901760, %v25538_v6  ;;  %v11938_v40 = vand.u32 4294901760, %v11937_v13  ;;  %v11957_v15 = vsub.f32 %v25528_v30, %v26338_v55  ;;  %v11977_v13 = vsub.f32 %v25547_v46, %v26349_v19  ;;  %v26670_v19 = vld [vmem:[#allocation43_spill] sm:$0xff] }
0x16f0   :  { %v11967_v49 = vsub.f32 %v25538_v6, %v26339_v51  ;;  %v11958_v0 = vand.u32 4294901760, %v11957_v15 }
0x16f1   :  { %18897 = vmatmul.mubr.f32.vlgmr.msra.gmra.mrb[16].mxu1 %v11908_v24  ;;  %v25563_v24 = vsub.f32 %v11784_v32, %v25549_v57 }
0x16f2   :  { %18899 = vmatprep.mubr.f32.mxu1 %v11918_v33  ;;  %v11948_v33 = vand.u32 4294901760, %v11947_v16  ;;  %v11968_v32 = vand.u32 4294901760, %v11967_v49  ;;  %v11978_v16 = vand.u32 4294901760, %v11977_v13 }
0x16f3   :  { %v26340_v55 = vand.u32 4294901760, %v25563_v24 }
0x16f5   :  { %18900 = vmatmul.mubr.f32.gmra.mrb[18].mxu1 %v11928_v34  ;;  %v11987_v34 = vsub.f32 %v25556_v53, %v26346_v61  ;;  %v26667_v61 = vld [vmem:[#allocation62_spill] sm:$0xff] }
0x16f6   :  { %18902 = vmatprep.mubr.f32.mxu1 %v11938_v40  ;;  %v11997_v40 = vsub.f32 %v25563_v24, %v26340_v55 }
0x16f7   :  { %v11988_v15 = vand.u32 4294901760, %v11987_v34 }
0x16f8   :  { %v11998_v51 = vand.u32 4294901760, %v11997_v40 }
0x16f9   :  { %18903 = vmatmul.mubr.f32.gmra.mrb[20].mxu1 %v11948_v33 }
0x16fa   :  { %18905 = vmatprep.mubr.f32.mxu1 %v11958_v0 }
0x16fd   :  { %18906 = vmatmul.mubr.f32.gmra.mrb[22].mxu1 %v11968_v32 }
0x16fe   :  { %18908 = vmatprep.mubr.f32.mxu1 %v11978_v16 }
0x1701   :  { %18909 = vmatmul.mubr.f32.gmra.mrb[24].mxu1 %v11988_v15 }
0x1702   :  { %18911 = vmatprep.mubr.f32.mxu1 %v11998_v51 }
0x1705   :  { %18912 = vmatmul.mubr.f32.gmra.mrb[26].mxu1 %v25017_v23 }
0x1706   :  { %18914 = vmatprep.mubr.f32.mxu1 %v25144_v41 }
0x1709   :  { %18915 = vmatmul.mubr.f32.gmra.mrb[28].mxu1 %v25271_v17  ;;  %v26629_v17 = vld [vmem:[#allocation28_spill] sm:$0xff] }
0x17a4   :  { %v11122_v0 = vpop.f32.mrb[14].mxu1 }
0x17a5   :  { %v11126_v33 = vadd.f32 %v23744_v48, %v11122_v0  ;;  %v18653_v49 = vpop.f32.mrb[15].mxu1 }
0x17a6   :  { %v26631_v49 = vld [vmem:[#allocation29_spill] sm:$0xff] }
0x17a7   :  { %22280 = vtanh.f32 %v11126_v33 }
0x17b1   :  { %v22281_v13 = vpop.eup %22280 }
0x17b2   :  { %11128 = vst [vmem:[#allocation13 + $0x70] sm:$0xff] %v22281_v13  ;;  %v25583_v55 = vand.u32 4294901760, %v22281_v13 }
0x17b4   :  { %v25586_v32 = vsub.f32 %v22281_v13, %v25583_v55  ;;  %v26632_v13 = vand.u32 4294901760, %v26631_v49 }
0x17b6   :  { %v25589_v51 = vand.u32 4294901760, %v25586_v32 }
0x17b8   :  { %v11214_v23 = vsub.f32 %v25586_v32, %v25589_v51 }
0x17ba   :  { %v11215_v41 = vand.u32 4294901760, %v11214_v23  ;;  %v25762_v23 = vsub.f32 %v26631_v49, %v26632_v13 }
0x17bc   :  { %18687 = vmatmul.mubr.f32.vlgmr.msra.gmra.mrb[30].mxu0 %v11215_v41  ;;  %18917 = vmatprep.mubr.f32.mxu1 %v11215_v41  ;;  %v26633_v41 = vld [vmem:[#allocation59_spill] sm:$0xff] }
0x17bd   :  { %21578 = vmatpush3.bf16.msra.mxu0 %v26556_v52  ;;  %18721 = vmatprep.mubr.msk.f32.mxu0 %vm22456_vm0, %v26417_v4 }
0x17be   :  { %21579 = vmatprep.subr.bf16.mxu0 %v26380_v38 }
0x17c1   :  { %21581 = vmatpush3.bf16.msra.mxu0 %v26558_v10  ;;  %v26623_v10 = vld [vmem:[#allocation26_spill] sm:$0xff] }
0x17c2   :  { %21582 = vmatprep.subr.bf16.mxu0 %v26380_v38 }
0x17c5   :  { %21584 = vmatpush3.bf16.msra.mxu0 %v26559_v62  ;;  %v26624_v62 = vand.u32 4294901760, %v26623_v10 }
0x17c6   :  { %21585 = vmatprep.subr.bf16.mxu0 %v26380_v38 }
0x17c9   :  { %21587 = vmatpush3.bf16.msra.mxu0 %v26560_v5  ;;  %v25726_v5 = vsub.f32 %v26623_v10, %v26624_v62  ;;  %v26637_v62 = vld [vmem:[#allocation31_spill] sm:$0xff] }
0x17ca   :  { %21588 = vmatprep.subr.bf16.mxu0 %v26380_v38 }
0x17cd   :  { %21590 = vmatpush3.bf16.msra.mxu0 %v26561_v2  ;;  %v26625_v2 = vld [vmem:[#allocation54_spill] sm:$0xff] }
0x17ce   :  { %21591 = vmatprep.subr.bf16.mxu0 %v26380_v38 }
0x17d1   :  { %21593 = vmatpush3.bf16.msra.mxu0 %v26562_v28  ;;  %v26626_v28 = vand.u32 4294901760, %v26625_v2 }
0x17d2   :  { %21594 = vmatprep.subr.bf16.mxu0 %v26380_v38 }
0x17d5   :  { %21596 = vmatpush3.bf16.msra.mxu0 %v26563_v39  ;;  %v25731_v39 = vsub.f32 %v26625_v2, %v26626_v28  ;;  %v26638_v2 = vand.u32 4294901760, %v26637_v62 }
0x17d6   :  { %21597 = vmatprep.subr.bf16.mxu0 %v26380_v38 }
0x17d7   :  { %v25785_v28 = vsub.f32 %v26637_v62, %v26638_v2 }
0x17d9   :  { %21599 = vmatpush3.bf16.msra.mxu0 %v26564_v12 }
0x17da   :  { %21600 = vmatprep.subr.bf16.mxu0 %v26380_v38 }
0x17dc   :  { %18722 = vmatmul.mubr.f32.vlgmr.msra.gmra.mrb[30].mxu0 %v25583_v55 }
0x17dd   :  { %21602 = vmatpush3.bf16.msra.mxu0 %v26565_v18  ;;  %18756 = vmatprep.mubr.msk.f32.mxu0 %vm22456_vm0, %v26417_v4 }
0x17de   :  { %21603 = vmatprep.subr.bf16.mxu0 %v26380_v38 }
0x17e1   :  { %21605 = vmatpush3.bf16.msra.mxu0 %v26566_v7  ;;  %v12085_v7 = vand.u32 4294901760, %v25726_v5 }
0x17e2   :  { %21606 = vmatprep.subr.bf16.mxu0 %v26380_v38 }
0x17e5   :  { %21608 = vmatpush3.bf16.msra.mxu0 %v26567_v35  ;;  %v12092_v35 = vand.u32 4294901760, %v25731_v39 }
0x17e6   :  { %21609 = vmatprep.subr.bf16.mxu0 %v26380_v38 }
0x17e9   :  { %21611 = vmatpush3.bf16.msra.mxu0 %v26568_v8 }
0x17ea   :  { %21612 = vmatprep.subr.bf16.mxu0 %v26380_v38 }
0x17ed   :  { %21614 = vmatpush3.bf16.msra.mxu0 %v26569_v1  ;;  %v12086_v1 = vsub.f32 %v25726_v5, %v12085_v7 }
0x17ee   :  { %21615 = vmatprep.subr.bf16.mxu0 %v26380_v38 }
0x17ef   :  { %v12087_v34 = vand.u32 4294901760, %v12086_v1  ;;  %v26347_v1 = vand.u32 4294901760, %v25785_v28 }
0x17f1   :  { %21617 = vmatpush3.bf16.msra.mxu0 %v26570_v45  ;;  %v26627_v45 = vld [vmem:[#allocation56_spill] sm:$0xff] }
0x17f2   :  { %21618 = vmatprep.subr.bf16.mxu0 %v26380_v38 }
0x17f5   :  { %21620 = vmatpush3.bf16.msra.mxu0 %v26571_v50  ;;  %v26628_v50 = vand.u32 4294901760, %v26627_v45 }
0x17f6   :  { %21621 = vmatprep.subr.bf16.mxu0 %v26380_v38 }
0x17f9   :  { %21623 = vmatpush3.bf16.msra.mxu0 %v26572_v42  ;;  %v25741_v42 = vsub.f32 %v26627_v45, %v26628_v50 }
0x17fa   :  { %21624 = vmatprep.subr.bf16.mxu0 %v26380_v38 }
0x17fb   :  { %v26353_v16 = vand.u32 4294901760, %v25741_v42 }
0x17fc   :  { %18757 = vmatmul.mubr.f32.vlgmr.msra.gmra.mrb[30].mxu0 %v25586_v32 }
0x17fd   :  { %21626 = vmatpush3.bf16.msra.mxu0 %v26502_v14  ;;  %18791 = vmatprep.mubr.msk.f32.mxu0 %vm22456_vm0, %v26417_v4  ;;  %v12100_v0 = vsub.f32 %v25741_v42, %v26353_v16 }
0x17fe   :  { %21627 = vmatprep.subr.bf16.mxu0 %v26380_v38 }
0x1801   :  { %21629 = vmatpush3.bf16.msra.mxu0 %v26506_v58 }
0x1802   :  { %21630 = vmatprep.subr.bf16.mxu0 %v26380_v38 }
0x1805   :  { %21632 = vmatpush3.bf16.msra.mxu0 %v26510_v11 }
0x1806   :  { %21633 = vmatprep.subr.bf16.mxu0 %v26380_v38 }
0x1809   :  { %21635 = vmatpush3.bf16.msra.mxu0 %v26514_v21 }
0x180a   :  { %21636 = vmatprep.subr.bf16.mxu0 %v26380_v38 }
0x180d   :  { %21638 = vmatpush3.bf16.msra.mxu0 %v26518_v22 }
0x180e   :  { %21639 = vmatprep.subr.bf16.mxu0 %v26380_v38 }
0x1811   :  { %21641 = vmatpush3.bf16.msra.mxu0 %v26522_v29 }
0x1812   :  { %21642 = vmatprep.subr.bf16.mxu0 %v26380_v38 }
0x1815   :  { %21644 = vmatpush3.bf16.msra.mxu0 %v26526_v26 }
0x1816   :  { %21645 = vmatprep.subr.bf16.mxu0 %v26380_v38 }
0x1819   :  { %21647 = vmatpush3.bf16.msra.mxu0 %v26555_v37 }
0x181a   :  { %21648 = vmatprep.subr.bf16.mxu0 %v26380_v38 }
0x181c   :  { %18792 = vmatmul.mubr.f32.vlgmr.msra.gmra.mrb[30].mxu0 %v25589_v51 }
0x181d   :  { %21650 = vmatpush3.bf16.msra.mxu0 %v23323_v9  ;;  %18826 = vmatprep.mubr.msk.f32.mxu0 %vm22456_vm0, %v26417_v4 }
0x181e   :  { %21651 = vmatprep.subr.bf16.mxu0 %v26380_v38 }
0x1821   :  { %21653 = vmatpush3.bf16.msra.mxu0 %v23335_v43  ;;  %v26619_v43 = vand.u32 4294901760, %v25366_v47 }
0x1822   :  { %21654 = vmatprep.subr.bf16.mxu0 %v26380_v38 }
0x1825   :  { %21656 = vmatpush3.bf16.msra.mxu0 %v23348_v63  ;;  %v25695_v63 = vsub.f32 %v25366_v47, %v26619_v43 }
0x1826   :  { %21657 = vmatprep.subr.bf16.mxu0 %v26380_v38 }
0x1829   :  { %21659 = vmatpush3.bf16.msra.mxu0 %v23360_v54 }
0x182a   :  { %21660 = vmatprep.subr.bf16.mxu0 %v26380_v38 }
0x182d   :  { %21662 = vmatpush3.bf16.msra.mxu0 %v26543_v25 }
0x182e   :  { %21663 = vmatprep.subr.bf16.mxu0 %v26380_v38 }
0x1831   :  { %21665 = vmatpush3.bf16.msra.mxu0 %v23386_v3  ;;  %v12064_v3 = vand.u32 4294901760, %v25695_v63 }
0x1832   :  { %21666 = vmatprep.subr.bf16.mxu0 %v26380_v38 }
0x1835   :  { %21668 = vmatpush3.bf16.msra.mxu0 %v23398_v56  ;;  %v12065_v56 = vsub.f32 %v25695_v63, %v12064_v3 }
0x1836   :  { %21669 = vmatprep.subr.bf16.mxu0 %v26380_v38 }
0x1839   :  { %21671 = vmatpush3.bf16.msra.mxu0 %v23407_v27  ;;  %v26620_v27 = vand.u32 4294901760, %v25376_v59 }
0x183a   :  { %21672 = vmatprep.subr.bf16.mxu0 %v26380_v38 }
0x183c   :  { %18827 = vmatmul.mubr.f32.vlgmr.msra.gmra.mrb[30].mxu0 %v25583_v55 }
0x183d   :  { %21674 = vmatpush3.bf16.msra.mxu0 %v26502_v14  ;;  %18861 = vmatprep.mubr.msk.f32.mxu0 %vm22456_vm0, %v26417_v4  ;;  %v26618_v4 = vand.u32 4294901760, %v25364_v60  ;;  %v26621_v14 = vld [vmem:[#allocation25_spill] sm:$0xff] }
0x183e   :  { %21675 = vmatprep.subr.bf16.mxu0 %v26380_v38 }
0x183f   :  { %v25690_v9 = vsub.f32 %v25364_v60, %v26618_v4  ;;  %v26630_v60 = vand.u32 4294901760, %v26629_v17  ;;  %v26634_v4 = vand.u32 4294901760, %v26633_v41 }
0x1841   :  { %21677 = vmatpush3.bf16.msra.mxu0 %v26506_v58  ;;  %v12057_v54 = vand.u32 4294901760, %v25690_v9  ;;  %v26622_v58 = vand.u32 4294901760, %v26621_v14  ;;  %v25746_v47 = vsub.f32 %v26629_v17, %v26630_v60  ;;  %v25767_v43 = vsub.f32 %v26633_v41, %v26634_v4  ;;  %v26639_v17 = vld [vmem:[#allocation32_spill] sm:$0xff] }
0x1842   :  { %21678 = vmatprep.subr.bf16.mxu0 %v26380_v38  ;;  %v26640_v60 = vand.u32 4294901760, %v26639_v17 }
0x1843   :  { %v26352_v40 = vand.u32 4294901760, %v25746_v47  ;;  %v21824_v16 = vpack.c.bf16 %v12064_v3, %v12057_v54 }
0x1845   :  { %21680 = vmatpush3.bf16.msra.mxu0 %v26510_v11  ;;  %v25713_v11 = vsub.f32 %v26621_v14, %v26622_v58  ;;  %v12107_v33 = vsub.f32 %v25746_v47, %v26352_v40  ;;  %v26351_v14 = vand.u32 4294901760, %v25762_v23  ;;  %v26350_v58 = vand.u32 4294901760, %v25767_v43  ;;  %v26673_v40 = vld [vmem:[#allocation67_spill] sm:$0xff] }
0x1846   :  { %21681 = vmatprep.subr.bf16.mxu0 %v26380_v38 }
0x1847   :  { %v12078_v25 = vand.u32 4294901760, %v25713_v11 }
0x1849   :  { %21683 = vmatpush3.bf16.msra.mxu0 %v26514_v21  ;;  %v12079_v48 = vsub.f32 %v25713_v11, %v12078_v25 }
0x184a   :  { %21684 = vmatprep.subr.bf16.mxu0 %v26380_v38 }
0x184b   :  { %v12080_v18 = vand.u32 4294901760, %v12079_v48 }
0x184d   :  { %21686 = vmatpush3.bf16.msra.mxu0 %v26518_v22  ;;  %v12066_v22 = vand.u32 4294901760, %v12065_v56  ;;  %v12101_v56 = vand.u32 4294901760, %v12100_v0 }
0x184e   :  { %21687 = vmatprep.subr.bf16.mxu0 %v26380_v38 }
0x1851   :  { %21689 = vmatpush3.bf16.msra.mxu0 %v26522_v29 }
0x1852   :  { %21690 = vmatprep.subr.bf16.mxu0 %v26380_v38 }
0x1855   :  { %21692 = vmatpush3.bf16.msra.mxu0 %v26526_v26  ;;  %v25708_v26 = vsub.f32 %v25376_v59, %v26620_v27  ;;  %v12093_v59 = vsub.f32 %v25731_v39, %v12092_v35  ;;  %v12108_v27 = vand.u32 4294901760, %v12107_v33  ;;  %v12135_v33 = vsub.f32 %v25785_v28, %v26347_v1  ;;  %v26668_v1 = vld [vmem:[#allocation35_spill] sm:$0xff] }
0x1856   :  { %21693 = vmatprep.subr.bf16.mxu0 %v26380_v38  ;;  %v12058_v38 = vsub.f32 %v25690_v9, %v12057_v54 }
0x1857   :  { %v12071_v29 = vand.u32 4294901760, %v25708_v26  ;;  %v12094_v15 = vand.u32 4294901760, %v12093_v59  ;;  %v25795_v59 = vsub.f32 %v26639_v17, %v26640_v60  ;;  %v12136_v4 = vand.u32 4294901760, %v12135_v33 }
0x1858   :  { %v12059_v21 = vand.u32 4294901760, %v12058_v38 }
0x1859   :  { %21695 = vmatpush3.bf16.msra.mxu0 %v26555_v37  ;;  %v12072_v52 = vsub.f32 %v25708_v26, %v12071_v29  ;;  %v21736_v38 = vpack.c.bf16 %v12094_v15, %v12087_v34  ;;  %v26641_v34 = vld [vmem:[#allocation63_spill] sm:$0xff]  ;;  %v26345_v13 = vand.u32 4294901760, %v25795_v59 }
0x185a   :  { %v21728_v37 = vpack.c.bf16 %v12066_v22, %v12059_v21  ;;  %v21740_v21 = vpack.c.bf16 %v12108_v27, %v12101_v56  ;;  %v12114_v22 = vsub.f32 %v25762_v23, %v26351_v14  ;;  %v26642_v15 = vand.u32 4294901760, %v26641_v34  ;;  %v26643_v27 = vld [vmem:[#allocation68_spill] sm:$0xff]  ;;  %v26672_v14 = vld [vmem:[#allocation23_spill] sm:$0xff] }
0x185b   :  { %v12073_v12 = vand.u32 4294901760, %v12072_v52  ;;  %v26635_v52 = vld [vmem:[#allocation60_spill] sm:$0xff] }
0x185c   :  { %18862 = vmatmul.mubr.f32.vlgmr.msra.gmra.mrb[30].mxu0 %v25583_v55  ;;  %21729 = vmatprep.subr.bf16.mxu1 %v21728_v37  ;;  %v26636_v48 = vand.u32 4294901760, %v26635_v52  ;;  %v25800_v0 = vsub.f32 %v26641_v34, %v26642_v15 }
0x185d   :  { %21731 = vmatpush3.bf16.msra.mxu1 %v21728_v37  ;;  %v21732_v8 = vpack.c.bf16 %v12080_v18, %v12073_v12  ;;  %v12121_v37 = vsub.f32 %v25767_v43, %v26350_v58  ;;  %v12115_v12 = vand.u32 4294901760, %v12114_v22  ;;  %v26671_v58 = vld [vmem:[#allocation36_spill] sm:$0xff] }
0x185e   :  { %v25780_v10 = vsub.f32 %v26635_v52, %v26636_v48  ;;  %v26343_v41 = vand.u32 4294901760, %v25800_v0 }
0x185f   :  { %21733 = vmatprep.subr.bf16.mxu1 %v21732_v8  ;;  %v12122_v18 = vand.u32 4294901760, %v12121_v37  ;;  %v26645_v37 = vld [vmem:[#allocation72_spill] sm:$0xff] }
0x1860   :  { %v12149_v56 = vsub.f32 %v25800_v0, %v26343_v41  ;;  %v26646_v52 = vand.u32 4294901760, %v26645_v37  ;;  %v26654_v41 = vld [vmem:[#allocation55_spill] sm:$0xff] }
0x1861   :  { %21735 = vmatpush3.bf16.msra.mxu1 %v21732_v8  ;;  %v26348_v8 = vand.u32 4294901760, %v25780_v10  ;;  %v21744_v45 = vpack.c.bf16 %v12122_v18, %v12115_v12 }
0x1862   :  { %21737 = vmatprep.subr.bf16.mxu1 %v21736_v38  ;;  %v25821_v48 = vsub.f32 %v26645_v37, %v26646_v52  ;;  %v12150_v12 = vand.u32 4294901760, %v12149_v56  ;;  %v21772_v56 = vpack.c.bf16 %v25746_v47, %v25741_v42  ;;  %v21784_v37 = vpack.c.bf16 %v25800_v0, %v25795_v59 }
0x1863   :  { %v12128_v50 = vsub.f32 %v25780_v10, %v26348_v8  ;;  %v26669_v8 = vld [vmem:[#allocation40_spill] sm:$0xff] }
0x1865   :  { %21739 = vmatpush3.bf16.msra.mxu1 %v21736_v38  ;;  %v12129_v49 = vand.u32 4294901760, %v12128_v50  ;;  %v12142_v38 = vsub.f32 %v25795_v59, %v26345_v13  ;;  %v26664_v13 = vld [vmem:[#allocation50_spill] sm:$0xff] }
0x1866   :  { %21741 = vmatprep.subr.bf16.mxu1 %v21740_v21  ;;  %v26678_v3 = vand.u32 4294901760, %v26664_v13 }
0x1867   :  { %v21748_v62 = vpack.c.bf16 %v12136_v4, %v12129_v49  ;;  %v12143_v2 = vand.u32 4294901760, %v12142_v38  ;;  %v21760_v49 = vpack.c.bf16 %v25695_v63, %v25690_v9  ;;  %v21764_v4 = vpack.c.bf16 %v25713_v11, %v25708_v26 }
0x1868   :  { %v21768_v38 = vpack.c.bf16 %v25731_v39, %v25726_v5  ;;  %v21832_v63 = vpack.c.bf16 %v12092_v35, %v12085_v7  ;;  %v26679_v26 = vand.u32 4294901760, %v25741_v42  ;;  %v26680_v11 = vand.u32 4294901760, %v25746_v47 }
0x1869   :  { %21743 = vmatpush3.bf16.msra.mxu1 %v21740_v21  ;;  %v26644_v21 = vand.u32 4294901760, %v26643_v27  ;;  %v21752_v50 = vpack.c.bf16 %v12150_v12, %v12143_v2  ;;  %v26647_v2 = vld [vmem:[#allocation38_spill] sm:$0xff]  ;;  %v26682_v5 = vand.u32 4294901760, %v25528_v30  ;;  %v26683_v39 = vand.u32 4294901760, %v25762_v23 }
0x186a   :  { %21745 = vmatprep.subr.bf16.mxu1 %v21744_v45  ;;  %v26684_v7 = vand.u32 4294901760, %v25767_v43  ;;  %v26686_v42 = vand.u32 4294901760, %v25547_v46 }
0x186b   :  { %v25816_v22 = vsub.f32 %v26643_v27, %v26644_v21  ;;  %v21776_v27 = vpack.c.bf16 %v25767_v43, %v25762_v23  ;;  %v21780_v21 = vpack.c.bf16 %v25785_v28, %v25780_v10  ;;  %v26690_v23 = vand.u32 4294901760, %v25563_v24 }
0x186c   :  { %v21840_v35 = vpack.c.bf16 %v26684_v7, %v26683_v39 }
0x186d   :  { %21747 = vmatpush3.bf16.msra.mxu1 %v21744_v45  ;;  %v26342_v18 = vand.u32 4294901760, %v25816_v22  ;;  %v26341_v45 = vand.u32 4294901760, %v25821_v48  ;;  %v21788_v52 = vpack.c.bf16 %v25821_v48, %v25816_v22 }
0x186e   :  { %21749 = vmatprep.subr.bf16.mxu1 %v21748_v62 }
0x186f   :  { %v12156_v17 = vsub.f32 %v25816_v22, %v26342_v18  ;;  %v12163_v60 = vsub.f32 %v25821_v48, %v26341_v45  ;;  %v26648_v18 = vld [vmem:[#allocation24_spill] sm:$0xff] }
0x1871   :  { %21751 = vmatpush3.bf16.msra.mxu1 %v21748_v62  ;;  %v12157_v34 = vand.u32 4294901760, %v12156_v17  ;;  %v12164_v15 = vand.u32 4294901760, %v12163_v60 }
0x1872   :  { %21753 = vmatprep.subr.bf16.mxu1 %v21752_v50 }
0x1873   :  { %v21756_v33 = vpack.c.bf16 %v12164_v15, %v12157_v34 }
0x1875   :  { %21755 = vmatpush3.bf16.msra.mxu1 %v21752_v50 }
0x1876   :  { %21757 = vmatprep.subr.bf16.mxu1 %v21756_v33 }
0x1879   :  { %21759 = vmatpush3.bf16.msra.mxu1 %v21756_v33 }
0x187a   :  { %21761 = vmatprep.subr.bf16.mxu1 %v21760_v49 }
0x192f   :  { %v11767_v62 = vpop.f32.mrb[30].mxu0 }
0x1930   :  { %v11771_v12 = vadd.f32 %v26647_v2, %v11767_v62  ;;  %v18863_v50 = vpop.f32.mrb[31].mxu0  ;;  %v26649_v62 = vld [vmem:[#allocation34_spill] sm:$0xff] }
0x1931   :  { %v26650_v2 = vld [vmem:[#allocation66_spill] sm:$0xff]  ;;  %v26652_v50 = vld [vmem:[#allocation65_spill] sm:$0xff] }
0x1932   :  { %22282 = vtanh.f32 %v11771_v12  ;;  %v26651_v12 = vld [vmem:[#allocation39_spill] sm:$0xff] }
0x193c   :  { %v22283_v17 = vpop.eup %22282 }
0x193d   :  { %11773 = vst [vmem:[#allocation13 + $0x78] sm:$0xff] %v22283_v17  ;;  %v25848_v60 = vand.u32 4294901760, %v22283_v17 }
0x193f   :  { %v25851_v34 = vsub.f32 %v22283_v17, %v25848_v60  ;;  %v26653_v17 = vld [vmem:[#allocation44_spill] sm:$0xff] }
0x1941   :  { %v26344_v15 = vand.u32 4294901760, %v25851_v34 }
0x1943   :  { %v12047_v33 = vsub.f32 %v25851_v34, %v26344_v15  ;;  %v26663_v15 = vld [vmem:[#allocation37_spill] sm:$0xff] }
0x1944   :  { %v26677_v54 = vand.u32 4294901760, %v26663_v15 }
0x1945   :  { %v12048_v45 = vand.u32 4294901760, %v12047_v33  ;;  %v26661_v33 = vld [vmem:[#allocation33_spill] sm:$0xff] }
0x1946   :  { %v26676_v9 = vand.u32 4294901760, %v26661_v33 }
0x1947   :  { %18918 = vmatmul.mubr.f32.gmra.mrb[30].mxu1 %v12048_v45  ;;  %v26655_v45 = vld [vmem:[#allocation20_spill] sm:$0xff] }
0x1948   :  { %18952 = vmatprep.mubr.f32.mxu1 %v26648_v18 }
0x194b   :  { %18953 = vmatmul.mubr.f32.vlgmr.msra.gmra.mrb[16].mxu1 %v26649_v62 }
0x194c   :  { %18955 = vmatprep.mubr.f32.mxu1 %v26650_v2  ;;  %21763 = vmatpush3.bf16.msra.mxu1 %v21760_v49  ;;  %v26656_v49 = vld [vmem:[#allocation21_spill] sm:$0xff] }
0x194d   :  { %21765 = vmatprep.subr.bf16.mxu1 %v21764_v4 }
0x194f   :  { %18956 = vmatmul.mubr.f32.gmra.mrb[18].mxu1 %v26651_v12 }
0x1950   :  { %18958 = vmatprep.mubr.f32.mxu1 %v26652_v50  ;;  %21767 = vmatpush3.bf16.msra.mxu1 %v21764_v4  ;;  %v26657_v4 = vld [vmem:[#allocation45_spill] sm:$0xff] }
0x1951   :  { %21769 = vmatprep.subr.bf16.mxu1 %v21768_v38 }
0x1953   :  { %18959 = vmatmul.mubr.f32.gmra.mrb[20].mxu1 %v26653_v17 }
0x1954   :  { %18961 = vmatprep.mubr.f32.mxu1 %v26654_v41  ;;  %21771 = vmatpush3.bf16.msra.mxu1 %v21768_v38  ;;  %v26658_v38 = vld [vmem:[#allocation49_spill] sm:$0xff] }
0x1955   :  { %21773 = vmatprep.subr.bf16.mxu1 %v21772_v56 }
0x1957   :  { %18962 = vmatmul.mubr.f32.gmra.mrb[22].mxu1 %v25524_v36 }
0x1958   :  { %18964 = vmatprep.mubr.f32.mxu1 %v25530_v20  ;;  %21775 = vmatpush3.bf16.msra.mxu1 %v21772_v56  ;;  %v26659_v56 = vld [vmem:[#allocation53_spill] sm:$0xff] }
0x1959   :  { %21777 = vmatprep.subr.bf16.mxu1 %v21776_v27 }
0x195b   :  { %18965 = vmatmul.mubr.f32.gmra.mrb[24].mxu1 %v25540_v44 }
0x195c   :  { %18967 = vmatprep.mubr.f32.mxu1 %v25549_v57  ;;  %21779 = vmatpush3.bf16.msra.mxu1 %v21776_v27  ;;  %v26660_v27 = vld [vmem:[#allocation73_spill] sm:$0xff] }
0x195d   :  { %21781 = vmatprep.subr.bf16.mxu1 %v21780_v21 }
0x195f   :  { %18968 = vmatmul.mubr.f32.gmra.mrb[26].mxu1 %v26655_v45 }
0x1960   :  { %18970 = vmatprep.mubr.f32.mxu1 %v26656_v49  ;;  %21783 = vmatpush3.bf16.msra.mxu1 %v21780_v21  ;;  %v26662_v21 = vld [vmem:[#allocation27_spill] sm:$0xff] }
0x1961   :  { %21785 = vmatprep.subr.bf16.mxu1 %v21784_v37 }
0x1963   :  { %18971 = vmatmul.mubr.f32.gmra.mrb[28].mxu1 %v26657_v4 }
0x1964   :  { %18973 = vmatprep.mubr.f32.mxu1 %v25583_v55  ;;  %21787 = vmatpush3.bf16.msra.mxu1 %v21784_v37  ;;  %v26665_v37 = vld [vmem:[#allocation57_spill] sm:$0xff] }
0x1965   :  { %21789 = vmatprep.subr.bf16.mxu1 %v21788_v52 }
0x1967   :  { %18974 = vmatmul.mubr.f32.gmra.mrb[30].mxu1 %v25848_v60 }
0x1968   :  { %21791 = vmatpush3.bf16.msra.mxu1 %v21788_v52  ;;  %19008 = vmatprep.mubr.f32.mxu1 %v26658_v38  ;;  %v26666_v52 = vld [vmem:[#allocation30_spill] sm:$0xff] }
0x1969   :  { %21793 = vmatprep.subr.bf16.mxu1 %v26659_v56 }
0x196b   :  { %19009 = vmatmul.mubr.f32.vlgmr.msra.gmra.mrb[16].mxu1 %v26660_v27 }
0x196c   :  { %19011 = vmatprep.mubr.f32.mxu1 %v26661_v33  ;;  %21795 = vmatpush3.bf16.msra.mxu1 %v26659_v56 }
0x196d   :  { %21797 = vmatprep.subr.bf16.mxu1 %v26662_v21 }
0x196f   :  { %19012 = vmatmul.mubr.f32.gmra.mrb[18].mxu1 %v26663_v15  ;;  %v26694_v15 = vld [vmem:[#allocation22_spill] sm:$0xff] }
0x1970   :  { %19014 = vmatprep.mubr.f32.mxu1 %v26664_v13  ;;  %21799 = vmatpush3.bf16.msra.mxu1 %v26662_v21  ;;  %v26693_v13 = vld [vmem:[#allocation41_spill] sm:$0xff] }
0x1971   :  { %21801 = vmatprep.subr.bf16.mxu1 %v26665_v37 }
0x1973   :  { %19015 = vmatmul.mubr.f32.gmra.mrb[20].mxu1 %v25522_v31 }
0x1974   :  { %19017 = vmatprep.mubr.f32.mxu1 %v25528_v30  ;;  %21803 = vmatpush3.bf16.msra.mxu1 %v26665_v37  ;;  %v26688_v30 = vand.u32 4294901760, %v25785_v28 }
0x1975   :  { %21805 = vmatprep.subr.bf16.mxu1 %v26666_v52 }
0x1977   :  { %19018 = vmatmul.mubr.f32.gmra.mrb[22].mxu1 %v25538_v6 }
0x1978   :  { %19020 = vmatprep.mubr.f32.mxu1 %v25547_v46  ;;  %21807 = vmatpush3.bf16.msra.mxu1 %v26666_v52  ;;  %v26692_v46 = vand.u32 4294901760, %v25800_v0 }
0x1979   :  { %21809 = vmatprep.subr.bf16.mxu1 %v26667_v61 }
0x197b   :  { %19021 = vmatmul.mubr.f32.gmra.mrb[24].mxu1 %v25556_v53 }
0x197c   :  { %19023 = vmatprep.mubr.f32.mxu1 %v25563_v24  ;;  %21811 = vmatpush3.bf16.msra.mxu1 %v26667_v61  ;;  %v26697_v24 = vld [vmem:[#allocation47_spill] sm:$0xff] }
0x197d   :  { %21813 = vmatprep.subr.bf16.mxu1 %v26668_v1 }
0x197f   :  { %19024 = vmatmul.mubr.f32.gmra.mrb[26].mxu1 %v26669_v8  ;;  %v26689_v8 = vand.u32 4294901760, %v25556_v53  ;;  %v26696_v53 = vand.u32 4294901760, %v25821_v48 }
0x1980   :  { %19026 = vmatprep.mubr.f32.mxu1 %v26670_v19  ;;  %21815 = vmatpush3.bf16.msra.mxu1 %v26668_v1  ;;  %v26674_v19 = vand.u32 4294901760, %v26658_v38 }
0x1981   :  { %21817 = vmatprep.subr.bf16.mxu1 %v26671_v58 }
0x1983   :  { %19027 = vmatmul.mubr.f32.gmra.mrb[28].mxu1 %v26672_v14  ;;  %v26675_v14 = vand.u32 4294901760, %v26660_v27 }
0x1984   :  { %19029 = vmatprep.mubr.f32.mxu1 %v25586_v32  ;;  %21819 = vmatpush3.bf16.msra.mxu1 %v26671_v58  ;;  %v21828_v32 = vpack.c.bf16 %v12078_v25, %v12071_v29  ;;  %v21836_v29 = vpack.c.bf16 %v26680_v11, %v26679_v26  ;;  %v26681_v25 = vand.u32 4294901760, %v25522_v31  ;;  %v26687_v31 = vand.u32 4294901760, %v25780_v10 }
0x1985   :  { %21821 = vmatprep.subr.bf16.mxu1 %v26673_v40  ;;  %v26695_v10 = vand.u32 4294901760, %v25816_v22 }
0x1986   :  { %v21844_v47 = vpack.c.bf16 %v26688_v30, %v26687_v31 }
0x1987   :  { %19030 = vmatmul.mubr.f32.gmra.mrb[30].mxu1 %v25851_v34  ;;  %v21852_v28 = vpack.c.bf16 %v26696_v53, %v26695_v10 }
0x1988   :  { %21823 = vmatpush3.bf16.msra.mxu1 %v26673_v40  ;;  %19064 = vmatprep.mubr.f32.mxu1 %v26674_v19 }
0x1989   :  { %21825 = vmatprep.subr.bf16.mxu1 %v21824_v16 }
0x198b   :  { %19065 = vmatmul.mubr.f32.vlgmr.msra.gmra.mrb[16].mxu1 %v26675_v14 }
0x198c   :  { %19067 = vmatprep.mubr.f32.mxu1 %v26676_v9  ;;  %21827 = vmatpush3.bf16.msra.mxu1 %v21824_v16  ;;  %v26685_v16 = vand.u32 4294901760, %v25538_v6  ;;  %v26691_v6 = vand.u32 4294901760, %v25795_v59  ;;  %v26698_v59 = vand.u32 4294901760, %v25851_v34 }
0x198d   :  { %21829 = vmatprep.subr.bf16.mxu1 %v21828_v32 }
0x198e   :  { %v21848_v43 = vpack.c.bf16 %v26692_v46, %v26691_v6 }
0x198f   :  { %19068 = vmatmul.mubr.f32.gmra.mrb[18].mxu1 %v26677_v54 }
0x1990   :  { %19070 = vmatprep.mubr.f32.mxu1 %v26678_v3  ;;  %21831 = vmatpush3.bf16.msra.mxu1 %v21828_v32 }
0x1991   :  { %21833 = vmatprep.subr.bf16.mxu1 %v21832_v63 }
0x1993   :  { %19071 = vmatmul.mubr.f32.gmra.mrb[20].mxu1 %v26681_v25 }
0x1994   :  { %19073 = vmatprep.mubr.f32.mxu1 %v26682_v5  ;;  %21835 = vmatpush3.bf16.msra.mxu1 %v21832_v63 }
0x1995   :  { %21837 = vmatprep.subr.bf16.mxu1 %v21836_v29 }
0x1997   :  { %19074 = vmatmul.mubr.f32.gmra.mrb[22].mxu1 %v26685_v16 }
0x1998   :  { %19076 = vmatprep.mubr.f32.mxu1 %v26686_v42  ;;  %21839 = vmatpush3.bf16.msra.mxu1 %v21836_v29 }
0x1999   :  { %21841 = vmatprep.subr.bf16.mxu1 %v21840_v35 }
0x199b   :  { %19077 = vmatmul.mubr.f32.gmra.mrb[24].mxu1 %v26689_v8 }
0x199c   :  { %19079 = vmatprep.mubr.f32.mxu1 %v26690_v23  ;;  %21843 = vmatpush3.bf16.msra.mxu1 %v21840_v35 }
0x199d   :  { %21845 = vmatprep.subr.bf16.mxu1 %v21844_v47 }
0x199f   :  { %19080 = vmatmul.mubr.f32.gmra.mrb[26].mxu1 %v26693_v13 }
0x19a0   :  { %19082 = vmatprep.mubr.f32.mxu1 %v26694_v15  ;;  %21847 = vmatpush3.bf16.msra.mxu1 %v21844_v47 }
0x19a1   :  { %21849 = vmatprep.subr.bf16.mxu1 %v21848_v43 }
0x19a3   :  { %19083 = vmatmul.mubr.f32.gmra.mrb[28].mxu1 %v26697_v24 }
0x19a4   :  { %19085 = vmatprep.mubr.f32.mxu1 %v25589_v51  ;;  %21851 = vmatpush3.bf16.msra.mxu1 %v21848_v43 }
0x19a5   :  { %21853 = vmatprep.subr.bf16.mxu1 %v21852_v28 }
0x19a7   :  { %19086 = vmatmul.mubr.f32.gmra.mrb[30].mxu1 %v26698_v59 }
0x19a8   :  { %21855 = vmatpush3.bf16.msra.mxu1 %v21852_v28  ;;  %19120 = vmatprep.mubr.f32.mxu1 %v26648_v18 }
0x19a9   :  { %21857 = vmatprep.subr.bf16.mxu1 %v26659_v56 }
0x19ab   :  { %19121 = vmatmul.mubr.f32.vlgmr.msra.gmra.mrb[16].mxu1 %v26649_v62 }
0x19ac   :  { %19123 = vmatprep.mubr.f32.mxu1 %v26650_v2  ;;  %21859 = vmatpush3.bf16.msra.mxu1 %v26659_v56 }
0x19ad   :  { %21861 = vmatprep.subr.bf16.mxu1 %v26662_v21 }
0x19af   :  { %19124 = vmatmul.mubr.f32.gmra.mrb[18].mxu1 %v26651_v12 }
0x19b0   :  { %19126 = vmatprep.mubr.f32.mxu1 %v26652_v50  ;;  %21863 = vmatpush3.bf16.msra.mxu1 %v26662_v21 }
0x19b1   :  { %21865 = vmatprep.subr.bf16.mxu1 %v26665_v37 }
0x19b3   :  { %19127 = vmatmul.mubr.f32.gmra.mrb[20].mxu1 %v26653_v17 }
0x19b4   :  { %19129 = vmatprep.mubr.f32.mxu1 %v26654_v41  ;;  %21867 = vmatpush3.bf16.msra.mxu1 %v26665_v37 }
0x19b5   :  { %21869 = vmatprep.subr.bf16.mxu1 %v26666_v52 }
0x19b7   :  { %19130 = vmatmul.mubr.f32.gmra.mrb[22].mxu1 %v25524_v36 }
0x19b8   :  { %19132 = vmatprep.mubr.f32.mxu1 %v25530_v20  ;;  %21871 = vmatpush3.bf16.msra.mxu1 %v26666_v52 }
0x19b9   :  { %21873 = vmatprep.subr.bf16.mxu1 %v26667_v61 }
0x19bb   :  { %19133 = vmatmul.mubr.f32.gmra.mrb[24].mxu1 %v25540_v44 }
0x19bc   :  { %19135 = vmatprep.mubr.f32.mxu1 %v25549_v57  ;;  %21875 = vmatpush3.bf16.msra.mxu1 %v26667_v61 }
0x19bd   :  { %21877 = vmatprep.subr.bf16.mxu1 %v26668_v1 }
0x19bf   :  { %19136 = vmatmul.mubr.f32.gmra.mrb[26].mxu1 %v26655_v45 }
0x19c0   :  { %19138 = vmatprep.mubr.f32.mxu1 %v26656_v49  ;;  %21879 = vmatpush3.bf16.msra.mxu1 %v26668_v1 }
0x19c1   :  { %21881 = vmatprep.subr.bf16.mxu1 %v26671_v58 }
0x19c3   :  { %19139 = vmatmul.mubr.f32.gmra.mrb[28].mxu1 %v26657_v4 }
0x19c4   :  { %19141 = vmatprep.mubr.f32.mxu1 %v25583_v55  ;;  %21883 = vmatpush3.bf16.msra.mxu1 %v26671_v58 }
0x19c5   :  { %21885 = vmatprep.subr.bf16.mxu1 %v26673_v40 }
0x19c7   :  { %19142 = vmatmul.mubr.f32.gmra.mrb[30].mxu1 %v25848_v60 }
0x19c8   :  { %21887 = vmatpush3.bf16.msra.mxu1 %v26673_v40  ;;  %19176 = vmatprep.mubr.f32.mxu1 %v26648_v18 }
0x19cb   :  { %19177 = vmatmul.mubr.f32.vlgmr.msra.gmra.mrb[16].mxu1 %v26649_v62 }
0x19cc   :  { %19179 = vmatprep.mubr.f32.mxu1 %v26650_v2 }
0x19cf   :  { %19180 = vmatmul.mubr.f32.gmra.mrb[18].mxu1 %v26651_v12 }
0x19d0   :  { %19182 = vmatprep.mubr.f32.mxu1 %v26652_v50 }
0x19d3   :  { %19183 = vmatmul.mubr.f32.gmra.mrb[20].mxu1 %v26653_v17 }
0x19d4   :  { %19185 = vmatprep.mubr.f32.mxu1 %v26654_v41 }
0x19d7   :  { %19186 = vmatmul.mubr.f32.gmra.mrb[22].mxu1 %v25524_v36 }
0x19d8   :  { %19188 = vmatprep.mubr.f32.mxu1 %v25530_v20 }
0x19db   :  { %19189 = vmatmul.mubr.f32.gmra.mrb[24].mxu1 %v25540_v44 }
0x19dc   :  { %19191 = vmatprep.mubr.f32.mxu1 %v25549_v57 }
0x19df   :  { %19192 = vmatmul.mubr.f32.gmra.mrb[26].mxu1 %v26655_v45 }
0x19e0   :  { %19194 = vmatprep.mubr.f32.mxu1 %v26656_v49 }
0x19e3   :  { %19195 = vmatmul.mubr.f32.gmra.mrb[28].mxu1 %v26657_v4 }
0x19e4   :  { %19197 = vmatprep.mubr.f32.mxu1 %v25583_v55 }
0x19e7   :  { %19198 = vmatmul.mubr.f32.gmra.mrb[30].mxu1 %v25848_v60 }
0x19e8   :  { %22405 = shalt.err (!%p22402_p2)
}
0x19e9   :  { %s22406_s25 = scalar_lea.hbm %s26054_s8, 2048 }
0x19ea   :  { %p22407_p3 = scmp.ne.s32.totalorder %s26054_s8, %s22406_s25  ;;  %p22410_p4 = scmp.lt.u32.totalorder %s22406_s25, %s26054_s8 }
0x19ec   :  { %p22412_p5 = pnand %p22410_p4, %p22407_p3 }
0x19ee   :  { %22415 = shalt.err (!%p22412_p5)
}
0x19ef   :  { %13138 = dma.vmem_to_hbm [thread:$0]  %s13133_s21, 2048, %s26054_s8, [#allocation14], %s22451_s28, %s22451_s28, %s22452_s29  }
0x19f0   :  { %v13151_v44 = vld [vmem:[%s26052_s6] ss:$0 sm:$0xff]  ;;  %s22459_s6 = smov [#allocation12]  }
0x19f1   :  { %s13120_s8 = sshll.u32 %s22459_s6, 4  ;;  %s13121_s8 = int_to_ptr.vmem [resolvable:$true] %s13120_s8 }
0x19f2   :  { %s22416_s11 = scalar_lea.vmem %s13121_s8, 2048  ;;  %p22421_p7 = scmp.lt.s32.totalorder %s13121_s8, %s13121_s8 }
0x19f3   :  { %p22417_p6 = scmp.ne.s32.totalorder %s13121_s8, %s22416_s11  ;;  %p22422_p8 = scmp.lt.s32.totalorder %s22416_s11, %s22416_s11 }
0x19f5   :  { %p22423_p9 = por %p22422_p8, %p22421_p7 }
0x19f7   :  { %p22424_p10 = pnand %p22423_p9, %p22417_p6 }
0x1a9e   :  { %v19178_v55 = vpop.f32.mrb[16].mxu1 }
0x1a9f   :  { %v21904_v20 = vadd.f32 %v19178_v55, %v13151_v44  ;;  %v13005_v36 = vpop.f32.mrb[17].mxu1 }
0x1aa0   :  { %v21905_v57 = vadd.f32 %v13151_v44, %v13005_v36 }
0x1aa1   :  { %13100 = vst [vmem:[#allocation12 + $0x8] sm:$0xff] %v21904_v20 }
0x1aa2   :  { %13099 = vst [vmem:[#allocation12] sm:$0xff] %v21905_v57  ;;  %v19181_v61 = vpop.f32.mrb[18].mxu1 }
0x1aa3   :  { %v21906_v51 = vadd.f32 %v19181_v61, %v13151_v44  ;;  %v13017_v40 = vpop.f32.mrb[19].mxu1 }
0x1aa4   :  { %v21907_v58 = vadd.f32 %v13151_v44, %v13017_v40 }
0x1aa5   :  { %13102 = vst [vmem:[#allocation12 + $0x18] sm:$0xff] %v21906_v51 }
0x1aa6   :  { %13101 = vst [vmem:[#allocation12 + $0x10] sm:$0xff] %v21907_v58  ;;  %v19184_v1 = vpop.f32.mrb[20].mxu1 }
0x1aa7   :  { %v21908_v0 = vadd.f32 %v19184_v1, %v13151_v44  ;;  %v13029_v41 = vpop.f32.mrb[21].mxu1 }
0x1aa8   :  { %v21909_v22 = vadd.f32 %v13151_v44, %v13029_v41 }
0x1aa9   :  { %13104 = vst [vmem:[#allocation12 + $0x28] sm:$0xff] %v21908_v0 }
0x1aaa   :  { %13103 = vst [vmem:[#allocation12 + $0x20] sm:$0xff] %v21909_v22  ;;  %v19187_v48 = vpop.f32.mrb[22].mxu1 }
0x1aab   :  { %v21910_v18 = vadd.f32 %v19187_v48, %v13151_v44  ;;  %v13041_v60 = vpop.f32.mrb[23].mxu1 }
0x1aac   :  { %v21911_v34 = vadd.f32 %v13151_v44, %v13041_v60 }
0x1aad   :  { %13106 = vst [vmem:[#allocation12 + $0x38] sm:$0xff] %v21910_v18 }
0x1aae   :  { %13105 = vst [vmem:[#allocation12 + $0x30] sm:$0xff] %v21911_v34  ;;  %v19190_v62 = vpop.f32.mrb[24].mxu1 }
0x1aaf   :  { %v21912_v2 = vadd.f32 %v19190_v62, %v13151_v44  ;;  %v13053_v12 = vpop.f32.mrb[25].mxu1 }
0x1ab0   :  { %v21913_v50 = vadd.f32 %v13151_v44, %v13053_v12 }
0x1ab1   :  { %13108 = vst [vmem:[#allocation12 + $0x48] sm:$0xff] %v21912_v2 }
0x1ab2   :  { %13107 = vst [vmem:[#allocation12 + $0x40] sm:$0xff] %v21913_v50  ;;  %v19193_v17 = vpop.f32.mrb[26].mxu1 }
0x1ab3   :  { %v21914_v45 = vadd.f32 %v19193_v17, %v13151_v44  ;;  %v13065_v49 = vpop.f32.mrb[27].mxu1 }
0x1ab4   :  { %v21915_v4 = vadd.f32 %v13151_v44, %v13065_v49 }
0x1ab5   :  { %13110 = vst [vmem:[#allocation12 + $0x58] sm:$0xff] %v21914_v45 }
0x1ab6   :  { %13109 = vst [vmem:[#allocation12 + $0x50] sm:$0xff] %v21915_v4  ;;  %v19196_v38 = vpop.f32.mrb[28].mxu1 }
0x1ab7   :  { %v21916_v56 = vadd.f32 %v19196_v38, %v13151_v44  ;;  %v13077_v27 = vpop.f32.mrb[29].mxu1 }
0x1ab8   :  { %v21917_v33 = vadd.f32 %v13151_v44, %v13077_v27 }
0x1ab9   :  { %13112 = vst [vmem:[#allocation12 + $0x68] sm:$0xff] %v21916_v56 }
0x1aba   :  { %13111 = vst [vmem:[#allocation12 + $0x60] sm:$0xff] %v21917_v33  ;;  %v19199_v21 = vpop.f32.mrb[30].mxu1 }
0x1abb   :  { %v21918_v37 = vadd.f32 %v19199_v21, %v13151_v44  ;;  %v13089_v52 = vpop.f32.mrb[31].mxu1 }
0x1abc   :  { %v21919_v19 = vadd.f32 %v13151_v44, %v13089_v52 }
0x1abd   :  { %13114 = vst [vmem:[#allocation12 + $0x78] sm:$0xff] %v21918_v37 }
0x1abe   :  { %13113 = vst [vmem:[#allocation12 + $0x70] sm:$0xff] %v21919_v19 }
0x1abf   :  { %22427 = shalt.err (!%p22424_p10)
}
0x1ac0   :  { %s22428_s14 = scalar_lea.hbm %s26053_s7, 2048 }
0x1ac1   :  { %p22429_p11 = scmp.ne.s32.totalorder %s26053_s7, %s22428_s14  ;;  %p22432_p12 = scmp.lt.u32.totalorder %s22428_s14, %s26053_s7 }
0x1ac3   :  { %p22434_p13 = pnand %p22432_p12, %p22429_p11 }
0x1ac5   :  { %22437 = shalt.err (!%p22434_p13)
}
0x1ac6   :  { %13126 = dma.vmem_to_hbm [thread:$0]  %s13121_s8, 2048, %s26053_s7, [#allocation5], %s22451_s28, %s22451_s28, %s22452_s29  }
0x1ac7   :  { %22444 = dma.done.wait [#allocation5], 2048  }
0x1ac8   :  { %22445 = vsyncadd [#allocation5], 4294965248 }
0x1ac9   :  { %22446 = dma.done.wait [#allocation14], 2048  }
0x1aca   :  { %22447 = vsyncadd [#allocation14], 4294965248 }
0x1acb   :  { %13145 = vsyncpa [#allocation4], 1 }
0x1acc   :  { %13146 = vsyncpa [#allocation7], 1 }
0x1acd   :  { %13147 = vsyncpa [#allocation10], 1 }
0x1ace   :  { %13148 = vsyncpa [#allocation5], 1 }
0x1acf   :  { %13149 = vsyncpa [#allocation14], 1 }

</bundles_post_ra>
